<compile_context>
chip_gen: v7x
topology: tpu7x:2x2x1
jax: 0.10.0
libtpu: 0.0.40
codegen_flags: <defaults>
</compile_context>

<pallas_src>
import jax
import jax.numpy as jnp
import numpy as np
from jax.experimental import pallas as pl
from jax.experimental.pallas import tpu as pltpu


# ------------------------------ fused kernel ------------------------------ #

def _fpn_kernel(c3_ref, c4_ref, u_ref, w3_ref, b3_ref, w4_ref, b4_ref,
                wtd_ref, btd_ref, o3_ref, o4_ref, xpad_ref):
    _, H, W, Cin3 = c3_ref.shape          # (1, 16, 16, 128)
    _, H4, W4, Cin4 = c4_ref.shape        # (1, 8, 8, 512)
    C = w3_ref.shape[1]                   # out_channels

    # ---- lateral 1x1 convs: per-pixel matmuls (bf16 operands, f32 accumulate) ----
    c3f = c3_ref[0].reshape(H * W, Cin3)
    p3 = jnp.dot(c3f.astype(jnp.bfloat16), w3_ref[...],
                 preferred_element_type=jnp.float32) + b3_ref[...]

    c4f = c4_ref[0].reshape(H4 * W4, Cin4)
    p4 = jnp.dot(c4f.astype(jnp.bfloat16), w4_ref[...],
                 preferred_element_type=jnp.float32)
    # Nearest 2x upsample of p4 as a one-hot row-duplication matmul (f32, exact).
    # Bias added afterwards is equivalent since every row of U is one-hot.
    p4u = jnp.dot(u_ref[...], p4, preferred_element_type=jnp.float32) + b4_ref[...]

    # ---- fused add + zero padding (pad=1) into a VMEM scratch tile ----
    x = (p3 + p4u).reshape(H, W, C)
    xpad_ref[...] = jnp.zeros(xpad_ref.shape, xpad_ref.dtype)
    xpad_ref[1:H + 1, 1:W + 1, :] = x

    # ---- 3x3 conv via im2col: 9 shifted slabs -> one matmul with K = 9*C ----
    slabs = []
    for dy in range(3):
        for dx in range(3):
            slabs.append(xpad_ref[dy:dy + H, dx:dx + W, :].reshape(H * W, C))
    im2col = jnp.concatenate(slabs, axis=-1)                         # (H*W, 9C)
    p3c = jnp.dot(im2col.astype(jnp.bfloat16), wtd_ref[...],
                  preferred_element_type=jnp.float32) + btd_ref[...]

    # ---- nearest 2x upsample to 32x32, written lane-dense as (2H, W, 2C) ----
    # packed[h, w2, :] = [pix(h, 2*w2), pix(h, 2*w2+1)] and both equal src[h//2, w2],
    # so W-repeat is a lane concat and H-repeat only touches leading dims.
    def up2_lane_dense(y_flat):
        y = y_flat.reshape(H, W, C)
        y = jnp.concatenate([y, y], axis=-1)                          # (H, W, 2C)
        y = jnp.broadcast_to(y[:, None], (H, 2, W, 2 * C))
        return y.reshape(2 * H, W, 2 * C)

    o3_ref[0] = up2_lane_dense(p3c)
    o4_ref[0] = up2_lane_dense(p4u)


# --------------------------------- wrapper --------------------------------- #

def fpn_forward(c3_nchw, c4_nchw, params):
    c3 = jnp.transpose(c3_nchw, (0, 2, 3, 1)).astype(jnp.float32)    # NCHW -> NHWC
    c4 = jnp.transpose(c4_nchw, (0, 2, 3, 1)).astype(jnp.float32)

    N, H, W, _ = c3.shape
    _, H4, W4, _ = c4.shape
    C = params["w_lat3"].shape[1]
    assert H == 2 * H4 and W == 2 * W4          # p4 -> p3 nearest upsample is 2x
    assert (2 * H, 2 * W) == (32, 32)           # module hard-codes 32x32 final size

    # Trace-time constant: one-hot 2x nearest-upsample operator. Row (h*W + w)
    # selects source pixel (h//2, w//2) of the H4 x W4 grid.
    r = np.arange(H * W)
    src = ((r // W) // 2) * W4 + (r % W) // 2
    u = jnp.asarray(np.eye(H4 * W4, dtype=np.float32)[src])          # (H*W, H4*W4)

    # Pre-shape weights once (trace time): bf16 MXU operands, f32 biases.
    w3 = params["w_lat3"].astype(jnp.bfloat16)                       # (128, C)
    w4 = params["w_lat4"].astype(jnp.bfloat16)                       # (512, C)
    wtd = params["w_td4"].reshape(9 * C, C).astype(jnp.bfloat16)     # HWIO -> (9C, C)
    b3 = params["b_lat3"].reshape(1, C).astype(jnp.float32)
    b4 = params["b_lat4"].reshape(1, C).astype(jnp.float32)
    btd = params["b_td4"].reshape(1, C).astype(jnp.float32)

    def full2d(shp):
        return pl.BlockSpec(shp, lambda n: (0, 0))

    out_sds = jax.ShapeDtypeStruct((N, 2 * H, W, 2 * C), jnp.float32)
    out_spec = pl.BlockSpec((1, 2 * H, W, 2 * C), lambda n: (n, 0, 0, 0))

    o3, o4 = pl.pallas_call(
        _fpn_kernel,
        out_shape=(out_sds, out_sds),
        grid=(N,),
        in_specs=[
            pl.BlockSpec((1, H, W, c3.shape[-1]), lambda n: (n, 0, 0, 0)),
            pl.BlockSpec((1, H4, W4, c4.shape[-1]), lambda n: (n, 0, 0, 0)),
            full2d(u.shape),
            full2d(w3.shape), full2d(b3.shape),
            full2d(w4.shape), full2d(b4.shape),
            full2d(wtd.shape), full2d(btd.shape),
        ],
        out_specs=(out_spec, out_spec),
        scratch_shapes=[pltpu.VMEM((H + 2, W + 2, C), jnp.float32)],
        compiler_params=pltpu.CompilerParams(dimension_semantics=("parallel",)),
    )(c3, c4, u, w3, b3, w4, b4, wtd, btd)

    # lane-dense (N, 2H, W, 2C) -> (N, 2H, 2W, C) -> PyTorch NCHW
    p3_up = jnp.transpose(o3.reshape(N, 2 * H, 2 * W, C), (0, 3, 1, 2))
    p4_up = jnp.transpose(o4.reshape(N, 2 * H, 2 * W, C), (0, 3, 1, 2))
    return p3_up, p4_up


# ---------------------------- pure-JAX reference --------------------------- #

def ref_forward(c3_nchw, c4_nchw, params):
    def conv(x, w_oihw, b, pad):
        y = jax.lax.conv_general_dilated(
            x, w_oihw, (1, 1), pad, dimension_numbers=("NCHW", "OIHW", "NCHW"))
        return y + b.reshape(1, -1, 1, 1)

    def up(x, out_hw):
        N, C, H, W = x.shape
        x = jnp.repeat(x, out_hw[0] // H, axis=2)
        return jnp.repeat(x, out_hw[1] // W, axis=3)

    w_lat3 = params["w_lat3"].T[:, :, None, None]          # (C, 128, 1, 1)
    w_lat4 = params["w_lat4"].T[:, :, None, None]          # (C, 512, 1, 1)
    w_td4 = jnp.transpose(params["w_td4"], (3, 2, 0, 1))   # HWIO -> OIHW

    p4 = conv(c4_nchw, w_lat4, params["b_lat4"], "VALID")
    p3 = conv(c3_nchw, w_lat3, params["b_lat3"], "VALID")
    p3 = p3 + up(p4, p3.shape[-2:])
    p3 = conv(p3, w_td4, params["b_td4"], ((1, 1), (1, 1)))
    return up(p3, (32, 32)), up(p4, (32, 32))


# ---------------------------------- main ----------------------------------- #

if __name__ == "__main__":
    out_channels = 64
    N = 2
    key = jax.random.PRNGKey(0)
    k1, k2, k3, k4, k5, k6, kc3, kc4 = jax.random.split(key, 8)

    # Deterministic synthetic params (shapes from the module __init__).
    params = {
        "w_lat3": jax.random.normal(k1, (128, out_channels), jnp.float32) * 0.05,
        "b_lat3": jax.random.normal(k2, (out_channels,), jnp.float32) * 0.05,
        "w_lat4": jax.random.normal(k3, (512, out_channels), jnp.float32) * 0.05,
        "b_lat4": jax.random.normal(k4, (out_channels,), jnp.float32) * 0.05,
        "w_td4": jax.random.normal(k5, (3, 3, out_channels, out_channels),
                                   jnp.float32) * 0.05,
        "b_td4": jax.random.normal(k6, (out_channels,), jnp.float32) * 0.05,
    }

    # c3 has 128 channels, c4 has 512 channels (per the Conv2d in-channels).
    c3 = jax.random.normal(kc3, (N, 128, 16, 16), jnp.float32)
    c4 = jax.random.normal(kc4, (N, 512, 8, 8), jnp.float32)

    fpn_jit = jax.jit(fpn_forward)
    p3_up, p4_up = jax.block_until_ready(fpn_jit(c3, c4, params))
    r3, r4 = jax.block_until_ready(ref_forward(c3, c4, params))

    assert p3_up.shape == (N, out_channels, 32, 32)
    assert p4_up.shape == (N, out_channels, 32, 32)
    np.testing.assert_allclose(np.asarray(p3_up), np.asarray(r3), atol=5e-2, rtol=5e-2)
    np.testing.assert_allclose(np.asarray(p4_up), np.asarray(r4), atol=5e-2, rtol=5e-2)

    print("KERNEL_OK")
</pallas_src>

<mosaic_0001>
module attributes {stable_mosaic.version = 11 : i64} {
  func.func @_fpn_kernel(%arg0: i32, %arg1: memref<1x16x16x128xf32, #tpu.memory_space<vmem>>, %arg2: memref<1x8x8x512xf32, #tpu.memory_space<vmem>>, %arg3: memref<256x64xf32, #tpu.memory_space<vmem>>, %arg4: memref<128x64xbf16, #tpu.memory_space<vmem>>, %arg5: memref<1x64xf32, #tpu.memory_space<vmem>>, %arg6: memref<512x64xbf16, #tpu.memory_space<vmem>>, %arg7: memref<1x64xf32, #tpu.memory_space<vmem>>, %arg8: memref<576x64xbf16, #tpu.memory_space<vmem>>, %arg9: memref<1x64xf32, #tpu.memory_space<vmem>>, %arg10: memref<1x32x16x128xf32, #tpu.memory_space<vmem>>, %arg11: memref<1x32x16x128xf32, #tpu.memory_space<vmem>>, %arg12: memref<18x18x64xf32, #tpu.memory_space<vmem>>) attributes {dimension_semantics = [#tpu.dimension_semantics<parallel>], iteration_bounds = array<i64: 2>, scalar_prefetch = 0 : i64, scratch_operands = 1 : i64, tpu.core_type = #tpu.core_type<tc>, window_params = [{transform_indices = @transform_0, window_bounds = array<i64: 1, 16, 16, 128>}, {transform_indices = @transform_1, window_bounds = array<i64: 1, 8, 8, 512>}, {pipeline_mode = #tpu.pipeline_mode<synchronous>, transform_indices = @transform_2, window_bounds = array<i64: 256, 64>}, {pipeline_mode = #tpu.pipeline_mode<synchronous>, transform_indices = @transform_3, window_bounds = array<i64: 128, 64>}, {pipeline_mode = #tpu.pipeline_mode<synchronous>, transform_indices = @transform_4, window_bounds = array<i64: 1, 64>}, {pipeline_mode = #tpu.pipeline_mode<synchronous>, transform_indices = @transform_5, window_bounds = array<i64: 512, 64>}, {pipeline_mode = #tpu.pipeline_mode<synchronous>, transform_indices = @transform_6, window_bounds = array<i64: 1, 64>}, {pipeline_mode = #tpu.pipeline_mode<synchronous>, transform_indices = @transform_7, window_bounds = array<i64: 576, 64>}, {pipeline_mode = #tpu.pipeline_mode<synchronous>, transform_indices = @transform_8, window_bounds = array<i64: 1, 64>}, {transform_indices = @transform_9, window_bounds = array<i64: 1, 32, 16, 128>}, {transform_indices = @transform_10, window_bounds = array<i64: 1, 32, 16, 128>}]} {
    %c0 = arith.constant 0 : index
    %c0_0 = arith.constant 0 : index
    %c0_1 = arith.constant 0 : index
    %c0_2 = arith.constant 0 : index
    %0 = vector.load %arg1[%c0, %c0_0, %c0_1, %c0_2] : memref<1x16x16x128xf32, #tpu.memory_space<vmem>>, vector<1x16x16x128xf32>
    %1 = vector.shape_cast %0 : vector<1x16x16x128xf32> to vector<16x16x128xf32>
    %2 = vector.shape_cast %1 : vector<16x16x128xf32> to vector<256x128xf32>
    %3 = arith.truncf %2 : vector<256x128xf32> to vector<256x128xbf16>
    %c0_3 = arith.constant 0 : index
    %c0_4 = arith.constant 0 : index
    %4 = vector.load %arg4[%c0_3, %c0_4] : memref<128x64xbf16, #tpu.memory_space<vmem>>, vector<128x64xbf16>
    %cst = arith.constant dense<0.000000e+00> : vector<256x64xf32>
    %5 = tpu.matmul %3, %4, %cst {dimension_numbers = #tpu.dot_dimension_numbers<[1], [0], [0], [1], [0, 0, 1, 1], [], []>} : vector<256x128xbf16>, vector<128x64xbf16>, vector<256x64xf32> -> vector<256x64xf32>
    %c0_5 = arith.constant 0 : index
    %c0_6 = arith.constant 0 : index
    %6 = vector.load %arg5[%c0_5, %c0_6] : memref<1x64xf32, #tpu.memory_space<vmem>>, vector<1x64xf32>
    %7 = vector.broadcast %6 : vector<1x64xf32> to vector<256x64xf32>
    %8 = arith.addf %5, %7 : vector<256x64xf32>
    %c0_7 = arith.constant 0 : index
    %c0_8 = arith.constant 0 : index
    %c0_9 = arith.constant 0 : index
    %c0_10 = arith.constant 0 : index
    %9 = vector.load %arg2[%c0_7, %c0_8, %c0_9, %c0_10] : memref<1x8x8x512xf32, #tpu.memory_space<vmem>>, vector<1x8x8x512xf32>
    %10 = vector.shape_cast %9 : vector<1x8x8x512xf32> to vector<8x8x512xf32>
    %11 = vector.shape_cast %10 : vector<8x8x512xf32> to vector<64x512xf32>
    %12 = arith.truncf %11 : vector<64x512xf32> to vector<64x512xbf16>
    %c0_11 = arith.constant 0 : index
    %c0_12 = arith.constant 0 : index
    %13 = vector.load %arg6[%c0_11, %c0_12] : memref<512x64xbf16, #tpu.memory_space<vmem>>, vector<512x64xbf16>
    %cst_13 = arith.constant dense<0.000000e+00> : vector<64x64xf32>
    %14 = tpu.matmul %12, %13, %cst_13 {dimension_numbers = #tpu.dot_dimension_numbers<[1], [0], [0], [1], [0, 0, 1, 1], [], []>} : vector<64x512xbf16>, vector<512x64xbf16>, vector<64x64xf32> -> vector<64x64xf32>
    %c0_14 = arith.constant 0 : index
    %c0_15 = arith.constant 0 : index
    %15 = vector.load %arg3[%c0_14, %c0_15] : memref<256x64xf32, #tpu.memory_space<vmem>>, vector<256x64xf32>
    %cst_16 = arith.constant dense<0.000000e+00> : vector<256x64xf32>
    %16 = tpu.matmul %15, %14, %cst_16 {dimension_numbers = #tpu.dot_dimension_numbers<[1], [0], [0], [1], [0, 0, 1, 1], [], []>} : vector<256x64xf32>, vector<64x64xf32>, vector<256x64xf32> -> vector<256x64xf32>
    %c0_17 = arith.constant 0 : index
    %c0_18 = arith.constant 0 : index
    %17 = vector.load %arg7[%c0_17, %c0_18] : memref<1x64xf32, #tpu.memory_space<vmem>>, vector<1x64xf32>
    %18 = vector.broadcast %17 : vector<1x64xf32> to vector<256x64xf32>
    %19 = arith.addf %16, %18 : vector<256x64xf32>
    %20 = arith.addf %8, %19 : vector<256x64xf32>
    %21 = vector.shape_cast %20 : vector<256x64xf32> to vector<16x16x64xf32>
    %cst_19 = arith.constant 0.000000e+00 : f32
    %22 = vector.broadcast %cst_19 : f32 to vector<18x18x64xf32>
    %c0_20 = arith.constant 0 : index
    %c0_21 = arith.constant 0 : index
    %c0_22 = arith.constant 0 : index
    %23 = vector.load %arg12[%c0_20, %c0_21, %c0_22] : memref<18x18x64xf32, #tpu.memory_space<vmem>>, vector<18x18x64xf32>
    tpu.vector_store %arg12[%c0_20, %c0_21, %c0_22], %22 {strides = array<i32>} : memref<18x18x64xf32, #tpu.memory_space<vmem>>, vector<18x18x64xf32>,
    %c1 = arith.constant 1 : index
    %c1_23 = arith.constant 1 : index
    %c0_24 = arith.constant 0 : index
    %24 = vector.load %arg12[%c1, %c1_23, %c0_24] : memref<18x18x64xf32, #tpu.memory_space<vmem>>, vector<16x16x64xf32>
    tpu.vector_store %arg12[%c1, %c1_23, %c0_24], %21 {strides = array<i32>} : memref<18x18x64xf32, #tpu.memory_space<vmem>>, vector<16x16x64xf32>,
    %c0_25 = arith.constant 0 : index
    %c0_26 = arith.constant 0 : index
    %c0_27 = arith.constant 0 : index
    %25 = vector.load %arg12[%c0_25, %c0_26, %c0_27] : memref<18x18x64xf32, #tpu.memory_space<vmem>>, vector<16x16x64xf32>
    %26 = vector.shape_cast %25 : vector<16x16x64xf32> to vector<256x64xf32>
    %c0_28 = arith.constant 0 : index
    %c1_29 = arith.constant 1 : index
    %c0_30 = arith.constant 0 : index
    %27 = vector.load %arg12[%c0_28, %c1_29, %c0_30] : memref<18x18x64xf32, #tpu.memory_space<vmem>>, vector<16x16x64xf32>
    %28 = vector.shape_cast %27 : vector<16x16x64xf32> to vector<256x64xf32>
    %c0_31 = arith.constant 0 : index
    %c2 = arith.constant 2 : index
    %c0_32 = arith.constant 0 : index
    %29 = vector.load %arg12[%c0_31, %c2, %c0_32] : memref<18x18x64xf32, #tpu.memory_space<vmem>>, vector<16x16x64xf32>
    %30 = vector.shape_cast %29 : vector<16x16x64xf32> to vector<256x64xf32>
    %c1_33 = arith.constant 1 : index
    %c0_34 = arith.constant 0 : index
    %c0_35 = arith.constant 0 : index
    %31 = vector.load %arg12[%c1_33, %c0_34, %c0_35] : memref<18x18x64xf32, #tpu.memory_space<vmem>>, vector<16x16x64xf32>
    %32 = vector.shape_cast %31 : vector<16x16x64xf32> to vector<256x64xf32>
    %c1_36 = arith.constant 1 : index
    %c1_37 = arith.constant 1 : index
    %c0_38 = arith.constant 0 : index
    %33 = vector.load %arg12[%c1_36, %c1_37, %c0_38] : memref<18x18x64xf32, #tpu.memory_space<vmem>>, vector<16x16x64xf32>
    %34 = vector.shape_cast %33 : vector<16x16x64xf32> to vector<256x64xf32>
    %c1_39 = arith.constant 1 : index
    %c2_40 = arith.constant 2 : index
    %c0_41 = arith.constant 0 : index
    %35 = vector.load %arg12[%c1_39, %c2_40, %c0_41] : memref<18x18x64xf32, #tpu.memory_space<vmem>>, vector<16x16x64xf32>
    %36 = vector.shape_cast %35 : vector<16x16x64xf32> to vector<256x64xf32>
    %c2_42 = arith.constant 2 : index
    %c0_43 = arith.constant 0 : index
    %c0_44 = arith.constant 0 : index
    %37 = vector.load %arg12[%c2_42, %c0_43, %c0_44] : memref<18x18x64xf32, #tpu.memory_space<vmem>>, vector<16x16x64xf32>
    %38 = vector.shape_cast %37 : vector<16x16x64xf32> to vector<256x64xf32>
    %c2_45 = arith.constant 2 : index
    %c1_46 = arith.constant 1 : index
    %c0_47 = arith.constant 0 : index
    %39 = vector.load %arg12[%c2_45, %c1_46, %c0_47] : memref<18x18x64xf32, #tpu.memory_space<vmem>>, vector<16x16x64xf32>
    %40 = vector.shape_cast %39 : vector<16x16x64xf32> to vector<256x64xf32>
    %c2_48 = arith.constant 2 : index
    %c2_49 = arith.constant 2 : index
    %c0_50 = arith.constant 0 : index
    %41 = vector.load %arg12[%c2_48, %c2_49, %c0_50] : memref<18x18x64xf32, #tpu.memory_space<vmem>>, vector<16x16x64xf32>
    %42 = vector.shape_cast %41 : vector<16x16x64xf32> to vector<256x64xf32>
    %43 = tpu.concatenate %26, %28, %30, %32, %34, %36, %38, %40, %42 in 1 : vector<256x64xf32>, vector<256x64xf32>, vector<256x64xf32>, vector<256x64xf32>, vector<256x64xf32>, vector<256x64xf32>, vector<256x64xf32>, vector<256x64xf32>, vector<256x64xf32> -> vector<256x576xf32>
    %44 = arith.truncf %43 : vector<256x576xf32> to vector<256x576xbf16>
    %c0_51 = arith.constant 0 : index
    %c0_52 = arith.constant 0 : index
    %45 = vector.load %arg8[%c0_51, %c0_52] : memref<576x64xbf16, #tpu.memory_space<vmem>>, vector<576x64xbf16>
    %cst_53 = arith.constant dense<0.000000e+00> : vector<256x64xf32>
    %46 = tpu.matmul %44, %45, %cst_53 {dimension_numbers = #tpu.dot_dimension_numbers<[1], [0], [0], [1], [0, 0, 1, 1], [], []>} : vector<256x576xbf16>, vector<576x64xbf16>, vector<256x64xf32> -> vector<256x64xf32>
    %c0_54 = arith.constant 0 : index
    %c0_55 = arith.constant 0 : index
    %47 = vector.load %arg9[%c0_54, %c0_55] : memref<1x64xf32, #tpu.memory_space<vmem>>, vector<1x64xf32>
    %48 = vector.broadcast %47 : vector<1x64xf32> to vector<256x64xf32>
    %49 = arith.addf %46, %48 : vector<256x64xf32>
    %50 = vector.shape_cast %49 : vector<256x64xf32> to vector<16x16x64xf32>
    %51 = tpu.concatenate %50, %50 in 2 : vector<16x16x64xf32>, vector<16x16x64xf32> -> vector<16x16x128xf32>
    %52 = vector.shape_cast %51 : vector<16x16x128xf32> to vector<16x1x16x128xf32>
    %53 = vector.shape_cast %52 : vector<16x1x16x128xf32> to vector<16x1x16x128xf32>
    %54 = vector.broadcast %53 : vector<16x1x16x128xf32> to vector<16x2x16x128xf32>
    %55 = vector.shape_cast %54 : vector<16x2x16x128xf32> to vector<32x16x128xf32>
    %c0_56 = arith.constant 0 : index
    %c0_57 = arith.constant 0 : index
    %c0_58 = arith.constant 0 : index
    %c0_59 = arith.constant 0 : index
    %56 = vector.load %arg10[%c0_56, %c0_57, %c0_58, %c0_59] : memref<1x32x16x128xf32, #tpu.memory_space<vmem>>, vector<1x32x16x128xf32>
    %57 = vector.shape_cast %56 : vector<1x32x16x128xf32> to vector<32x16x128xf32>
    %58 = vector.shape_cast %55 : vector<32x16x128xf32> to vector<1x32x16x128xf32>
    tpu.vector_store %arg10[%c0_56, %c0_57, %c0_58, %c0_59], %58 {strides = array<i32>} : memref<1x32x16x128xf32, #tpu.memory_space<vmem>>, vector<1x32x16x128xf32>,
    %59 = vector.shape_cast %19 : vector<256x64xf32> to vector<16x16x64xf32>
    %60 = tpu.concatenate %59, %59 in 2 : vector<16x16x64xf32>, vector<16x16x64xf32> -> vector<16x16x128xf32>
    %61 = vector.shape_cast %60 : vector<16x16x128xf32> to vector<16x1x16x128xf32>
    %62 = vector.shape_cast %61 : vector<16x1x16x128xf32> to vector<16x1x16x128xf32>
    %63 = vector.broadcast %62 : vector<16x1x16x128xf32> to vector<16x2x16x128xf32>
    %64 = vector.shape_cast %63 : vector<16x2x16x128xf32> to vector<32x16x128xf32>
    %c0_60 = arith.constant 0 : index
    %c0_61 = arith.constant 0 : index
    %c0_62 = arith.constant 0 : index
    %c0_63 = arith.constant 0 : index
    %65 = vector.load %arg11[%c0_60, %c0_61, %c0_62, %c0_63] : memref<1x32x16x128xf32, #tpu.memory_space<vmem>>, vector<1x32x16x128xf32>
    %66 = vector.shape_cast %65 : vector<1x32x16x128xf32> to vector<32x16x128xf32>
    %67 = vector.shape_cast %64 : vector<32x16x128xf32> to vector<1x32x16x128xf32>
    tpu.vector_store %arg11[%c0_60, %c0_61, %c0_62, %c0_63], %67 {strides = array<i32>} : memref<1x32x16x128xf32, #tpu.memory_space<vmem>>, vector<1x32x16x128xf32>,
    return
  }
  func.func @transform_0(%arg0: i32) -> (i32, i32, i32, i32) {
    %c0_i32 = arith.constant 0 : i32
    %c0_i32_0 = arith.constant 0 : i32
    %c0_i32_1 = arith.constant 0 : i32
    %c0_i32_2 = arith.constant 0 : i32
    return %arg0, %c0_i32, %c0_i32_0, %c0_i32_1 : i32, i32, i32, i32
  }
  func.func @transform_1(%arg0: i32) -> (i32, i32, i32, i32) {
    %c0_i32 = arith.constant 0 : i32
    %c0_i32_0 = arith.constant 0 : i32
    %c0_i32_1 = arith.constant 0 : i32
    %c0_i32_2 = arith.constant 0 : i32
    return %arg0, %c0_i32, %c0_i32_0, %c0_i32_1 : i32, i32, i32, i32
  }
  func.func @transform_2(%arg0: i32) -> (i32, i32) {
    %c0_i32 = arith.constant 0 : i32
    %c0_i32_0 = arith.constant 0 : i32
    %c0_i32_1 = arith.constant 0 : i32
    return %c0_i32, %c0_i32_0 : i32, i32
  }
  func.func @transform_3(%arg0: i32) -> (i32, i32) {
    %c0_i32 = arith.constant 0 : i32
    %c0_i32_0 = arith.constant 0 : i32
    %c0_i32_1 = arith.constant 0 : i32
    return %c0_i32, %c0_i32_0 : i32, i32
  }
  func.func @transform_4(%arg0: i32) -> (i32, i32) {
    %c0_i32 = arith.constant 0 : i32
    %c0_i32_0 = arith.constant 0 : i32
    %c0_i32_1 = arith.constant 0 : i32
    return %c0_i32, %c0_i32_0 : i32, i32
  }
  func.func @transform_5(%arg0: i32) -> (i32, i32) {
    %c0_i32 = arith.constant 0 : i32
    %c0_i32_0 = arith.constant 0 : i32
    %c0_i32_1 = arith.constant 0 : i32
    return %c0_i32, %c0_i32_0 : i32, i32
  }
  func.func @transform_6(%arg0: i32) -> (i32, i32) {
    %c0_i32 = arith.constant 0 : i32
    %c0_i32_0 = arith.constant 0 : i32
    %c0_i32_1 = arith.constant 0 : i32
    return %c0_i32, %c0_i32_0 : i32, i32
  }
  func.func @transform_7(%arg0: i32) -> (i32, i32) {
    %c0_i32 = arith.constant 0 : i32
    %c0_i32_0 = arith.constant 0 : i32
    %c0_i32_1 = arith.constant 0 : i32
    return %c0_i32, %c0_i32_0 : i32, i32
  }
  func.func @transform_8(%arg0: i32) -> (i32, i32) {
    %c0_i32 = arith.constant 0 : i32
    %c0_i32_0 = arith.constant 0 : i32
    %c0_i32_1 = arith.constant 0 : i32
    return %c0_i32, %c0_i32_0 : i32, i32
  }
  func.func @transform_9(%arg0: i32) -> (i32, i32, i32, i32) {
    %c0_i32 = arith.constant 0 : i32
    %c0_i32_0 = arith.constant 0 : i32
    %c0_i32_1 = arith.constant 0 : i32
    %c0_i32_2 = arith.constant 0 : i32
    return %arg0, %c0_i32, %c0_i32_0, %c0_i32_1 : i32, i32, i32, i32
  }
  func.func @transform_10(%arg0: i32) -> (i32, i32, i32, i32) {
    %c0_i32 = arith.constant 0 : i32
    %c0_i32_0 = arith.constant 0 : i32
    %c0_i32_1 = arith.constant 0 : i32
    %c0_i32_2 = arith.constant 0 : i32
    return %arg0, %c0_i32, %c0_i32_0, %c0_i32_1 : i32, i32, i32, i32
  }
}

</mosaic_0001>

<bundles_post_ra>
// kernel: fpn_forward.1
= control target key start
LH: loop header
LB: loop body
LE: loop exit
PB: predicated region body
PF: predicated region fallthrough
CT: control target
= control target key end

     0   :  { %s5147_s13 = smov 0   ;;  %s7170_s0 = inlined_call_operand.vmem [shape: f32[2,16,16,128], index: 0, kind: input, shape index: {}]   ;;  %s7171_s1 = inlined_call_operand.vmem [shape: f32[2,8,8,512], index: 1, kind: input, shape index: {}]   ;;  %s7172_s2 = inlined_call_operand.vmem [shape: f32[256,64], index: 2, kind: input, shape index: {}]   ;;  %s7173_s3 = inlined_call_operand.vmem [shape: bf16[128,64], index: 3, kind: input, shape index: {}]   ;;  %s7174_s4 = inlined_call_operand.vmem [shape: f32[1,64], index: 4, kind: input, shape index: {}]   ;;  %s7175_s5 = inlined_call_operand.vmem [shape: bf16[512,64], index: 5, kind: input, shape index: {}]   ;;  %s7176_s6 = inlined_call_operand.vmem [shape: f32[1,64], index: 6, kind: input, shape index: {}]   ;;  %s7177_s7 = inlined_call_operand.vmem [shape: bf16[576,64], index: 7, kind: input, shape index: {}]   ;;  %s7178_s8 = inlined_call_operand.vmem [shape: f32[1,64], index: 8, kind: input, shape index: {}]   ;;  %s7179_s9 = inlined_call_operand.vmem [shape: f32[2,32,16,128], index: 9, kind: output, shape index: {0}]   ;;  %s7180_s10 = inlined_call_operand.vmem [shape: f32[2,32,16,128], index: 10, kind: output, shape index: {1}]  }
   0x1 LB: > { %s3972_s14 = sadd.s32 4294967295, %s5088_s13   ;;  %p3976_p0 = scmp.ge.s32.totalorder %s5088_s13, 1  ;;  %s5088_s13 = sphi %s5147_s13, %s21_s13  }
   0x2   : > { %p325_p1 = scmp.lt.s32.totalorder %s5088_s13, 3 }
   0x4   : > { %p326_p2 = pnand %p3976_p0, %p325_p1 }
   0x6   : > { %329 = sbr.rel (%p326_p2) target bundleno = 1203 (0x4b3), region = 56 }
   0xd   : > { %v5004_v0 = vld [vmem:[%s7175_s5 + $0x40] sm:$0xff]   ;;  %v5006_v2 = vld [vmem:[%s7175_s5 + $0x48] sm:$0xff]   ;;  %p373_p3 = scmp.lt.s32.totalorder %s3972_s14, 1  ;;  %v5008_v4 = vld [vmem:[%s7175_s5 + $0x50] sm:$0xff]   ;;  %vm1147_vm0 = vcmask 523264   ;;  %vm1503_vm1 = vcmask 517120  }
   0xe   : > { %v5005_v1 = vld [vmem:[%s7175_s5] sm:$0xff]   ;;  %4142 = vmatprep.subr.bf16.mxu1 %v5004_v0  ;;  %v5007_v3 = vld [vmem:[%s7175_s5 + $0x8] sm:$0xff]   ;;  %v5009_v5 = vld [vmem:[%s7175_s5 + $0x10] sm:$0xff]   ;;  %s5091_s17 = smov 64  }
   0xf   : > { %4143 = vmatpush3.bf16.msra.mxu1 %v5005_v1  ;;  %s7259_s14 = smov (!%p373_p3, %s3972_s14), 1  ;;  %v5010_v6 = vld [vmem:[%s7175_s5 + $0x58] sm:$0xff]   ;;  %v5012_v8 = vld [vmem:[%s7175_s5 + $0x60] sm:$0xff]   ;;  %v5014_v10 = vld [vmem:[%s7175_s5 + $0x68] sm:$0xff]  }
  0x10   : > { %4144 = vmatprep.subr.bf16.mxu1 %v5006_v2  ;;  %s4114_s29 = sshll.u32 %s7259_s14, 8  ;;  %v5011_v7 = vld [vmem:[%s7175_s5 + $0x18] sm:$0xff]   ;;  %v5013_v9 = vld [vmem:[%s7175_s5 + $0x20] sm:$0xff]   ;;  %v5015_v14 = vld [vmem:[%s7175_s5 + $0x28] sm:$0xff]  }
  0x11   : > { %s5190_s18 = scalar_lea.vmem %s7171_s1, %s4114_s29  ;;  %v5016_v15 = vld [vmem:[%s7175_s5 + $0x70] sm:$0xff]   ;;  %v5018_v17 = vld [vmem:[%s7175_s5 + $0x78] sm:$0xff]   ;;  %v5020_v21 = vld [vmem:[%s7175_s5 + $0xc0] sm:$0xff]   ;;  %s5322_s19 = scalar_lea.vmem %s7170_s0, %s4114_s29 }
  0x12   : > { %v675_v11 = vld [vmem:[%s5190_s18 + $0x8] sm:$0xff]  ;;  %v5017_v16 = vld [vmem:[%s7175_s5 + $0x30] sm:$0xff]   ;;  %v5019_v18 = vld [vmem:[%s7175_s5 + $0x38] sm:$0xff]  }
  0x13   : > { %4145 = vmatpush3.bf16.msra.mxu1 %v5007_v3  ;;  %v679_v12 = vld [vmem:[%s5190_s18 + $0x28] sm:$0xff]  ;;  %v674_v19 = vld [vmem:[%s5190_s18] sm:$0xff]  ;;  %v5024_v31 = vld [vmem:[%s7175_s5 + $0xd0] sm:$0xff]  }
  0x14   : > { %4146 = vmatprep.subr.bf16.mxu1 %v5008_v4  ;;  %v707_v13 = vpack.c.bf16 %v679_v12, %v675_v11  ;;  %v678_v20 = vld [vmem:[%s5190_s18 + $0x20] sm:$0xff]  ;;  %v683_v22 = vld [vmem:[%s5190_s18 + $0x48] sm:$0xff]  ;;  %v5025_v35 = vld [vmem:[%s7175_s5 + $0x90] sm:$0xff]  }
  0x15   : > { %v687_v23 = vld [vmem:[%s5190_s18 + $0x68] sm:$0xff]  ;;  %v706_v24 = vpack.c.bf16 %v678_v20, %v674_v19  ;;  %v5021_v25 = vld [vmem:[%s7175_s5 + $0x80] sm:$0xff]   ;;  %v5026_v37 = vld [vmem:[%s7175_s5 + $0xd8] sm:$0xff]  }
  0x16   : > { %1010 = vmatprep.mubr.bf16.mxu1 %v707_v13  ;;  %v711_v26 = vpack.c.bf16 %v687_v23, %v683_v22  ;;  %v5022_v27 = vld [vmem:[%s7175_s5 + $0xc8] sm:$0xff]   ;;  %v682_v29 = vld [vmem:[%s5190_s18 + $0x40] sm:$0xff]  ;;  %v5027_v38 = vld [vmem:[%s7175_s5 + $0x98] sm:$0xff]  }
  0x17   : > { %4147 = vmatpush3.bf16.msra.mxu1 %v5009_v5  ;;  %v5023_v28 = vld [vmem:[%s7175_s5 + $0x88] sm:$0xff]   ;;  %v686_v30 = vld [vmem:[%s5190_s18 + $0x60] sm:$0xff]  ;;  %v5038_v50 = vld [vmem:[%s7173_s3 + $0x10] sm:$0xff]  }
  0x18   : > { %4148 = vmatprep.subr.bf16.mxu1 %v5010_v6  ;;  %v691_v32 = vld [vmem:[%s5190_s18 + $0x88] sm:$0xff]  ;;  %v710_v34 = vpack.c.bf16 %v686_v30, %v682_v29  ;;  %v690_v39 = vld [vmem:[%s5190_s18 + $0x80] sm:$0xff]  ;;  %v5039_v54 = vld [vmem:[%s7173_s3 + $0x18] sm:$0xff]  }
  0x19   : > { %v695_v33 = vld [vmem:[%s5190_s18 + $0xa8] sm:$0xff]  ;;  %v694_v40 = vld [vmem:[%s5190_s18 + $0xa0] sm:$0xff]  ;;  %v5032_v55 = vld [vmem:[%s7175_s5 + $0xf0] sm:$0xff]  }
  0x1a   : > { %v715_v36 = vpack.c.bf16 %v695_v33, %v691_v32  ;;  %v5028_v41 = vld [vmem:[%s7175_s5 + $0xe0] sm:$0xff]   ;;  %v699_v42 = vld [vmem:[%s5190_s18 + $0xc8] sm:$0xff]  ;;  %v714_v46 = vpack.c.bf16 %v694_v40, %v690_v39  ;;  %v677_v56 = vld [vmem:[%s5190_s18 + $0x18] sm:$0xff] }
  0x1b   : > { %4149 = vmatpush3.bf16.msra.mxu1 %v5011_v7  ;;  %v703_v43 = vld [vmem:[%s5190_s18 + $0xe8] sm:$0xff]  ;;  %v5036_v44 = vld [vmem:[%s7173_s3] sm:$0xff]   ;;  %v681_v57 = vld [vmem:[%s5190_s18 + $0x38] sm:$0xff] }
  0x1c   : > { %4150 = vmatprep.subr.bf16.mxu1 %v5012_v8  ;;  %v5037_v45 = vld [vmem:[%s7173_s3 + $0x8] sm:$0xff]   ;;  %4506 = vmatprep.subr.bf16.mxu0 %v5036_v44  ;;  %v5029_v47 = vld [vmem:[%s7175_s5 + $0xa0] sm:$0xff]   ;;  %v719_v49 = vpack.c.bf16 %v703_v43, %v699_v42  ;;  %v5033_v58 = vld [vmem:[%s7175_s5 + $0xb0] sm:$0xff]   ;;  %v709_v62 = vpack.c.bf16 %v681_v57, %v677_v56 }
  0x1d   : > { %4507 = vmatpush3.bf16.msra.mxu0 %v5036_v44  ;;  %v5030_v48 = vld [vmem:[%s7175_s5 + $0xe8] sm:$0xff]   ;;  %v698_v52 = vld [vmem:[%s5190_s18 + $0xc0] sm:$0xff]  ;;  %v5034_v60 = vld [vmem:[%s7175_s5 + $0xf8] sm:$0xff]  }
  0x1e   : > { %4508 = vmatprep.subr.bf16.mxu0 %v5037_v45  ;;  %v5031_v51 = vld [vmem:[%s7175_s5 + $0xa8] sm:$0xff]   ;;  %v702_v53 = vld [vmem:[%s5190_s18 + $0xe0] sm:$0xff]  ;;  %v5035_v63 = vld [vmem:[%s7175_s5 + $0xb8] sm:$0xff]  }
  0x1f   : > { %4151 = vmatpush3.bf16.msra.mxu1 %v5013_v9  ;;  %v718_v59 = vpack.c.bf16 %v702_v53, %v698_v52  ;;  %v5040_v61 = vld [vmem:[%s7173_s3 + $0x20] sm:$0xff]   ;;  %v676_v0 = vld [vmem:[%s5190_s18 + $0x10] sm:$0xff]  ;;  %v5041_v2 = vld [vmem:[%s7173_s3 + $0x28] sm:$0xff]  }
  0x20   : > { %4152 = vmatprep.subr.bf16.mxu1 %v5014_v10  ;;  %v680_v1 = vld [vmem:[%s5190_s18 + $0x30] sm:$0xff]  ;;  %v685_v3 = vld [vmem:[%s5190_s18 + $0x58] sm:$0xff]  ;;  %v398_v30 = vld [vmem:[%s5322_s19 + $0x20] sm:$0xff] }
  0x21   : > { %4509 = vmatpush3.bf16.msra.mxu0 %v5037_v45  ;;  %v689_v4 = vld [vmem:[%s5190_s18 + $0x78] sm:$0xff]  ;;  %v5042_v5 = vld [vmem:[%s7173_s3 + $0x30] sm:$0xff]   ;;  %v708_v6 = vpack.c.bf16 %v680_v1, %v676_v0  ;;  %v406_v42 = vld [vmem:[%s5322_s19 + $0x60] sm:$0xff] }
  0x22   : > { %4510 = vmatprep.subr.bf16.mxu0 %v5038_v50  ;;  %v713_v7 = vpack.c.bf16 %v689_v4, %v685_v3  ;;  %v684_v8 = vld [vmem:[%s5190_s18 + $0x50] sm:$0xff]  ;;  %v693_v10 = vld [vmem:[%s5190_s18 + $0x98] sm:$0xff]  ;;  %v407_v43 = vld [vmem:[%s5322_s19 + $0x68] sm:$0xff] }
  0x23   : > { %4153 = vmatpush3.bf16.msra.mxu1 %v5015_v14  ;;  %v688_v9 = vld [vmem:[%s5190_s18 + $0x70] sm:$0xff]  ;;  %v697_v11 = vld [vmem:[%s5190_s18 + $0xb8] sm:$0xff]  ;;  %v432_v44 = vpack.c.bf16 %v407_v43, %v406_v42  ;;  %v423_v3 = vld [vmem:[%s5322_s19 + $0xe8] sm:$0xff] }
  0x24   : > { %4154 = vmatprep.subr.bf16.mxu1 %v5016_v15  ;;  %v712_v12 = vpack.c.bf16 %v688_v9, %v684_v8  ;;  %v717_v13 = vpack.c.bf16 %v697_v11, %v693_v10  ;;  %v692_v14 = vld [vmem:[%s5190_s18 + $0x90] sm:$0xff]  ;;  %v5043_v23 = vld [vmem:[%s7173_s3 + $0x38] sm:$0xff]   ;;  %v1108_v8 = vld [vmem:[%s7172_s2] sm:$0xff] }
  0x25   : > { %4511 = vmatpush3.bf16.msra.mxu0 %v5038_v50  ;;  %v696_v15 = vld [vmem:[%s5190_s18 + $0xb0] sm:$0xff]  ;;  %v405_v40 = vld [vmem:[%s5322_s19 + $0x58] sm:$0xff] }
  0x26   : > { %4512 = vmatprep.subr.bf16.mxu0 %v5039_v54  ;;  %v700_v20 = vld [vmem:[%s5190_s18 + $0xd0] sm:$0xff]  ;;  %v413_v52 = vld [vmem:[%s5322_s19 + $0x98] sm:$0xff] }
  0x27   : > { %4155 = vmatpush3.bf16.msra.mxu1 %v5017_v16  ;;  %v701_v16 = vld [vmem:[%s5190_s18 + $0xd8] sm:$0xff]  ;;  %v400_v33 = vld [vmem:[%s5322_s19 + $0x30] sm:$0xff] }
  0x28   : > { %4156 = vmatprep.subr.bf16.mxu1 %v5018_v17  ;;  %v705_v17 = vld [vmem:[%s5190_s18 + $0xf8] sm:$0xff]  ;;  %v404_v39 = vld [vmem:[%s5322_s19 + $0x50] sm:$0xff] }
  0x29   : > { %4513 = vmatpush3.bf16.msra.mxu0 %v5039_v54  ;;  %v721_v19 = vpack.c.bf16 %v705_v17, %v701_v16  ;;  %v408_v45 = vld [vmem:[%s5322_s19 + $0x70] sm:$0xff]  ;;  %v414_v54 = vld [vmem:[%s5322_s19 + $0xa0] sm:$0xff]  ;;  %v421_v0 = vld [vmem:[%s5322_s19 + $0xd8] sm:$0xff] }
  0x2a   : > { %4514 = vmatprep.subr.bf16.mxu0 %v5040_v61  ;;  %v416_v57 = vld [vmem:[%s5322_s19 + $0xb0] sm:$0xff] }
  0x2b   : > { %4157 = vmatpush3.bf16.msra.mxu1 %v5019_v18  ;;  %v716_v18 = vpack.c.bf16 %v696_v15, %v692_v14 }
  0x2c   : > { %4182 = vmatprep.subr.bf16.mxu1 %v5020_v21  ;;  %v704_v21 = vld [vmem:[%s5190_s18 + $0xf0] sm:$0xff] }
  0x2d   : > { %4515 = vmatpush3.bf16.msra.mxu0 %v5040_v61  ;;  %v720_v22 = vpack.c.bf16 %v704_v21, %v700_v20  ;;  %v419_v61 = vld [vmem:[%s5322_s19 + $0xc8] sm:$0xff] }
  0x2e   : > { %1011 = vmatmul.mubr.bf16.vlgmr.msra.gmra.mrb[0].mxu1 %v706_v24  ;;  %4516 = vmatprep.subr.bf16.mxu0 %v5041_v2  ;;  %v394_v24 = vld [vmem:[%s5322_s19] sm:$0xff] }
  0x2f   : > { %4183 = vmatpush3.bf16.msra.mxu1 %v5021_v25  ;;  %1018 = vmatprep.mubr.bf16.mxu1 %v711_v26  ;;  %v395_v25 = vld [vmem:[%s5322_s19 + $0x8] sm:$0xff] }
  0x30   : > { %4184 = vmatprep.subr.bf16.mxu1 %v5022_v27  ;;  %v426_v26 = vpack.c.bf16 %v395_v25, %v394_v24  ;;  %v396_v27 = vld [vmem:[%s5322_s19 + $0x10] sm:$0xff] }
  0x31   : > { %4517 = vmatpush3.bf16.msra.mxu0 %v5041_v2  ;;  %v422_v2 = vld [vmem:[%s5322_s19 + $0xe0] sm:$0xff] }
  0x32   : > { %4518 = vmatprep.subr.bf16.mxu0 %v5042_v5  ;;  %4522 = vmatprep.mubr.bf16.mxu0 %v426_v26  ;;  %v440_v4 = vpack.c.bf16 %v423_v3, %v422_v2 }
  0x33   : > { %4185 = vmatpush3.bf16.msra.mxu1 %v5023_v28  ;;  %v397_v28 = vld [vmem:[%s5322_s19 + $0x18] sm:$0xff] }
  0x34   : > { %4186 = vmatprep.subr.bf16.mxu1 %v5024_v31  ;;  %v427_v29 = vpack.c.bf16 %v397_v28, %v396_v27  ;;  %v399_v31 = vld [vmem:[%s5322_s19 + $0x28] sm:$0xff] }
  0x35   : > { %4519 = vmatpush3.bf16.msra.mxu0 %v5042_v5  ;;  %v428_v32 = vpack.c.bf16 %v399_v31, %v398_v30  ;;  %v424_v5 = vld [vmem:[%s5322_s19 + $0xf0] sm:$0xff] }
  0x36   : > { %1019 = vmatmul.mubr.bf16.gmra.mrb[4].mxu1 %v710_v34  ;;  %4520 = vmatprep.subr.bf16.mxu0 %v5043_v23  ;;  %v401_v34 = vld [vmem:[%s5322_s19 + $0x38] sm:$0xff] }
  0x37   : > { %4187 = vmatpush3.bf16.msra.mxu1 %v5025_v35  ;;  %1026 = vmatprep.mubr.bf16.mxu1 %v715_v36  ;;  %v429_v35 = vpack.c.bf16 %v401_v34, %v400_v33  ;;  %v402_v36 = vld [vmem:[%s5322_s19 + $0x40] sm:$0xff] }
  0x38   : > { %4188 = vmatprep.subr.bf16.mxu1 %v5026_v37  ;;  %v403_v37 = vld [vmem:[%s5322_s19 + $0x48] sm:$0xff] }
  0x39   : > { %4521 = vmatpush3.bf16.msra.mxu0 %v5043_v23 }
  0x3b   : > { %4189 = vmatpush3.bf16.msra.mxu1 %v5027_v38  ;;  %v430_v38 = vpack.c.bf16 %v403_v37, %v402_v36 }
  0x3c   : > { %4190 = vmatprep.subr.bf16.mxu1 %v5028_v41  ;;  %4523 = vmatmul.mubr.bf16.vlgmr.msra.gmra.mrb[0].mxu0 %v427_v29  ;;  %v431_v41 = vpack.c.bf16 %v405_v40, %v404_v39 }
  0x3d   : > { %4526 = vmatprep.mubr.bf16.mxu0 %v428_v32 }
  0x3e   : > { %1027 = vmatmul.mubr.bf16.gmra.mrb[8].mxu1 %v714_v46  ;;  %v409_v46 = vld [vmem:[%s5322_s19 + $0x78] sm:$0xff] }
  0x3f   : > { %4191 = vmatpush3.bf16.msra.mxu1 %v5029_v47  ;;  %1034 = vmatprep.mubr.bf16.mxu1 %v719_v49  ;;  %v433_v47 = vpack.c.bf16 %v409_v46, %v408_v45  ;;  %v411_v49 = vld [vmem:[%s5322_s19 + $0x88] sm:$0xff] }
  0x40   : > { %4192 = vmatprep.subr.bf16.mxu1 %v5030_v48  ;;  %v410_v48 = vld [vmem:[%s5322_s19 + $0x80] sm:$0xff] }
  0x41   : > { %v434_v50 = vpack.c.bf16 %v411_v49, %v410_v48 }
  0x43   : > { %4193 = vmatpush3.bf16.msra.mxu1 %v5031_v51  ;;  %v412_v51 = vld [vmem:[%s5322_s19 + $0x90] sm:$0xff] }
  0x44   : > { %4194 = vmatprep.subr.bf16.mxu1 %v5032_v55  ;;  %4527 = vmatmul.mubr.bf16.gmra.mrb[4].mxu0 %v429_v35  ;;  %v435_v53 = vpack.c.bf16 %v413_v52, %v412_v51  ;;  %v415_v55 = vld [vmem:[%s5322_s19 + $0xa8] sm:$0xff] }
  0x45   : > { %4530 = vmatprep.mubr.bf16.mxu0 %v430_v38  ;;  %v436_v56 = vpack.c.bf16 %v415_v55, %v414_v54 }
  0x46   : > { %1035 = vmatmul.mubr.bf16.gmra.mrb[12].mxu1 %v718_v59 }
  0x47   : > { %4195 = vmatpush3.bf16.msra.mxu1 %v5033_v58  ;;  %1075 = vmatprep.mubr.bf16.mxu1 %v709_v62  ;;  %v417_v58 = vld [vmem:[%s5322_s19 + $0xb8] sm:$0xff] }
  0x48   : > { %4196 = vmatprep.subr.bf16.mxu1 %v5034_v60  ;;  %v437_v59 = vpack.c.bf16 %v417_v58, %v416_v57  ;;  %v418_v60 = vld [vmem:[%s5322_s19 + $0xc0] sm:$0xff] }
  0x49   : > { %v438_v62 = vpack.c.bf16 %v419_v61, %v418_v60 }
  0x4b   : > { %4197 = vmatpush3.bf16.msra.mxu1 %v5035_v63  ;;  %v420_v63 = vld [vmem:[%s5322_s19 + $0xd0] sm:$0xff] }
  0x4c   : > { %4531 = vmatmul.mubr.bf16.gmra.mrb[8].mxu0 %v431_v41  ;;  %v439_v1 = vpack.c.bf16 %v421_v0, %v420_v63 }
  0x4d   : > { %4534 = vmatprep.mubr.bf16.mxu0 %v432_v44 }
  0x4e   : > { %1076 = vmatmul.mubr.bf16.vlgmr.msra.gmra.mrb[16].mxu1 %v708_v6  ;;  %v425_v6 = vld [vmem:[%s5322_s19 + $0xf8] sm:$0xff]  ;;  %s4116_s19 = sshll.u32 %s7259_s14, 9 }
  0x4f   : > { %1083 = vmatprep.mubr.bf16.mxu1 %v713_v7  ;;  %v441_v7 = vpack.c.bf16 %v425_v6, %v424_v5  ;;  %v1109_v5 = vld [vmem:[%s7172_s2 + $0x8] sm:$0xff]  ;;  %v1110_v6 = vld [vmem:[%s7172_s2 + $0x10] sm:$0xff]  ;;  %s6512_s20 = scalar_lea.vmem %s7180_s10, %s4116_s19  ;;  %s7029_s25 = scalar_lea.vmem %s7179_s9, %s4116_s19 }
  0x54   : > { %4535 = vmatmul.mubr.bf16.gmra.mrb[12].mxu0 %v433_v47 }
  0x55   : > { %4538 = vmatprep.mubr.bf16.mxu0 %v434_v50 }
  0x56   : > { %1084 = vmatmul.mubr.bf16.gmra.mrb[20].mxu1 %v712_v12 }
  0x57   : > { %1091 = vmatprep.mubr.bf16.mxu1 %v717_v13 }
  0x5c   : > { %4539 = vmatmul.mubr.bf16.gmra.mrb[16].mxu0 %v435_v53 }
  0x5d   : > { %4542 = vmatprep.mubr.bf16.mxu0 %v436_v56 }
  0x5e   : > { %1092 = vmatmul.mubr.bf16.gmra.mrb[24].mxu1 %v716_v18 }
  0x5f   : > { %1099 = vmatprep.mubr.bf16.mxu1 %v721_v19 }
  0x64   : > { %4543 = vmatmul.mubr.bf16.gmra.mrb[20].mxu0 %v437_v59 }
  0x65   : > { %4546 = vmatprep.mubr.bf16.mxu0 %v438_v62 }
  0x66   : > { %1100 = vmatmul.mubr.bf16.gmra.mrb[28].mxu1 %v720_v22 }
  0x6c   : > { %4547 = vmatmul.mubr.bf16.gmra.mrb[24].mxu0 %v439_v1 }
  0x6d   : > { %4550 = vmatprep.mubr.bf16.mxu0 %v440_v4 }
  0x74   : > { %4551 = vmatmul.mubr.bf16.gmra.mrb[28].mxu0 %v441_v7  ;;  %v1111_v7 = vld [vmem:[%s7172_s2 + $0x18] sm:$0xff] }
  0x75   : > { %4570 = vmatprep.mubr.msk.f32.mxu0 %vm1147_vm0, %v1108_v8  ;;  %v1112_v8 = vld [vmem:[%s7172_s2 + $0x20] sm:$0xff] }
 0x101   : > { %v4158_v9 = vpop.f32.mrb[0].mxu1 }
 0x102   : > { %v4159_v10 = vpop.f32.mrb[1].mxu1 }
 0x103   : > { %v4160_v11 = vadd.f32 %v4159_v10, %v4158_v9  ;;  %v4161_v12 = vpop.f32.mrb[2].mxu1  ;;  %v1113_v9 = vld [vmem:[%s7172_s2 + $0x28] sm:$0xff]  ;;  %v1114_v10 = vld [vmem:[%s7172_s2 + $0x30] sm:$0xff] }
 0x104   : > { %v4162_v13 = vpop.f32.mrb[3].mxu1 }
 0x105   : > { %v4163_v14 = vadd.f32 %v4162_v13, %v4161_v12  ;;  %v1116_v12 = vld [vmem:[%s7172_s2 + $0x40] sm:$0xff]  ;;  %v1117_v13 = vld [vmem:[%s7172_s2 + $0x48] sm:$0xff] }
 0x109   : > { %v4164_v15 = vpop.f32.mrb[4].mxu1 }
 0x10a   : > { %v4165_v16 = vpop.f32.mrb[5].mxu1 }
 0x10b   : > { %v4166_v17 = vadd.f32 %v4165_v16, %v4164_v15  ;;  %v4167_v18 = vpop.f32.mrb[6].mxu1  ;;  %v1119_v16 = vld [vmem:[%s7172_s2 + $0x58] sm:$0xff] }
 0x10c   : > { %v4168_v19 = vpop.f32.mrb[7].mxu1 }
 0x10d   : > { %v4169_v20 = vadd.f32 %v4168_v19, %v4167_v18  ;;  %v1120_v18 = vld [vmem:[%s7172_s2 + $0x60] sm:$0xff] }
 0x10f   : > { %v5399_v15 = vpop.f32.mrb[0].mxu0 }
 0x111   : > { %v4170_v21 = vpop.f32.mrb[8].mxu1 }
 0x112   : > { %v4171_v22 = vpop.f32.mrb[9].mxu1 }
 0x113   : > { %v4172_v23 = vadd.f32 %v4171_v22, %v4170_v21  ;;  %v4173_v24 = vpop.f32.mrb[10].mxu1  ;;  %v1121_v21 = vld [vmem:[%s7172_s2 + $0x68] sm:$0xff]  ;;  %v1122_v22 = vld [vmem:[%s7172_s2 + $0x70] sm:$0xff] }
 0x114   : > { %v4174_v25 = vpop.f32.mrb[11].mxu1 }
 0x115   : > { %v4175_v26 = vadd.f32 %v4174_v25, %v4173_v24  ;;  %v1123_v24 = vld [vmem:[%s7172_s2 + $0x78] sm:$0xff] }
 0x119   : > { %v4176_v27 = vpop.f32.mrb[12].mxu1 }
 0x11a   : > { %v4177_v28 = vpop.f32.mrb[13].mxu1 }
 0x11b   : > { %v4178_v29 = vadd.f32 %v4177_v28, %v4176_v27  ;;  %v4179_v30 = vpop.f32.mrb[14].mxu1 }
 0x11c   : > { %v4180_v31 = vpop.f32.mrb[15].mxu1 }
 0x11d   : > { %v4181_v32 = vadd.f32 %v4180_v31, %v4179_v30  ;;  %v1126_v30 = vld [vmem:[%s7172_s2 + $0x90] sm:$0xff] }
 0x121   : > { %v4198_v33 = vpop.f32.mrb[16].mxu1 }
 0x122   : > { %v4199_v34 = vpop.f32.mrb[17].mxu1 }
 0x123   : > { %v4200_v35 = vadd.f32 %v4199_v34, %v4198_v33  ;;  %v4201_v36 = vpop.f32.mrb[18].mxu1  ;;  %v1128_v34 = vld [vmem:[%s7172_s2 + $0xa0] sm:$0xff] }
 0x124   : > { %v4202_v37 = vpop.f32.mrb[19].mxu1 }
 0x125   : > { %v1078_v38 = vadd.f32 %v4200_v35, %v4160_v11  ;;  %v4203_v39 = vadd.f32 %v4202_v37, %v4201_v36  ;;  %v1115_v11 = vld [vmem:[%s7172_s2 + $0x38] sm:$0xff]  ;;  %v1129_v37 = vld [vmem:[%s7172_s2 + $0xa8] sm:$0xff] }
 0x127   : > { %v1081_v40 = vadd.f32 %v4203_v39, %v4163_v14  ;;  %v1118_v14 = vld [vmem:[%s7172_s2 + $0x50] sm:$0xff] }
 0x129   : > { %v4204_v41 = vpop.f32.mrb[20].mxu1  ;;  %v4658_v42 = vpack.c.bf16 %v1081_v40, %v1078_v38  ;;  %v1130_v38 = vld [vmem:[%s7172_s2 + $0xb0] sm:$0xff]  ;;  %v1131_v40 = vld [vmem:[%s7172_s2 + $0xb8] sm:$0xff] }
 0x12a   : > { %v4205_v43 = vpop.f32.mrb[21].mxu1 }
 0x12b   : > { %v4206_v44 = vadd.f32 %v4205_v43, %v4204_v41  ;;  %v4207_v45 = vpop.f32.mrb[22].mxu1  ;;  %4659 = vmatprep.subr.bf16.mxu0 %v4658_v42 }
 0x12c   : > { %v4208_v46 = vpop.f32.mrb[23].mxu1  ;;  %4661 = vmatpush3.bf16.msra.mxu0 %v4658_v42  ;;  %v1132_v42 = vld [vmem:[%s7172_s2 + $0xc0] sm:$0xff] }
 0x12d   : > { %v1086_v47 = vadd.f32 %v4206_v44, %v4166_v17  ;;  %v4209_v48 = vadd.f32 %v4208_v46, %v4207_v45  ;;  %v5405_v17 = vpop.f32.mrb[1].mxu0  ;;  %v1133_v45 = vld [vmem:[%s7172_s2 + $0xc8] sm:$0xff]  ;;  %v1134_v46 = vld [vmem:[%s7172_s2 + $0xd0] sm:$0xff] }
 0x12e   : > { %v5410_v19 = vpop.f32.mrb[2].mxu0 }
 0x12f   : > { %v1089_v49 = vadd.f32 %v4209_v48, %v4169_v20  ;;  %v5412_v20 = vpop.f32.mrb[3].mxu0  ;;  %v1135_v48 = vld [vmem:[%s7172_s2 + $0xd8] sm:$0xff] }
 0x131   : > { %v4210_v50 = vpop.f32.mrb[24].mxu1  ;;  %v4662_v51 = vpack.c.bf16 %v1089_v49, %v1086_v47 }
 0x132   : > { %v4211_v52 = vpop.f32.mrb[25].mxu1 }
 0x133   : > { %v4212_v53 = vadd.f32 %v4211_v52, %v4210_v50  ;;  %v4213_v54 = vpop.f32.mrb[26].mxu1  ;;  %4663 = vmatprep.subr.bf16.mxu0 %v4662_v51  ;;  %v1136_v50 = vld [vmem:[%s7172_s2 + $0xe0] sm:$0xff] }
 0x134   : > { %v4214_v55 = vpop.f32.mrb[27].mxu1  ;;  %4665 = vmatpush3.bf16.msra.mxu0 %v4662_v51 }
 0x135   : > { %v1094_v56 = vadd.f32 %v4212_v53, %v4172_v23  ;;  %v4215_v57 = vadd.f32 %v4214_v55, %v4213_v54  ;;  %v5423_v23 = vpop.f32.mrb[4].mxu0  ;;  %v1137_v53 = vld [vmem:[%s7172_s2 + $0xe8] sm:$0xff]  ;;  %v1138_v54 = vld [vmem:[%s7172_s2 + $0xf0] sm:$0xff] }
 0x136   : > { %v5429_v25 = vpop.f32.mrb[5].mxu0 }
 0x137   : > { %v1097_v58 = vadd.f32 %v4215_v57, %v4175_v26  ;;  %v1124_v26 = vld [vmem:[%s7172_s2 + $0x80] sm:$0xff]  ;;  %v5434_v27 = vpop.f32.mrb[6].mxu0 }
 0x138   : > { %v5436_v28 = vpop.f32.mrb[7].mxu0 }
 0x139   : > { %v4216_v59 = vpop.f32.mrb[28].mxu1  ;;  %v4666_v60 = vpack.c.bf16 %v1097_v58, %v1094_v56  ;;  %v5447_v31 = vpop.f32.mrb[8].mxu0  ;;  %v1139_v56 = vld [vmem:[%s7172_s2 + $0xf8] sm:$0xff] }
 0x13a   : > { %v4217_v61 = vpop.f32.mrb[29].mxu1  ;;  %v5453_v33 = vpop.f32.mrb[9].mxu0 }
 0x13b   : > { %v4218_v62 = vadd.f32 %v4217_v61, %v4216_v59  ;;  %v4219_v63 = vpop.f32.mrb[30].mxu1  ;;  %4667 = vmatprep.subr.bf16.mxu0 %v4666_v60  ;;  %v5458_v35 = vpop.f32.mrb[10].mxu0 }
 0x13c   : > { %v4220_v0 = vpop.f32.mrb[31].mxu1  ;;  %4669 = vmatpush3.bf16.msra.mxu0 %v4666_v60  ;;  %v5460_v36 = vpop.f32.mrb[11].mxu0 }
 0x13d   : > { %v1102_v1 = vadd.f32 %v4218_v62, %v4178_v29  ;;  %v4221_v2 = vadd.f32 %v4220_v0, %v4219_v63  ;;  %v1125_v29 = vld [vmem:[%s7172_s2 + $0x88] sm:$0xff]  ;;  %v5471_v39 = vpop.f32.mrb[12].mxu0 }
 0x13e   : > { %v5477_v41 = vpop.f32.mrb[13].mxu0 }
 0x13f   : > { %v1105_v3 = vadd.f32 %v4221_v2, %v4181_v32  ;;  %v1127_v32 = vld [vmem:[%s7172_s2 + $0x98] sm:$0xff]  ;;  %v5482_v43 = vpop.f32.mrb[14].mxu0 }
 0x140   : > { %v5484_v44 = vpop.f32.mrb[15].mxu0 }
 0x141   : > { %v4670_v4 = vpack.c.bf16 %v1105_v3, %v1102_v1  ;;  %v5495_v47 = vpop.f32.mrb[16].mxu0 }
 0x142   : > { %v5501_v49 = vpop.f32.mrb[17].mxu0 }
 0x143   : > { %4671 = vmatprep.subr.bf16.mxu0 %v4670_v4  ;;  %v5506_v51 = vpop.f32.mrb[18].mxu0 }
 0x144   : > { %4673 = vmatpush3.bf16.msra.mxu0 %v4670_v4  ;;  %v5508_v52 = vpop.f32.mrb[19].mxu0  ;;  %v5090_v4 = vmov 0.0  }
 0x145   : > { %v5519_v55 = vpop.f32.mrb[20].mxu0  ;;  %1506 = vst.msk [vmem:[#allocation2 + $0x20] sm:$0xff] %vm1147_vm0, %v5090_v4  ;;  %1501 = vst.msk [vmem:[#allocation2] sm:$0xff] %vm1147_vm0, %v5090_v4 }
 0x146   : > { %v5525_v57 = vpop.f32.mrb[21].mxu0  ;;  %1507 = vst.msk [vmem:[#allocation2 + $0x28] sm:$0x3] %vm1503_vm1, %v5090_v4  ;;  %1504 = vst.msk [vmem:[#allocation2 + $0x10] sm:$0x3] %vm1503_vm1, %v5090_v4 }
 0x147   : > { %4571 = vmatmul.mubr.msk.f32.vlgmr.msra.gmra.mrb[32].mxu0 %vm1147_vm0, %v1109_v5  ;;  %v5527_v58 = vpop.f32.mrb[22].mxu0  ;;  %1502 = vst.msk [vmem:[#allocation2 + $0x8] sm:$0xff] %vm1147_vm0, %v5090_v4  ;;  %1505 = vst.msk [vmem:[#allocation2 + $0x18] sm:$0xff] %vm1147_vm0, %v5090_v4  ;;  %v5044_v5 = vld [vmem:[%s7177_s7 + $0x40] sm:$0xff]  }
 0x148   : > { %4573 = vmatprep.mubr.msk.f32.mxu0 %vm1147_vm0, %v1110_v6  ;;  %v5529_v59 = vpop.f32.mrb[23].mxu0  ;;  %1508 = vst.msk [vmem:[#allocation2 + $0x30] sm:$0xff] %vm1147_vm0, %v5090_v4  ;;  %1509 = vst.msk [vmem:[#allocation2 + $0x38] sm:$0xff] %vm1147_vm0, %v5090_v4  ;;  %4262 = vmatprep.subr.bf16.mxu1 %v5044_v5  ;;  %v5045_v6 = vld [vmem:[%s7177_s7] sm:$0xff]  }
 0x149   : > { %v5532_v60 = vpop.f32.mrb[24].mxu0  ;;  %1510 = vst.msk [vmem:[#allocation2 + $0x40] sm:$0x3] %vm1503_vm1, %v5090_v4  ;;  %1513 = vst.msk [vmem:[#allocation2 + $0x58] sm:$0x3] %vm1503_vm1, %v5090_v4  ;;  %4263 = vmatpush3.bf16.msra.mxu1 %v5045_v6 }
 0x14a   : > { %v5534_v61 = vpop.f32.mrb[25].mxu0  ;;  %1511 = vst.msk [vmem:[#allocation2 + $0x48] sm:$0xff] %vm1147_vm0, %v5090_v4  ;;  %1512 = vst.msk [vmem:[#allocation2 + $0x50] sm:$0xff] %vm1147_vm0, %v5090_v4 }
 0x14b   : > { %4574 = vmatmul.mubr.msk.f32.gmra.mrb[34].mxu0 %vm1147_vm0, %v1111_v7  ;;  %v5536_v62 = vpop.f32.mrb[26].mxu0  ;;  %1514 = vst.msk [vmem:[#allocation2 + $0x60] sm:$0xff] %vm1147_vm0, %v5090_v4  ;;  %1515 = vst.msk [vmem:[#allocation2 + $0x68] sm:$0xff] %vm1147_vm0, %v5090_v4  ;;  %v5046_v7 = vld [vmem:[%s7177_s7 + $0x48] sm:$0xff]  }
 0x14c   : > { %4576 = vmatprep.mubr.msk.f32.mxu0 %vm1147_vm0, %v1112_v8  ;;  %v5538_v63 = vpop.f32.mrb[27].mxu0  ;;  %1516 = vst.msk [vmem:[#allocation2 + $0x70] sm:$0x3] %vm1503_vm1, %v5090_v4  ;;  %1519 = vst.msk [vmem:[#allocation2 + $0x88] sm:$0x3] %vm1503_vm1, %v5090_v4  ;;  %4264 = vmatprep.subr.bf16.mxu1 %v5046_v7  ;;  %v5047_v8 = vld [vmem:[%s7177_s7 + $0x8] sm:$0xff]  }
 0x14d   : > { %v5540_v0 = vpop.f32.mrb[28].mxu0  ;;  %1517 = vst.msk [vmem:[#allocation2 + $0x78] sm:$0xff] %vm1147_vm0, %v5090_v4  ;;  %1518 = vst.msk [vmem:[#allocation2 + $0x80] sm:$0xff] %vm1147_vm0, %v5090_v4  ;;  %4265 = vmatpush3.bf16.msra.mxu1 %v5047_v8 }
 0x14e   : > { %v5542_v1 = vpop.f32.mrb[29].mxu0  ;;  %1520 = vst.msk [vmem:[#allocation2 + $0x90] sm:$0xff] %vm1147_vm0, %v5090_v4  ;;  %1521 = vst.msk [vmem:[#allocation2 + $0x98] sm:$0xff] %vm1147_vm0, %v5090_v4 }
 0x14f   : > { %4577 = vmatmul.mubr.msk.f32.gmra.mrb[36].mxu0 %vm1147_vm0, %v1113_v9  ;;  %v5544_v2 = vpop.f32.mrb[30].mxu0  ;;  %1522 = vst.msk [vmem:[#allocation2 + $0xa0] sm:$0x3] %vm1503_vm1, %v5090_v4  ;;  %1525 = vst.msk [vmem:[#allocation2 + $0xb8] sm:$0x3] %vm1503_vm1, %v5090_v4  ;;  %v5048_v9 = vld [vmem:[%s7177_s7 + $0x50] sm:$0xff]  }
 0x150   : > { %4579 = vmatprep.mubr.msk.f32.mxu0 %vm1147_vm0, %v1114_v10  ;;  %v5546_v3 = vpop.f32.mrb[31].mxu0  ;;  %1523 = vst.msk [vmem:[#allocation2 + $0xa8] sm:$0xff] %vm1147_vm0, %v5090_v4  ;;  %1524 = vst.msk [vmem:[#allocation2 + $0xb0] sm:$0xff] %vm1147_vm0, %v5090_v4  ;;  %4266 = vmatprep.subr.bf16.mxu1 %v5048_v9  ;;  %v5049_v10 = vld [vmem:[%s7177_s7 + $0x10] sm:$0xff]  }
 0x151   : > { %1526 = vst.msk [vmem:[#allocation2 + $0xc0] sm:$0xff] %vm1147_vm0, %v5090_v4  ;;  %1527 = vst.msk [vmem:[#allocation2 + $0xc8] sm:$0xff] %vm1147_vm0, %v5090_v4  ;;  %4267 = vmatpush3.bf16.msra.mxu1 %v5049_v10 }
 0x152   : > { %1528 = vst.msk [vmem:[#allocation2 + $0xd0] sm:$0x3] %vm1503_vm1, %v5090_v4  ;;  %1531 = vst.msk [vmem:[#allocation2 + $0xe8] sm:$0x3] %vm1503_vm1, %v5090_v4 }
 0x153   : > { %4580 = vmatmul.mubr.msk.f32.gmra.mrb[38].mxu0 %vm1147_vm0, %v1115_v11  ;;  %1529 = vst.msk [vmem:[#allocation2 + $0xd8] sm:$0xff] %vm1147_vm0, %v5090_v4  ;;  %1530 = vst.msk [vmem:[#allocation2 + $0xe0] sm:$0xff] %vm1147_vm0, %v5090_v4  ;;  %v5050_v11 = vld [vmem:[%s7177_s7 + $0x58] sm:$0xff]  }
 0x154   : > { %4582 = vmatprep.mubr.msk.f32.mxu0 %vm1147_vm0, %v1116_v12  ;;  %1532 = vst.msk [vmem:[#allocation2 + $0xf0] sm:$0xff] %vm1147_vm0, %v5090_v4  ;;  %1533 = vst.msk [vmem:[#allocation2 + $0xf8] sm:$0xff] %vm1147_vm0, %v5090_v4  ;;  %4268 = vmatprep.subr.bf16.mxu1 %v5050_v11  ;;  %v5051_v12 = vld [vmem:[%s7177_s7 + $0x18] sm:$0xff]  }
 0x155   : > { %1534 = vst.msk [vmem:[#allocation2 + $0x100] sm:$0x3] %vm1503_vm1, %v5090_v4  ;;  %1537 = vst.msk [vmem:[#allocation2 + $0x118] sm:$0x3] %vm1503_vm1, %v5090_v4  ;;  %4269 = vmatpush3.bf16.msra.mxu1 %v5051_v12  ;;  %v1621_v12 = vld [vmem:[#allocation2 + $0x1] sm:$0xff] }
 0x156   : > { %1535 = vst.msk [vmem:[#allocation2 + $0x108] sm:$0xff] %vm1147_vm0, %v5090_v4  ;;  %1536 = vst.msk [vmem:[#allocation2 + $0x110] sm:$0xff] %vm1147_vm0, %v5090_v4 }
 0x157   : > { %4583 = vmatmul.mubr.msk.f32.gmra.mrb[40].mxu0 %vm1147_vm0, %v1117_v13  ;;  %1538 = vst.msk [vmem:[#allocation2 + $0x120] sm:$0xff] %vm1147_vm0, %v5090_v4  ;;  %1539 = vst.msk [vmem:[#allocation2 + $0x128] sm:$0xff] %vm1147_vm0, %v5090_v4  ;;  %v5052_v13 = vld [vmem:[%s7177_s7 + $0x60] sm:$0xff]  }
 0x158   : > { %4585 = vmatprep.mubr.msk.f32.mxu0 %vm1147_vm0, %v1118_v14  ;;  %1540 = vst.msk [vmem:[#allocation2 + $0x130] sm:$0x3] %vm1503_vm1, %v5090_v4  ;;  %1543 = vst.msk [vmem:[#allocation2 + $0x148] sm:$0x3] %vm1503_vm1, %v5090_v4  ;;  %4270 = vmatprep.subr.bf16.mxu1 %v5052_v13  ;;  %v5053_v14 = vld [vmem:[%s7177_s7 + $0x20] sm:$0xff]  }
 0x159   : > { %1541 = vst.msk [vmem:[#allocation2 + $0x138] sm:$0xff] %vm1147_vm0, %v5090_v4  ;;  %1542 = vst.msk [vmem:[#allocation2 + $0x140] sm:$0xff] %vm1147_vm0, %v5090_v4  ;;  %4271 = vmatpush3.bf16.msra.mxu1 %v5053_v14 }
 0x15a   : > { %1544 = vst.msk [vmem:[#allocation2 + $0x150] sm:$0xff] %vm1147_vm0, %v5090_v4  ;;  %1545 = vst.msk [vmem:[#allocation2 + $0x158] sm:$0xff] %vm1147_vm0, %v5090_v4 }
 0x15b   : > { %4586 = vmatmul.mubr.msk.f32.gmra.mrb[42].mxu0 %vm1147_vm0, %v1119_v16  ;;  %1546 = vst.msk [vmem:[#allocation2 + $0x160] sm:$0x3] %vm1503_vm1, %v5090_v4  ;;  %1549 = vst.msk [vmem:[#allocation2 + $0x178] sm:$0x3] %vm1503_vm1, %v5090_v4  ;;  %v5054_v16 = vld [vmem:[%s7177_s7 + $0x68] sm:$0xff]  }
 0x15c   : > { %4588 = vmatprep.mubr.msk.f32.mxu0 %vm1147_vm0, %v1120_v18  ;;  %1547 = vst.msk [vmem:[#allocation2 + $0x168] sm:$0xff] %vm1147_vm0, %v5090_v4  ;;  %1548 = vst.msk [vmem:[#allocation2 + $0x170] sm:$0xff] %vm1147_vm0, %v5090_v4  ;;  %v5638_v18 = vld [vmem:[%s7174_s4] ss:$0 sm:$0xff]  ;;  %4272 = vmatprep.subr.bf16.mxu1 %v5054_v16 }
 0x15d   : > { %1550 = vst.msk [vmem:[#allocation2 + $0x180] sm:$0xff] %vm1147_vm0, %v5090_v4  ;;  %1551 = vst.msk [vmem:[#allocation2 + $0x188] sm:$0xff] %vm1147_vm0, %v5090_v4  ;;  %v564_v7 = vadd.f32 %v5638_v18, %v5429_v25  ;;  %v5061_v25 = vld [vmem:[%s7177_s7 + $0x80] sm:$0xff]   ;;  %v575_v13 = vadd.f32 %v5434_v27, %v5638_v18 }
 0x15e   : > { %1552 = vst.msk [vmem:[#allocation2 + $0x190] sm:$0x3] %vm1503_vm1, %v5090_v4  ;;  %1555 = vst.msk [vmem:[#allocation2 + $0x1a8] sm:$0x3] %vm1503_vm1, %v5090_v4 }
 0x15f   : > { %4589 = vmatmul.mubr.msk.f32.gmra.mrb[44].mxu0 %vm1147_vm0, %v1121_v21  ;;  %1553 = vst.msk [vmem:[#allocation2 + $0x198] sm:$0xff] %vm1147_vm0, %v5090_v4  ;;  %1554 = vst.msk [vmem:[#allocation2 + $0x1a0] sm:$0xff] %vm1147_vm0, %v5090_v4  ;;  %v5643_v21 = vld [vmem:[%s7176_s6] ss:$0 sm:$0xff]  ;;  %v5059_v4 = vld [vmem:[%s7177_s7 + $0x38] sm:$0xff]  }
 0x160   : > { %4591 = vmatprep.mubr.msk.f32.mxu0 %vm1147_vm0, %v1122_v22 }
 0x163   : > { %4592 = vmatmul.mubr.msk.f32.gmra.mrb[46].mxu0 %vm1147_vm0, %v1123_v24  ;;  %v5055_v24 = vld [vmem:[%s7177_s7 + $0x28] sm:$0xff]  }
 0x164   : > { %4594 = vmatprep.mubr.msk.f32.mxu0 %vm1147_vm0, %v1124_v26  ;;  %v551_v26 = vadd.f32 %v5638_v18, %v5412_v20  ;;  %4273 = vmatpush3.bf16.msra.mxu1 %v5055_v24 }
 0x167   : > { %4595 = vmatmul.mubr.msk.f32.gmra.mrb[48].mxu0 %vm1147_vm0, %v1125_v29 }
 0x168   : > { %4597 = vmatprep.mubr.msk.f32.mxu0 %vm1147_vm0, %v1126_v30 }
 0x16b   : > { %4598 = vmatmul.mubr.msk.f32.gmra.mrb[50].mxu0 %vm1147_vm0, %v1127_v32  ;;  %v548_v32 = vadd.f32 %v5638_v18, %v5405_v17  ;;  %v559_v17 = vadd.f32 %v5410_v19, %v5638_v18  ;;  %v5058_v19 = vld [vmem:[%s7177_s7 + $0x78] sm:$0xff]  }
 0x16c   : > { %4600 = vmatprep.mubr.msk.f32.mxu0 %vm1147_vm0, %v1128_v34 }
 0x16f   : > { %4601 = vmatmul.mubr.msk.f32.gmra.mrb[52].mxu0 %vm1147_vm0, %v1129_v37 }
 0x170   : > { %4603 = vmatprep.mubr.msk.f32.mxu0 %vm1147_vm0, %v1130_v38  ;;  %v5056_v38 = vld [vmem:[%s7177_s7 + $0x70] sm:$0xff]  }
 0x171   : > { %4274 = vmatprep.subr.bf16.mxu1 %v5056_v38  ;;  %v5062_v38 = vld [vmem:[%s7177_s7 + $0xc8] sm:$0xff]  }
 0x173   : > { %4604 = vmatmul.mubr.msk.f32.gmra.mrb[54].mxu0 %vm1147_vm0, %v1131_v40 }
 0x174   : > { %4606 = vmatprep.mubr.msk.f32.mxu0 %vm1147_vm0, %v1132_v42  ;;  %v5057_v42 = vld [vmem:[%s7177_s7 + $0x30] sm:$0xff]  }
 0x175   : > { %4275 = vmatpush3.bf16.msra.mxu1 %v5057_v42  ;;  %v5063_v42 = vld [vmem:[%s7177_s7 + $0x88] sm:$0xff]  }
 0x176   : > { %4276 = vmatprep.subr.bf16.mxu1 %v5058_v19 }
 0x177   : > { %4607 = vmatmul.mubr.msk.f32.gmra.mrb[56].mxu0 %vm1147_vm0, %v1133_v45 }
 0x178   : > { %4609 = vmatprep.mubr.msk.f32.mxu0 %vm1147_vm0, %v1134_v46 }
 0x179   : > { %4277 = vmatpush3.bf16.msra.mxu1 %v5059_v4 }
 0x17b   : > { %4610 = vmatmul.mubr.msk.f32.gmra.mrb[58].mxu0 %vm1147_vm0, %v1135_v48  ;;  %v556_v48 = vadd.f32 %v5399_v15, %v5638_v18  ;;  %v567_v15 = vadd.f32 %v5638_v18, %v5436_v28  ;;  %v5060_v28 = vld [vmem:[%s7177_s7 + $0xc0] sm:$0xff]  }
 0x17c   : > { %4612 = vmatprep.mubr.msk.f32.mxu0 %vm1147_vm0, %v1136_v50  ;;  %4374 = vmatprep.subr.bf16.mxu0 %v5060_v28  ;;  %v591_v28 = vadd.f32 %v5458_v35, %v5638_v18  ;;  %v5065_v35 = vld [vmem:[%s7177_s7 + $0x90] sm:$0xff]  }
 0x17d   : > { %4375 = vmatpush3.bf16.msra.mxu0 %v5061_v25 }
 0x17e   : > { %4376 = vmatprep.subr.bf16.mxu0 %v5062_v38 }
 0x17f   : > { %4613 = vmatmul.mubr.msk.f32.gmra.mrb[60].mxu0 %vm1147_vm0, %v1137_v53 }
 0x180   : > { %4615 = vmatprep.mubr.msk.f32.mxu0 %vm1147_vm0, %v1138_v54 }
 0x181   : > { %4377 = vmatpush3.bf16.msra.mxu0 %v5063_v42 }
 0x183   : > { %4616 = vmatmul.mubr.msk.f32.gmra.mrb[62].mxu0 %vm1147_vm0, %v1139_v56 }
 0x21a   : > { %v4572_v22 = vpop.f32.mrb[32].mxu0 }
 0x21b   : > { %v5651_v29 = vadd.f32 %v4572_v22, %v5643_v21  ;;  %v1310_v30 = vpop.f32.mrb[33].mxu0 }
 0x21c   : > { %v5656_v34 = vadd.f32 %v5643_v21, %v1310_v30  ;;  %v572_v30 = vadd.f32 %v5423_v23, %v5638_v18 }
 0x21d   : > { %v1470_v37 = vadd.f32 %v5651_v29, %v551_v26  ;;  %v1622_v26 = vld [vmem:[#allocation2 + $0x9] sm:$0xff] }
 0x21e   : > { %v1469_v40 = vadd.f32 %v5656_v34, %v548_v32  ;;  %v4575_v20 = vpop.f32.mrb[34].mxu0  ;;  %v4689_v23 = vpack.i.bf16 %v1622_v26, %v1621_v12 }
 0x21f   : > { %1558 = vst.msk [vmem:[#allocation2 + $0x21] sm:$0xff] %vm1147_vm0, %v1470_v37  ;;  %v5670_v45 = vadd.f32 %v4575_v20, %v5643_v21  ;;  %v1320_v46 = vpop.f32.mrb[35].mxu0 }
 0x220   : > { %1557 = vst.msk [vmem:[#allocation2 + $0x19] sm:$0xff] %vm1147_vm0, %v1469_v40  ;;  %v5676_v50 = vadd.f32 %v5643_v21, %v1320_v46 }
 0x221   : > { %v1472_v53 = vadd.f32 %v5670_v45, %v559_v17  ;;  %v583_v17 = vadd.f32 %v5638_v18, %v5460_v36 }
 0x222   : > { %v1471_v54 = vadd.f32 %v5676_v50, %v556_v48  ;;  %v4578_v56 = vpop.f32.mrb[36].mxu0 }
 0x223   : > { %1560 = vst.msk [vmem:[#allocation2 + $0x39] sm:$0xff] %vm1147_vm0, %v1472_v53  ;;  %v5690_v5 = vadd.f32 %v4578_v56, %v5643_v21  ;;  %v1330_v6 = vpop.f32.mrb[37].mxu0 }
 0x224   : > { %1559 = vst.msk [vmem:[#allocation2 + $0x31] sm:$0xff] %vm1147_vm0, %v1471_v54  ;;  %v5696_v8 = vadd.f32 %v5643_v21, %v1330_v6  ;;  %v580_v54 = vadd.f32 %v5638_v18, %v5453_v33 }
 0x225   : > { %v1474_v9 = vadd.f32 %v5690_v5, %v567_v15 }
 0x226   : > { %v1473_v10 = vadd.f32 %v5696_v8, %v564_v7  ;;  %v4581_v11 = vpop.f32.mrb[38].mxu0  ;;  %v1624_v6 = vld [vmem:[#allocation2 + $0x21] sm:$0xff]  ;;  %v5064_v7 = vld [vmem:[%s7177_s7 + $0xd0] sm:$0xff]  }
 0x227   : > { %1562 = vst.msk [vmem:[#allocation2 + $0x51] sm:$0xff] %vm1147_vm0, %v1474_v9  ;;  %v5710_v14 = vadd.f32 %v4581_v11, %v5643_v21  ;;  %v1340_v16 = vpop.f32.mrb[39].mxu0  ;;  %v5712_v22 = vld [vmem:[#allocation2 + $0x18] sm:$0xff]  ;;  %v5714_v24 = vld [vmem:[#allocation2 + $0x20] sm:$0xff]  ;;  %4378 = vmatprep.subr.bf16.mxu0 %v5064_v7 }
 0x228   : > { %1561 = vst.msk [vmem:[#allocation2 + $0x49] sm:$0xff] %vm1147_vm0, %v1473_v10  ;;  %v5720_v32 = vadd.f32 %v5643_v21, %v1340_v16  ;;  %v4684_v27 = vpack.i.bf16 %v5714_v24, %v5712_v22  ;;  %v1623_v15 = vld [vmem:[#allocation2 + $0x19] sm:$0xff]  ;;  %4379 = vmatpush3.bf16.msra.mxu0 %v5065_v35  ;;  %v604_v35 = vadd.f32 %v5471_v39, %v5638_v18  ;;  %v5070_v39 = vld [vmem:[%s7177_s7 + $0xe8] sm:$0xff]  }
 0x229   : > { %v1476_v37 = vadd.f32 %v5710_v14, %v575_v13  ;;  %v588_v13 = vadd.f32 %v5447_v31, %v5638_v18 }
 0x22a   : > { %v1475_v40 = vadd.f32 %v5720_v32, %v572_v30  ;;  %v4584_v20 = vpop.f32.mrb[40].mxu0  ;;  %4685 = vrot.lane.b32.xlu0 %v4684_v27, %s5091_s17  ;;  %v4699_v30 = vpack.i.bf16 %v1624_v6, %v1623_v15  ;;  %v1626_v38 = vld [vmem:[#allocation2 + $0x39] sm:$0xff] }
 0x22b   : > { %1564 = vst.msk [vmem:[#allocation2 + $0x69] sm:$0xff] %vm1147_vm0, %v1476_v37  ;;  %v5737_v46 = vadd.f32 %v4584_v20, %v5643_v21  ;;  %v1350_v48 = vpop.f32.mrb[41].mxu0  ;;  %v5739_v53 = vld [vmem:[#allocation2 + $0x30] sm:$0xff]  ;;  %v5741_v19 = vld [vmem:[#allocation2 + $0x38] sm:$0xff] }
 0x22c   : > { %1563 = vst.msk [vmem:[#allocation2 + $0x61] sm:$0xff] %vm1147_vm0, %v1475_v40  ;;  %v5747_v56 = vadd.f32 %v5643_v21, %v1350_v48  ;;  %v4694_v36 = vpack.i.bf16 %v5741_v19, %v5739_v53  ;;  %v1625_v37 = vld [vmem:[#allocation2 + $0x31] sm:$0xff] }
 0x22d   : > { %v1478_v4 = vadd.f32 %v5737_v46, %v583_v17  ;;  %v5066_v40 = vld [vmem:[%s7177_s7 + $0xd8] sm:$0xff]   ;;  %v5792_v6 = vpack.i.bf16 %v1626_v38, %v1625_v37 }
 0x22e   : > { %v1477_v9 = vadd.f32 %v5747_v56, %v580_v54  ;;  %v4587_v33 = vpop.f32.mrb[42].mxu0  ;;  %4695 = vrot.lane.b32.xlu1 %v4694_v36, %s5091_s17  ;;  %4690 = vrot.lane.b32.xlu0 %v4689_v23, %s5091_s17  ;;  %v599_v23 = vadd.f32 %v5638_v18, %v5484_v44  ;;  %v596_v36 = vadd.f32 %v5638_v18, %v5477_v41  ;;  %v5067_v44 = vld [vmem:[%s7177_s7 + $0x98] sm:$0xff]   ;;  %v5068_v41 = vld [vmem:[%s7177_s7 + $0xe0] sm:$0xff]  }
 0x22f   : > { %1566 = vst.msk [vmem:[#allocation2 + $0x81] sm:$0xff] %vm1147_vm0, %v1478_v4  ;;  %v5762_v10 = vadd.f32 %v4587_v33, %v5643_v21  ;;  %v1360_v11 = vpop.f32.mrb[43].mxu0  ;;  %v1689_v12 = vld [vmem:[#allocation2 + $0x48] sm:$0xff]  ;;  %v1690_v25 = vld [vmem:[#allocation2 + $0x50] sm:$0xff]  ;;  %4380 = vmatprep.subr.bf16.mxu0 %v5066_v40 }
 0x230   : > { %1565 = vst.msk [vmem:[#allocation2 + $0x79] sm:$0xff] %vm1147_vm0, %v1477_v9  ;;  %v5768_v16 = vadd.f32 %v5643_v21, %v1360_v11  ;;  %v4704_v26 = vpack.i.bf16 %v1690_v25, %v1689_v12  ;;  %v1627_v9 = vld [vmem:[#allocation2 + $0x49] sm:$0xff]  ;;  %v1628_v33 = vld [vmem:[#allocation2 + $0x51] sm:$0xff]  ;;  %v607_v12 = vadd.f32 %v5482_v43, %v5638_v18  ;;  %4381 = vmatpush3.bf16.msra.mxu0 %v5067_v44  ;;  %v5069_v43 = vld [vmem:[%s7177_s7 + $0xa0] sm:$0xff]  }
 0x231   : > { %v1480_v27 = vadd.f32 %v5762_v10, %v591_v28  ;;  %v5817_v38 = vpack.i.bf16 %v1628_v33, %v1627_v9  ;;  %4382 = vmatprep.subr.bf16.mxu0 %v5068_v41 }
 0x232   : > { %v1479_v31 = vadd.f32 %v5768_v16, %v588_v13  ;;  %v4590_v20 = vpop.f32.mrb[44].mxu0  ;;  %4705 = vrot.lane.b32.xlu0 %v4704_v26, %s5091_s17  ;;  %4700 = vrot.lane.b32.xlu1 %v4699_v30, %s5091_s17 }
 0x233   : > { %1568 = vst.msk [vmem:[#allocation2 + $0x99] sm:$0xff] %vm1147_vm0, %v1480_v27  ;;  %v5784_v42 = vadd.f32 %v4590_v20, %v5643_v21  ;;  %v1370_v17 = vpop.f32.mrb[45].mxu0  ;;  %v1691_v48 = vld [vmem:[#allocation2 + $0x60] sm:$0xff]  ;;  %v1692_v54 = vld [vmem:[#allocation2 + $0x68] sm:$0xff] }
 0x234   : > { %1567 = vst.msk [vmem:[#allocation2 + $0x91] sm:$0xff] %vm1147_vm0, %v1479_v31  ;;  %v5790_v4 = vadd.f32 %v5643_v21, %v1370_v17  ;;  %v4714_v15 = vpack.i.bf16 %v1692_v54, %v1691_v48  ;;  %v1629_v31 = vld [vmem:[#allocation2 + $0x61] sm:$0xff]  ;;  %v1630_v20 = vld [vmem:[#allocation2 + $0x69] sm:$0xff]  ;;  %v615_v48 = vadd.f32 %v5638_v18, %v5508_v52  ;;  %4383 = vmatpush3.bf16.msra.mxu0 %v5069_v43 }
 0x235   : > { %v1482_v7 = vadd.f32 %v5784_v42, %v599_v23  ;;  %v5842_v41 = vpack.i.bf16 %v1630_v20, %v1629_v31  ;;  %4384 = vmatprep.subr.bf16.mxu0 %v5070_v39  ;;  %v5071_v52 = vld [vmem:[%s7177_s7 + $0xa8] sm:$0xff]   ;;  %v620_v31 = vadd.f32 %v5495_v47, %v5638_v18 }
 0x236   : > { %v1481_v28 = vadd.f32 %v5790_v4, %v596_v36  ;;  %v4593_v11 = vpop.f32.mrb[46].mxu0  ;;  %4715 = vrot.lane.b32.xlu0 %v4714_v15, %s5091_s17  ;;  %4710 = vrot.lane.b32.xlu1 %v5792_v6, %s5091_s17 }
 0x237   : > { %1570 = vst.msk [vmem:[#allocation2 + $0xb1] sm:$0xff] %vm1147_vm0, %v1482_v7  ;;  %v5809_v25 = vadd.f32 %v4593_v11, %v5643_v21  ;;  %v1380_v13 = vpop.f32.mrb[47].mxu0  ;;  %v1693_v26 = vld [vmem:[#allocation2 + $0x78] sm:$0xff]  ;;  %v1694_v30 = vld [vmem:[#allocation2 + $0x80] sm:$0xff]  ;;  %v612_v7 = vadd.f32 %v5638_v18, %v5501_v49  ;;  %v5072_v49 = vld [vmem:[%s7177_s7 + $0xf0] sm:$0xff]  }
 0x238   : > { %1569 = vst.msk [vmem:[#allocation2 + $0xa9] sm:$0xff] %vm1147_vm0, %v1481_v28  ;;  %v5815_v27 = vadd.f32 %v5643_v21, %v1380_v13  ;;  %v4724_v37 = vpack.i.bf16 %v1694_v30, %v1693_v26  ;;  %v1631_v11 = vld [vmem:[#allocation2 + $0x79] sm:$0xff]  ;;  %v623_v30 = vadd.f32 %v5506_v51, %v5638_v18  ;;  %4385 = vmatpush3.bf16.msra.mxu0 %v5071_v52  ;;  %v5073_v51 = vld [vmem:[%s7177_s7 + $0xb0] sm:$0xff]  }
 0x239   : > { %v1484_v40 = vadd.f32 %v5809_v25, %v607_v12  ;;  %v1632_v12 = vld [vmem:[#allocation2 + $0x81] sm:$0xff]  ;;  %4386 = vmatprep.subr.bf16.mxu0 %v5072_v49 }
 0x23a   : > { %v1483_v23 = vadd.f32 %v5815_v27, %v604_v35  ;;  %v4596_v17 = vpop.f32.mrb[48].mxu0  ;;  %4725 = vrot.lane.b32.xlu0 %v4724_v37, %s5091_s17  ;;  %4720 = vrot.lane.b32.xlu1 %v5817_v38, %s5091_s17 }
 0x23b   : > { %1572 = vst.msk [vmem:[#allocation2 + $0xc9] sm:$0xff] %vm1147_vm0, %v1484_v40  ;;  %v5834_v54 = vadd.f32 %v4596_v17, %v5643_v21  ;;  %v1390_v36 = vpop.f32.mrb[49].mxu0  ;;  %v1695_v15 = vld [vmem:[#allocation2 + $0x90] sm:$0xff]  ;;  %v1696_v44 = vld [vmem:[#allocation2 + $0x98] sm:$0xff] }
 0x23c   : > { %1571 = vst.msk [vmem:[#allocation2 + $0xc1] sm:$0xff] %vm1147_vm0, %v1483_v23  ;;  %v5840_v9 = vadd.f32 %v5643_v21, %v1390_v36  ;;  %v4734_v33 = vpack.i.bf16 %v1696_v44, %v1695_v15  ;;  %v5867_v23 = vpack.i.bf16 %v1632_v12, %v1631_v11  ;;  %v1634_v36 = vld [vmem:[#allocation2 + $0x99] sm:$0xff]  ;;  %4387 = vmatpush3.bf16.msra.mxu0 %v5073_v51 }
 0x23d   : > { %v1486_v28 = vadd.f32 %v5834_v54, %v615_v48  ;;  %v1633_v48 = vld [vmem:[#allocation2 + $0x91] sm:$0xff]  ;;  %v628_v12 = vadd.f32 %v5638_v18, %v5525_v57 }
 0x23e   : > { %v1485_v13 = vadd.f32 %v5840_v9, %v612_v7  ;;  %v4599_v26 = vpop.f32.mrb[50].mxu0  ;;  %4735 = vrot.lane.b32.xlu0 %v4734_v33, %s5091_s17  ;;  %4730 = vrot.lane.b32.xlu1 %v5842_v41, %s5091_s17  ;;  %v5074_v44 = vld [vmem:[%s7177_s7 + $0xf8] sm:$0xff]   ;;  %v631_v7 = vadd.f32 %v5638_v18, %v5529_v59 }
 0x23f   : > { %1574 = vst.msk [vmem:[#allocation2 + $0xe1] sm:$0xff] %vm1147_vm0, %v1486_v28  ;;  %v5859_v35 = vadd.f32 %v4599_v26, %v5643_v21  ;;  %v1400_v37 = vpop.f32.mrb[51].mxu0  ;;  %v1697_v43 = vld [vmem:[#allocation2 + $0xa8] sm:$0xff]  ;;  %v1698_v40 = vld [vmem:[#allocation2 + $0xb0] sm:$0xff]  ;;  %v5892_v26 = vpack.i.bf16 %v1634_v36, %v1633_v48  ;;  %4388 = vmatprep.subr.bf16.mxu0 %v5074_v44  ;;  %v5075_v59 = vld [vmem:[%s7177_s7 + $0xb8] sm:$0xff]  }
 0x240   : > { %1573 = vst.msk [vmem:[#allocation2 + $0xd9] sm:$0xff] %vm1147_vm0, %v1485_v13  ;;  %v5865_v20 = vadd.f32 %v5643_v21, %v1400_v37  ;;  %v4744_v39 = vpack.i.bf16 %v1698_v40, %v1697_v43  ;;  %v1635_v37 = vld [vmem:[#allocation2 + $0xa9] sm:$0xff]  ;;  %v1636_v43 = vld [vmem:[#allocation2 + $0xb1] sm:$0xff]  ;;  %4389 = vmatpush3.bf16.msra.mxu0 %v5075_v59  ;;  %v644_v59 = vadd.f32 %v5638_v18, %v5534_v61 }
 0x241   : > { %v1488_v17 = vadd.f32 %v5859_v35, %v623_v30  ;;  %v5914_v36 = vpack.i.bf16 %v1636_v43, %v1635_v37  ;;  %v655_v61 = vadd.f32 %v5536_v62, %v5638_v18 }
 0x242   : > { %v1487_v15 = vadd.f32 %v5865_v20, %v620_v31  ;;  %v4602_v47 = vpop.f32.mrb[52].mxu0  ;;  %4745 = vrot.lane.b32.xlu0 %v4744_v39, %s5091_s17  ;;  %4740 = vrot.lane.b32.xlu1 %v5867_v23, %s5091_s17  ;;  %v639_v31 = vadd.f32 %v5527_v58, %v5638_v18  ;;  %v5918_v58 = vld [vmem:[#allocation2 + $0x22] sm:$0xff] }
 0x243   : > { %1576 = vst.msk [vmem:[#allocation2 + $0xf9] sm:$0xff] %vm1147_vm0, %v1488_v17  ;;  %v5884_v33 = vadd.f32 %v4602_v47, %v5643_v21  ;;  %v1410_v52 = vpop.f32.mrb[53].mxu0  ;;  %v1699_v28 = vld [vmem:[#allocation2 + $0xc0] sm:$0xff]  ;;  %v1700_v11 = vld [vmem:[#allocation2 + $0xc8] sm:$0xff]  ;;  %v636_v17 = vadd.f32 %v5519_v55, %v5638_v18 }
 0x244   : > { %1575 = vst.msk [vmem:[#allocation2 + $0xf1] sm:$0xff] %vm1147_vm0, %v1487_v15  ;;  %v5890_v49 = vadd.f32 %v5643_v21, %v1410_v52  ;;  %v4759_v13 = vpack.i.bf16 %v1700_v11, %v1699_v28  ;;  %v5916_v15 = vld [vmem:[#allocation2 + $0x1a] sm:$0xff]  ;;  %v647_v11 = vadd.f32 %v5638_v18, %v5538_v63 }
 0x245   : > { %7212 = vst [vmem:[#allocation3_spill] sm:$0xff] %v5884_v33  ;;  %v1490_v30 = vadd.f32 %v5884_v33, %v631_v7  ;;  %v5924_v52 = vld [vmem:[%s7177_s7 + $0x100] sm:$0xff]   ;;  %v4769_v63 = vpack.i.bf16 %v5918_v58, %v5916_v15 }
 0x246   : > { %v1489_v40 = vadd.f32 %v5890_v49, %v628_v12  ;;  %v4605_v57 = vpop.f32.mrb[54].mxu0  ;;  %4760 = vrot.lane.b32.xlu0 %v4759_v13, %s5091_s17  ;;  %4750 = vrot.lane.b32.xlu1 %v5892_v26, %s5091_s17  ;;  %v1637_v43 = vld [vmem:[#allocation2 + $0xc1] sm:$0xff] }
 0x247   : > { %1578 = vst.msk [vmem:[#allocation2 + $0x111] sm:$0xff] %vm1147_vm0, %v1490_v30  ;;  %v5906_v39 = vadd.f32 %v4605_v57, %v5643_v21  ;;  %v1420_v51 = vpop.f32.mrb[55].mxu0  ;;  %v1701_v44 = vld [vmem:[#allocation2 + $0xd8] sm:$0xff]  ;;  %v1702_v7 = vld [vmem:[#allocation2 + $0xe0] sm:$0xff]  ;;  %4618 = vmatprep.subr.bf16.mxu1 %v5924_v52 }
 0x248   : > { %1577 = vst.msk [vmem:[#allocation2 + $0x109] sm:$0xff] %vm1147_vm0, %v1489_v40  ;;  %v5912_v48 = vadd.f32 %v5643_v21, %v1420_v51  ;;  %v4779_v30 = vpack.i.bf16 %v1702_v7, %v1701_v44  ;;  %v1638_v40 = vld [vmem:[#allocation2 + $0xc9] sm:$0xff] }
 0x249   : > { %7213 = vst [vmem:[#allocation4_spill] sm:$0xff] %v5906_v39  ;;  %v1492_v47 = vadd.f32 %v5906_v39, %v639_v31  ;;  %v5962_v7 = vpack.i.bf16 %v1638_v40, %v1637_v43  ;;  %v660_v43 = vadd.f32 %v5638_v18, %v5542_v1  ;;  %v671_v1 = vadd.f32 %v5544_v2, %v5638_v18 }
 0x24a   : > { %7214 = vst [vmem:[#allocation5_spill] sm:$0xff] %v5912_v48  ;;  %v1491_v55 = vadd.f32 %v5912_v48, %v636_v17  ;;  %v4608_v28 = vpop.f32.mrb[56].mxu0  ;;  %4765 = vrot.lane.b32.xlu0 %v5792_v6, %s5091_s17  ;;  %4755 = vrot.lane.b32.xlu1 %v5914_v36, %s5091_s17 }
 0x24b   : > { %1580 = vst.msk [vmem:[#allocation2 + $0x129] sm:$0xff] %vm1147_vm0, %v1492_v47  ;;  %v5935_v12 = vadd.f32 %v4608_v28, %v5643_v21  ;;  %v1430_v13 = vpop.f32.mrb[57].mxu0  ;;  %v652_v47 = vadd.f32 %v5532_v60, %v5638_v18  ;;  %v1703_v28 = vld [vmem:[#allocation2 + $0xf0] sm:$0xff]  ;;  %v663_v60 = vadd.f32 %v5638_v18, %v5546_v3 }
 0x24c   : > { %1579 = vst.msk [vmem:[#allocation2 + $0x121] sm:$0xff] %vm1147_vm0, %v1491_v55  ;;  %v5942_v6 = vadd.f32 %v5643_v21, %v1430_v13  ;;  %v5964_v55 = vld [vmem:[#allocation2 + $0x3a] sm:$0xff]  ;;  %v5967_v13 = vld [vmem:[#allocation2 + $0x32] sm:$0xff] }
 0x24d   : > { %7215 = vst [vmem:[#allocation6_spill] sm:$0xff] %v5935_v12  ;;  %v1494_v37 = vadd.f32 %v5935_v12, %v647_v11  ;;  %v1704_v11 = vld [vmem:[#allocation2 + $0xf8] sm:$0xff] }
 0x24e   : > { %7216 = vst [vmem:[#allocation7_spill] sm:$0xff] %v5942_v6  ;;  %v1493_v57 = vadd.f32 %v5942_v6, %v644_v59  ;;  %v4611_v31 = vpop.f32.mrb[58].mxu0  ;;  %4780 = vrot.lane.b32.xlu0 %v4779_v30, %s5091_s17  ;;  %4770 = vrot.lane.b32.xlu1 %v4769_v63, %s5091_s17 }
 0x24f   : > { %1582 = vst.msk [vmem:[#allocation2 + $0x141] sm:$0xff] %vm1147_vm0, %v1494_v37  ;;  %v5954_v51 = vadd.f32 %v4611_v31, %v5643_v21  ;;  %v1440_v17 = vpop.f32.mrb[59].mxu0  ;;  %v1639_v31 = vld [vmem:[#allocation2 + $0xd9] sm:$0xff] }
 0x250   : > { %1581 = vst.msk [vmem:[#allocation2 + $0x139] sm:$0xff] %vm1147_vm0, %v1493_v57  ;;  %v5960_v44 = vadd.f32 %v5643_v21, %v1440_v17  ;;  %v4789_v57 = vpack.i.bf16 %v5964_v55, %v5967_v13 }
 0x251   : > { %7217 = vst [vmem:[#allocation8_spill] sm:$0xff] %v5954_v51  ;;  %v1496_v62 = vadd.f32 %v5954_v51, %v655_v61  ;;  %v1640_v61 = vld [vmem:[#allocation2 + $0xe1] sm:$0xff] }
 0x252   : > { %7218 = vst [vmem:[#allocation9_spill] sm:$0xff] %v5960_v44  ;;  %v1495_v59 = vadd.f32 %v5960_v44, %v652_v47  ;;  %v4614_v30 = vpop.f32.mrb[60].mxu0  ;;  %4785 = vrot.lane.b32.xlu0 %v5817_v38, %s5091_s17  ;;  %4775 = vrot.lane.b32.xlu1 %v5962_v7, %s5091_s17  ;;  %v4799_v38 = vpack.i.bf16 %v1704_v11, %v1703_v28  ;;  %v6077_v51 = vld [vmem:[#allocation2 + $0xc2] sm:$0xff] }
 0x253   : > { %1584 = vst.msk [vmem:[#allocation2 + $0x159] sm:$0xff] %vm1147_vm0, %v1496_v62  ;;  %v5978_v63 = vadd.f32 %v4614_v30, %v5643_v21  ;;  %v1450_v37 = vpop.f32.mrb[61].mxu0  ;;  %v668_v11 = vadd.f32 %v5540_v0, %v5638_v18  ;;  %v6004_v30 = vpack.i.bf16 %v1640_v61, %v1639_v31  ;;  %v6026_v61 = vld [vmem:[#allocation2 + $0x6a] sm:$0xff]  ;;  %7227 = vst [vmem:[#allocation18_spill] sm:$0xff] %v6077_v51 }
 0x254   : > { %1583 = vst.msk [vmem:[#allocation2 + $0x151] sm:$0xff] %vm1147_vm0, %v1495_v59  ;;  %v5984_v40 = vadd.f32 %v5643_v21, %v1450_v37  ;;  %v1705_v37 = vld [vmem:[#allocation2 + $0x108] sm:$0xff] }
 0x255   : > { %7219 = vst [vmem:[#allocation10_spill] sm:$0xff] %v5978_v63  ;;  %v1498_v3 = vadd.f32 %v5978_v63, %v663_v60  ;;  %v6006_v60 = vld [vmem:[#allocation2 + $0x52] sm:$0xff] }
 0x256   : > { %7220 = vst [vmem:[#allocation11_spill] sm:$0xff] %v5984_v40  ;;  %v1497_v17 = vadd.f32 %v5984_v40, %v660_v43  ;;  %v4617_v47 = vpop.f32.mrb[62].mxu0  ;;  %4800 = vrot.lane.b32.xlu0 %v4799_v38, %s5091_s17  ;;  %4790 = vrot.lane.b32.xlu1 %v4789_v57, %s5091_s17  ;;  %v1706_v43 = vld [vmem:[#allocation2 + $0x110] sm:$0xff]  ;;  %v1774_v40 = vld [vmem:[#allocation2 + $0x142] sm:$0xff] }
 0x257   : > { %1586 = vst.msk [vmem:[#allocation2 + $0x171] sm:$0xff] %vm1147_vm0, %v1498_v3  ;;  %v5996_v62 = vadd.f32 %v4617_v47, %v5643_v21  ;;  %v1460_v28 = vpop.f32.mrb[63].mxu0  ;;  %v6009_v38 = vld [vmem:[#allocation2 + $0x4a] sm:$0xff]  ;;  %v4819_v0 = vpack.i.bf16 %v1706_v43, %v1705_v37  ;;  %v1642_v3 = vld [vmem:[#allocation2 + $0xf9] sm:$0xff] }
 0x258   : > { %1585 = vst.msk [vmem:[#allocation2 + $0x169] sm:$0xff] %vm1147_vm0, %v1497_v17  ;;  %v6002_v59 = vadd.f32 %v5643_v21, %v1460_v28  ;;  %v4809_v18 = vpack.i.bf16 %v6006_v60, %v6009_v38  ;;  %v1641_v21 = vld [vmem:[#allocation2 + $0xf1] sm:$0xff]  ;;  %v1707_v47 = vld [vmem:[#allocation2 + $0x120] sm:$0xff]  ;;  %v1643_v43 = vld [vmem:[#allocation2 + $0x109] sm:$0xff] }
 0x259   : > { %7221 = vst [vmem:[#allocation12_spill] sm:$0xff] %v5996_v62  ;;  %v1500_v2 = vadd.f32 %v5996_v62, %v671_v1  ;;  %v1708_v1 = vld [vmem:[#allocation2 + $0x128] sm:$0xff] }
 0x25a   : > { %7222 = vst [vmem:[#allocation13_spill] sm:$0xff] %v6002_v59  ;;  %v1499_v57 = vadd.f32 %v6002_v59, %v668_v11  ;;  %4805 = vrot.lane.b32.xlu0 %v5842_v41, %s5091_s17  ;;  %4795 = vrot.lane.b32.xlu1 %v6004_v30, %s5091_s17  ;;  %v6024_v41 = vpack.i.bf16 %v1642_v3, %v1641_v21  ;;  %v6030_v28 = vld [vmem:[#allocation2 + $0x62] sm:$0xff]  ;;  %v1709_v21 = vld [vmem:[#allocation2 + $0x138] sm:$0xff] }
 0x25b   : > { %1588 = vst.msk [vmem:[#allocation2 + $0x189] sm:$0xff] %vm1147_vm0, %v1500_v2  ;;  %v4839_v2 = vpack.i.bf16 %v1708_v1, %v1707_v47  ;;  %v4829_v37 = vpack.i.bf16 %v6026_v61, %v6030_v28  ;;  %v1710_v3 = vld [vmem:[#allocation2 + $0x140] sm:$0xff]  ;;  %v1712_v62 = vld [vmem:[#allocation2 + $0x158] sm:$0xff] }
 0x25c   : > { %1587 = vst.msk [vmem:[#allocation2 + $0x181] sm:$0xff] %vm1147_vm0, %v1499_v57  ;;  %v1644_v57 = vld [vmem:[#allocation2 + $0x111] sm:$0xff]  ;;  %v6044_v11 = vld [vmem:[#allocation2 + $0x7a] sm:$0xff] }
 0x25d   : > { %v1645_v1 = vld [vmem:[#allocation2 + $0x121] sm:$0xff]  ;;  %v6055_v59 = vld [vmem:[#allocation2 + $0x92] sm:$0xff] }
 0x25e   : > { %4820 = vrot.lane.b32.xlu0 %v4819_v0, %s5091_s17  ;;  %4810 = vrot.lane.b32.xlu1 %v4809_v18, %s5091_s17  ;;  %v6022_v31 = vld [vmem:[#allocation2 + $0x172] sm:$0xff]  ;;  %v4834_v0 = vpack.i.bf16 %v1644_v57, %v1643_v43  ;;  %v6042_v18 = vld [vmem:[#allocation2 + $0x82] sm:$0xff]  ;;  %v6053_v43 = vld [vmem:[#allocation2 + $0x9a] sm:$0xff] }
 0x25f   : > { %7223 = vst [vmem:[#allocation14_spill] sm:$0xff] %v6022_v31  ;;  %v6028_v17 = vld [vmem:[#allocation2 + $0x16a] sm:$0xff]  ;;  %v4849_v47 = vpack.i.bf16 %v6042_v18, %v6044_v11  ;;  %v1776_v12 = vld [vmem:[#allocation2 + $0x15a] sm:$0xff] }
 0x260   : > { %7224 = vst [vmem:[#allocation15_spill] sm:$0xff] %v6028_v17  ;;  %v1711_v57 = vld [vmem:[#allocation2 + $0x150] sm:$0xff] }
 0x261   : > { %v1714_v17 = vld [vmem:[#allocation2 + $0x170] sm:$0xff] }
 0x262   : > { %4825 = vrot.lane.b32.xlu0 %v5867_v23, %s5091_s17  ;;  %4815 = vrot.lane.b32.xlu1 %v6024_v41, %s5091_s17  ;;  %v4859_v23 = vpack.i.bf16 %v1710_v3, %v1709_v21  ;;  %v4869_v21 = vpack.i.bf16 %v6053_v43, %v6055_v59  ;;  %v1647_v3 = vld [vmem:[#allocation2 + $0x139] sm:$0xff]  ;;  %v6066_v31 = vld [vmem:[#allocation2 + $0xaa] sm:$0xff] }
 0x263   : > { %v1716_v63 = vld [vmem:[#allocation2 + $0x188] sm:$0xff] }
 0x264   : > { %v1843_v44 = vld [vmem:[#allocation2 + $0x189] sm:$0xff] }
 0x266   : > { %4840 = vrot.lane.b32.xlu0 %v4839_v2, %s5091_s17  ;;  %4830 = vrot.lane.b32.xlu1 %v4829_v37, %s5091_s17  ;;  %v1646_v2 = vld [vmem:[#allocation2 + $0x129] sm:$0xff] }
 0x267   : > { %v4854_v37 = vpack.i.bf16 %v1646_v2, %v1645_v1  ;;  %v6064_v1 = vld [vmem:[#allocation2 + $0xb2] sm:$0xff]  ;;  %v1713_v2 = vld [vmem:[#allocation2 + $0x168] sm:$0xff] }
 0x268   : > { %7225 = vst [vmem:[#allocation16_spill] sm:$0xff] %v6064_v1 }
 0x26a   : > { %4845 = vrot.lane.b32.xlu0 %v5892_v26, %s5091_s17  ;;  %4835 = vrot.lane.b32.xlu1 %v4834_v0, %s5091_s17  ;;  %v4879_v26 = vpack.i.bf16 %v1712_v62, %v1711_v57  ;;  %v4889_v62 = vpack.i.bf16 %v6064_v1, %v6066_v31  ;;  %v1649_v57 = vld [vmem:[#allocation2 + $0x151] sm:$0xff] }
 0x26e   : > { %4860 = vrot.lane.b32.xlu0 %v4859_v23, %s5091_s17  ;;  %4850 = vrot.lane.b32.xlu1 %v4849_v47, %s5091_s17  ;;  %v1648_v23 = vld [vmem:[#allocation2 + $0x141] sm:$0xff] }
 0x26f   : > { %v4874_v47 = vpack.i.bf16 %v1648_v23, %v1647_v3  ;;  %v6075_v3 = vld [vmem:[#allocation2 + $0xca] sm:$0xff]  ;;  %v1715_v23 = vld [vmem:[#allocation2 + $0x180] sm:$0xff] }
 0x270   : > { %7226 = vst [vmem:[#allocation17_spill] sm:$0xff] %v6075_v3 }
 0x272   : > { %4865 = vrot.lane.b32.xlu0 %v5914_v36, %s5091_s17  ;;  %4855 = vrot.lane.b32.xlu1 %v4854_v37, %s5091_s17  ;;  %v4899_v36 = vpack.i.bf16 %v1714_v17, %v1713_v2  ;;  %v4909_v17 = vpack.i.bf16 %v6075_v3, %v6077_v51  ;;  %v1651_v2 = vld [vmem:[#allocation2 + $0x169] sm:$0xff]  ;;  %v1775_v3 = vld [vmem:[#allocation2 + $0x152] sm:$0xff] }
 0x276   : > { %4880 = vrot.lane.b32.xlu0 %v4879_v26, %s5091_s17  ;;  %4870 = vrot.lane.b32.xlu1 %v4869_v21, %s5091_s17  ;;  %v1650_v26 = vld [vmem:[#allocation2 + $0x159] sm:$0xff] }
 0x277   : > { %v4894_v21 = vpack.i.bf16 %v1650_v26, %v1649_v57  ;;  %v6086_v57 = vld [vmem:[#allocation2 + $0xda] sm:$0xff]  ;;  %v6088_v26 = vld [vmem:[#allocation2 + $0xe2] sm:$0xff] }
 0x278   : > { %7228 = vst [vmem:[#allocation19_spill] sm:$0xff] %v6086_v57  ;;  %7229 = vst [vmem:[#allocation20_spill] sm:$0xff] %v6088_v26 }
 0x27a   : > { %4885 = vrot.lane.b32.xlu0 %v5962_v7, %s5091_s17  ;;  %4875 = vrot.lane.b32.xlu1 %v4874_v47, %s5091_s17  ;;  %v4919_v7 = vpack.i.bf16 %v1716_v63, %v1715_v23  ;;  %v4929_v63 = vpack.i.bf16 %v6088_v26, %v6086_v57  ;;  %v6097_v23 = vld [vmem:[#allocation2 + $0xfa] sm:$0xff]  ;;  %v1772_v26 = vld [vmem:[#allocation2 + $0x12a] sm:$0xff] }
 0x27b   : > { %7231 = vst [vmem:[#allocation22_spill] sm:$0xff] %v6097_v23 }
 0x27e   : > { %4900 = vrot.lane.b32.xlu0 %v4899_v36, %s5091_s17  ;;  %4890 = vrot.lane.b32.xlu1 %v4889_v62, %s5091_s17  ;;  %v1652_v36 = vld [vmem:[#allocation2 + $0x171] sm:$0xff] }
 0x27f   : > { %v4914_v62 = vpack.i.bf16 %v1652_v36, %v1651_v2  ;;  %v1770_v2 = vld [vmem:[#allocation2 + $0x112] sm:$0xff]  ;;  %v1771_v36 = vld [vmem:[#allocation2 + $0x122] sm:$0xff] }
 0x280   : > { %v4959_v57 = vpack.i.bf16 %v1772_v26, %v1771_v36  ;;  %v1844_v26 = vld [vmem:[#allocation2 + $0x199] sm:$0xff]  ;;  %v1590_v36 = vld [vmem:[#allocation2 + $0x8] sm:$0xff] }
 0x282   : > { %4905 = vrot.lane.b32.xlu0 %v6004_v30, %s5091_s17  ;;  %4895 = vrot.lane.b32.xlu1 %v4894_v21, %s5091_s17  ;;  %v6095_v30 = vld [vmem:[#allocation2 + $0xf2] sm:$0xff] }
 0x283   : > { %7230 = vst [vmem:[#allocation21_spill] sm:$0xff] %v6095_v30 }
 0x286   : > { %4920 = vrot.lane.b32.xlu0 %v4919_v7, %s5091_s17  ;;  %4910 = vrot.lane.b32.xlu1 %v4909_v17, %s5091_s17  ;;  %v4939_v7 = vpack.i.bf16 %v6097_v23, %v6095_v30  ;;  %v1769_v17 = vld [vmem:[#allocation2 + $0x10a] sm:$0xff]  ;;  %v1653_v30 = vld [vmem:[#allocation2 + $0x2] sm:$0xff] }
 0x28a   : > { %4925 = vrot.lane.b32.xlu0 %v6024_v41, %s5091_s17  ;;  %4915 = vrot.lane.b32.xlu1 %v4914_v62, %s5091_s17  ;;  %v4949_v41 = vpack.i.bf16 %v1770_v2, %v1769_v17  ;;  %v1842_v2 = vld [vmem:[#allocation2 + $0x181] sm:$0xff] }
 0x28b   : > { %v4984_v51 = vpack.i.bf16 %v1843_v44, %v1842_v2 }
 0x28e   : > { %4935 = vrot.lane.b32.xlu0 %v4834_v0, %s5091_s17  ;;  %4930 = vrot.lane.b32.xlu1 %v4929_v63, %s5091_s17  ;;  %v1773_v0 = vld [vmem:[#allocation2 + $0x13a] sm:$0xff] }
 0x28f   : > { %v4969_v23 = vpack.i.bf16 %v1774_v40, %v1773_v0  ;;  %v1589_v40 = vld [vmem:[#allocation2] sm:$0xff] }
 0x292   : > { %4945 = vrot.lane.b32.xlu0 %v4854_v37, %s5091_s17  ;;  %4940 = vrot.lane.b32.xlu1 %v4939_v7, %s5091_s17  ;;  %v1654_v37 = vld [vmem:[#allocation2 + $0xa] sm:$0xff] }
 0x296   : > { %4955 = vrot.lane.b32.xlu0 %v4874_v47, %s5091_s17  ;;  %4950 = vrot.lane.b32.xlu1 %v4949_v41, %s5091_s17 }
 0x29a   : > { %4965 = vrot.lane.b32.xlu0 %v4894_v21, %s5091_s17  ;;  %4960 = vrot.lane.b32.xlu1 %v4959_v57, %s5091_s17  ;;  %v1845_v57 = vld [vmem:[#allocation2 + $0x1a1] sm:$0xff] }
 0x29c   : > { %v4686_v63 = vpop.permute.xlu0 %4685 }
 0x29d   : > { %v4688_v7 = vunpack.i.h.bf16 %v4686_v63  ;;  %v4687_v17 = vunpack.i.l.bf16 %v4686_v63  ;;  %v4979_v63 = vpack.i.bf16 %v1776_v12, %v1775_v3 }
 0x29e   : > { %4975 = vrot.lane.b32.xlu0 %v4914_v62, %s5091_s17  ;;  %4970 = vrot.lane.b32.xlu1 %v4969_v23, %s5091_s17  ;;  %v4994_v62 = vpack.i.bf16 %v1845_v57, %v1844_v26  ;;  %v1778_v23 = vld [vmem:[#allocation2 + $0x172] sm:$0xff] }
 0x29f   : > { %v2422_v47 = vsel %vm1147_vm0, %v1653_v30, %v4687_v17  ;;  %v2423_v21 = vsel %vm1147_vm0, %v1654_v37, %v4688_v7  ;;  %v1777_v30 = vld [vmem:[#allocation2 + $0x16a] sm:$0xff] }
 0x2a0   : > { %v4696_v41 = vpop.permute.xlu1 %4695  ;;  %v4691_v0 = vpop.permute.xlu0 %4690  ;;  %v2519_v39 = vpack.c.bf16 %v2423_v21, %v2422_v47  ;;  %v4989_v21 = vpack.i.bf16 %v1778_v23, %v1777_v30 }
 0x2a1   : > { %v4698_v6 = vunpack.i.h.bf16 %v4696_v41  ;;  %v4697_v33 = vunpack.i.l.bf16 %v4696_v41  ;;  %v4693_v48 = vunpack.i.h.bf16 %v4691_v0  ;;  %v4692_v1 = vunpack.i.l.bf16 %v4691_v0 }
 0x2a2   : > { %4985 = vrot.lane.b32.xlu0 %v4984_v51, %s5091_s17  ;;  %2973 = vmatprep.mubr.bf16.mxu1 %v2519_v39 }
 0x2a3   : > { %v2391_v37 = vsel %vm1147_vm0, %v1590_v36, %v4693_v48  ;;  %v2390_v7 = vsel %vm1147_vm0, %v1589_v40, %v4692_v1  ;;  %4980 = vrot.lane.b32.xlu1 %v4979_v63, %s5091_s17  ;;  %v2424_v44 = vsel %vm1147_vm0, %v5916_v15, %v4697_v33  ;;  %v2425_v12 = vsel %vm1147_vm0, %v5918_v58, %v4698_v6  ;;  %v5077_v48 = vld [vmem:[%s7177_s7 + $0x108] sm:$0xff]   ;;  %v5078_v36 = vld [vmem:[%s7177_s7 + $0x110] sm:$0xff]  }
 0x2a4   : > { %v2518_v3 = vpack.c.bf16 %v2391_v37, %v2390_v7  ;;  %v4706_v17 = vpop.permute.xlu0 %4705  ;;  %v4701_v2 = vpop.permute.xlu1 %4700  ;;  %v2524_v51 = vpack.c.bf16 %v2425_v12, %v2424_v44  ;;  %v1779_v33 = vld [vmem:[#allocation2 + $0x182] sm:$0xff]  ;;  %v1780_v15 = vld [vmem:[#allocation2 + $0x18a] sm:$0xff]  ;;  %v5079_v37 = vld [vmem:[%s7177_s7 + $0x118] sm:$0xff]  }
 0x2a5   : > { %v4703_v39 = vunpack.i.h.bf16 %v4701_v2  ;;  %v4702_v47 = vunpack.i.l.bf16 %v4701_v2  ;;  %v4708_v1 = vunpack.i.h.bf16 %v4706_v17  ;;  %v4707_v26 = vunpack.i.l.bf16 %v4706_v17 }
 0x2a6   : > { %4995 = vrot.lane.b32.xlu0 %v4994_v62, %s5091_s17  ;;  %2974 = vmatmul.mubr.bf16.vlgmr.msra.gmra.mrb[32].mxu1 %v2518_v3  ;;  %v4999_v57 = vpack.i.bf16 %v1780_v15, %v1779_v33  ;;  %v1596_v33 = vld [vmem:[#allocation2 + $0x50] sm:$0xff] }
 0x2a7   : > { %4990 = vrot.lane.b32.xlu1 %v4989_v21, %s5091_s17  ;;  %2981 = vmatprep.mubr.bf16.mxu1 %v2524_v51  ;;  %v2392_v41 = vsel %vm1147_vm0, %v5712_v22, %v4702_v47  ;;  %v2393_v40 = vsel %vm1147_vm0, %v5714_v24, %v4703_v39  ;;  %v2426_v0 = vsel %vm1147_vm0, %v5967_v13, %v4707_v26  ;;  %v1595_v26 = vld [vmem:[#allocation2 + $0x48] sm:$0xff] }
 0x2a8   : > { %v4716_v58 = vpop.permute.xlu0 %4715  ;;  %v4711_v6 = vpop.permute.xlu1 %4710  ;;  %4619 = vmatpush3.bf16.msra.mxu1 %v5924_v52  ;;  %v2427_v52 = vsel %vm1147_vm0, %v5964_v55, %v4708_v1  ;;  %v2523_v62 = vpack.c.bf16 %v2393_v40, %v2392_v41 }
 0x2a9   : > { %4620 = vmatprep.subr.bf16.mxu1 %v5077_v48  ;;  %v4713_v24 = vunpack.i.h.bf16 %v4711_v6  ;;  %v4712_v30 = vunpack.i.l.bf16 %v4711_v6  ;;  %v2529_v23 = vpack.c.bf16 %v2427_v52, %v2426_v0  ;;  %v4718_v7 = vunpack.i.h.bf16 %v4716_v58 }
 0x2aa   : > { %3680 = vrot.lane.b32.xlu0 %v5656_v34, %s5091_s17  ;;  %v4717_v44 = vunpack.i.l.bf16 %v4716_v58 }
 0x2ab   : > { %5000 = vrot.lane.b32.xlu1 %v4999_v57, %s5091_s17  ;;  %v2394_v12 = vsel %vm1147_vm0, %v5739_v53, %v4712_v30  ;;  %v2395_v3 = vsel %vm1147_vm0, %v5741_v19, %v4713_v24  ;;  %v2429_v2 = vsel %vm1147_vm0, %v6006_v60, %v4718_v7  ;;  %v1783_v24 = vld [vmem:[#allocation2 + $0x38] sm:$0xff] }
 0x2ac   : > { %v4726_v22 = vpop.permute.xlu0 %4725  ;;  %v4721_v63 = vpop.permute.xlu1 %4720  ;;  %4621 = vmatpush3.bf16.msra.mxu1 %v5077_v48  ;;  %v2428_v17 = vsel %vm1147_vm0, %v6009_v38, %v4717_v44  ;;  %v2528_v53 = vpack.c.bf16 %v2395_v3, %v2394_v12  ;;  %v6196_v12 = vld [vmem:[#allocation2 + $0x60] sm:$0xff]  ;;  %v6198_v3 = vld [vmem:[#allocation2 + $0x68] sm:$0xff] }
 0x2ad   : > { %4622 = vmatprep.subr.bf16.mxu1 %v5078_v36  ;;  %v4723_v19 = vunpack.i.h.bf16 %v4721_v63  ;;  %v4722_v47 = vunpack.i.l.bf16 %v4721_v63  ;;  %v2534_v21 = vpack.c.bf16 %v2429_v2, %v2428_v17  ;;  %v4728_v48 = vunpack.i.h.bf16 %v4726_v22 }
 0x2ae   : > { %3684 = vrot.lane.b32.xlu0 %v5676_v50, %s5091_s17  ;;  %2982 = vmatmul.mubr.bf16.gmra.mrb[36].mxu1 %v2523_v62  ;;  %v4727_v1 = vunpack.i.l.bf16 %v4726_v22 }
 0x2af   : > { %3682 = vrot.lane.b32.xlu1 %v5651_v29, %s5091_s17  ;;  %2989 = vmatprep.mubr.bf16.mxu1 %v2529_v23  ;;  %v2396_v15 = vsel %vm1147_vm0, %v1595_v26, %v4722_v47  ;;  %v2397_v58 = vsel %vm1147_vm0, %v1596_v33, %v4723_v19  ;;  %v2431_v57 = vsel %vm1147_vm0, %v6026_v61, %v4728_v48  ;;  %v1717_v19 = vld [vmem:[#allocation2 + $0x19] sm:$0xff]  ;;  %v1718_v47 = vld [vmem:[#allocation2 + $0x21] sm:$0xff] }
 0x2b0   : > { %v6148_v55 = vpop.permute.xlu0 %4735  ;;  %v4731_v13 = vpop.permute.xlu1 %4730  ;;  %4623 = vmatpush3.bf16.msra.mxu1 %v5078_v36  ;;  %v2430_v6 = vsel %vm1147_vm0, %v6030_v28, %v4727_v1  ;;  %v2533_v0 = vpack.c.bf16 %v2397_v58, %v2396_v15  ;;  %v1782_v28 = vld [vmem:[#allocation2 + $0x30] sm:$0xff] }
 0x2b1   : > { %4624 = vmatprep.subr.bf16.mxu1 %v5079_v37  ;;  %v4733_v41 = vunpack.i.h.bf16 %v4731_v13  ;;  %v4732_v52 = vunpack.i.l.bf16 %v4731_v13  ;;  %v2539_v62 = vpack.c.bf16 %v2431_v57, %v2430_v6  ;;  %v4738_v61 = vunpack.i.h.bf16 %v6148_v55 }
 0x2b2   : > { %3688 = vrot.lane.b32.xlu0 %v5696_v8, %s5091_s17  ;;  %v4737_v30 = vunpack.i.l.bf16 %v6148_v55 }
 0x2b3   : > { %3686 = vrot.lane.b32.xlu1 %v5670_v45, %s5091_s17  ;;  %v2398_v55 = vsel %vm1147_vm0, %v6196_v12, %v4732_v52  ;;  %v2433_v15 = vsel %vm1147_vm0, %v6042_v18, %v4738_v61 }
 0x2b4   : > { %v6162_v51 = vpop.permute.xlu0 %4745  ;;  %v6164_v39 = vpop.permute.xlu1 %4740  ;;  %4625 = vmatpush3.bf16.msra.mxu1 %v5079_v37  ;;  %v2432_v1 = vsel %vm1147_vm0, %v6044_v11, %v4737_v30  ;;  %v6228_v30 = vld [vmem:[#allocation2 + $0x78] sm:$0xff] }
 0x2b5   : > { %v4748_v11 = vunpack.i.h.bf16 %v6162_v51  ;;  %v4747_v18 = vunpack.i.l.bf16 %v6162_v51 }
 0x2b6   : > { %3692 = vrot.lane.b32.xlu0 %v5720_v32, %s5091_s17  ;;  %2990 = vmatmul.mubr.bf16.gmra.mrb[40].mxu1 %v2528_v53  ;;  %v2399_v53 = vsel %vm1147_vm0, %v6198_v3, %v4733_v41 }
 0x2b7   : > { %3690 = vrot.lane.b32.xlu1 %v5690_v5, %s5091_s17  ;;  %2997 = vmatprep.mubr.bf16.mxu1 %v2534_v21  ;;  %v2538_v41 = vpack.c.bf16 %v2399_v53, %v2398_v55  ;;  %v2434_v55 = vsel %vm1147_vm0, %v6055_v59, %v4747_v18  ;;  %v2435_v53 = vsel %vm1147_vm0, %v6053_v43, %v4748_v11  ;;  %v6264_v11 = vld [vmem:[#allocation2 + $0x98] sm:$0xff] }
 0x2b8   : > { %v6170_v60 = vpop.permute.xlu0 %4760  ;;  %v6172_v38 = vpop.permute.xlu1 %4750 }
 0x2b9   : > { %v4763_v59 = vunpack.i.h.bf16 %v6170_v60  ;;  %v4762_v43 = vunpack.i.l.bf16 %v6170_v60 }
 0x2ba   : > { %3696 = vrot.lane.b32.xlu0 %v5747_v56, %s5091_s17 }
 0x2bb   : > { %3694 = vrot.lane.b32.xlu1 %v5710_v14, %s5091_s17 }
 0x2bc   : > { %v4766_v40 = vpop.permute.xlu0 %4765  ;;  %v6184_v36 = vpop.permute.xlu1 %4755 }
 0x2bd   : > { %v4768_v22 = vunpack.i.h.bf16 %v4766_v40  ;;  %v4767_v63 = vunpack.i.l.bf16 %v4766_v40  ;;  %v4743_v40 = vunpack.i.h.bf16 %v6164_v39 }
 0x2be   : > { %3700 = vrot.lane.b32.xlu0 %v5768_v16, %s5091_s17  ;;  %2998 = vmatmul.mubr.bf16.gmra.mrb[44].mxu1 %v2533_v0  ;;  %v4742_v0 = vunpack.i.l.bf16 %v6164_v39 }
 0x2bf   : > { %3698 = vrot.lane.b32.xlu1 %v5737_v46, %s5091_s17  ;;  %3005 = vmatprep.mubr.bf16.mxu1 %v2539_v62  ;;  %v2486_v23 = vsel %vm1147_vm0, %v1782_v28, %v4767_v63  ;;  %v2487_v37 = vsel %vm1147_vm0, %v1783_v24, %v4768_v22  ;;  %v2544_v63 = vpack.c.bf16 %v2433_v15, %v2432_v1  ;;  %v4753_v1 = vunpack.i.h.bf16 %v6172_v38 }
 0x2c0   : > { %v6194_v7 = vpop.permute.xlu0 %4780  ;;  %v4771_v44 = vpop.permute.xlu1 %4770  ;;  %v2521_v13 = vpack.c.bf16 %v2487_v37, %v2486_v23  ;;  %v6230_v23 = vld [vmem:[#allocation2 + $0x80] sm:$0xff]  ;;  %v2400_v51 = vsel %vm1147_vm0, %v6228_v30, %v4742_v0  ;;  %v4752_v15 = vunpack.i.l.bf16 %v6172_v38 }
 0x2c1   : > { %v4773_v17 = vunpack.i.h.bf16 %v4771_v44  ;;  %v4772_v2 = vunpack.i.l.bf16 %v4771_v44 }
 0x2c2   : > { %3704 = vrot.lane.b32.xlu0 %v5790_v4, %s5091_s17  ;;  %3134 = vmatprep.mubr.bf16.mxu0 %v2521_v13  ;;  %v2401_v13 = vsel %vm1147_vm0, %v6230_v23, %v4743_v40 }
 0x2c3   : > { %v2455_v21 = vsel %vm1147_vm0, %v1718_v47, %v4773_v17  ;;  %v2454_v48 = vsel %vm1147_vm0, %v1717_v19, %v4772_v2  ;;  %3702 = vrot.lane.b32.xlu1 %v5762_v10, %s5091_s17 }
 0x2c4   : > { %v2520_v58 = vpack.c.bf16 %v2455_v21, %v2454_v48  ;;  %v4786_v6 = vpop.permute.xlu0 %4785  ;;  %v6214_v57 = vpop.permute.xlu1 %4775  ;;  %v2543_v21 = vpack.c.bf16 %v2401_v13, %v2400_v51 }
 0x2c5   : > { %v4788_v52 = vunpack.i.h.bf16 %v4786_v6  ;;  %v4787_v22 = vunpack.i.l.bf16 %v4786_v6 }
 0x2c6   : > { %3708 = vrot.lane.b32.xlu0 %v5815_v27, %s5091_s17  ;;  %3006 = vmatmul.mubr.bf16.gmra.mrb[48].mxu1 %v2538_v41  ;;  %v2549_v41 = vpack.c.bf16 %v2435_v53, %v2434_v55  ;;  %v4757_v55 = vunpack.i.l.bf16 %v6184_v36 }
 0x2c7   : > { %3706 = vrot.lane.b32.xlu1 %v5784_v42, %s5091_s17  ;;  %3135 = vmatmul.mubr.bf16.vlgmr.msra.gmra.mrb[64].mxu0 %v2520_v58  ;;  %v2488_v62 = vsel %vm1147_vm0, %v1595_v26, %v4787_v22  ;;  %v2489_v28 = vsel %vm1147_vm0, %v1596_v33, %v4788_v52  ;;  %v1719_v26 = vld [vmem:[#allocation2 + $0x31] sm:$0xff]  ;;  %v1720_v33 = vld [vmem:[#allocation2 + $0x39] sm:$0xff] }
 0x2c8   : > { %3013 = vmatprep.mubr.bf16.mxu1 %v2544_v63  ;;  %v6226_v39 = vpop.permute.xlu0 %4800  ;;  %v4791_v24 = vpop.permute.xlu1 %4790  ;;  %v2526_v61 = vpack.c.bf16 %v2489_v28, %v2488_v62  ;;  %v6262_v63 = vld [vmem:[#allocation2 + $0x90] sm:$0xff] }
 0x2c9   : > { %v4793_v37 = vunpack.i.h.bf16 %v4791_v24  ;;  %v4792_v44 = vunpack.i.l.bf16 %v4791_v24  ;;  %v2402_v62 = vsel %vm1147_vm0, %v6262_v63, %v4752_v15  ;;  %v1722_v28 = vld [vmem:[#allocation2 + $0x51] sm:$0xff] }
 0x2ca   : > { %3712 = vrot.lane.b32.xlu0 %v5840_v9, %s5091_s17  ;;  %3142 = vmatprep.mubr.bf16.mxu0 %v2526_v61  ;;  %v7234_v15 = vld [vmem:[#allocation3_spill] sm:$0xff] }
 0x2cb   : > { %3710 = vrot.lane.b32.xlu1 %v5809_v25, %s5091_s17  ;;  %v2456_v17 = vsel %vm1147_vm0, %v1719_v26, %v4792_v44  ;;  %v2457_v2 = vsel %vm1147_vm0, %v1720_v33, %v4793_v37  ;;  %v2436_v37 = vsel %vm1147_vm0, %v6066_v31, %v4762_v43  ;;  %v7232_v44 = vld [vmem:[#allocation16_spill] sm:$0xff]  ;;  %v4783_v31 = vunpack.i.h.bf16 %v6194_v7  ;;  %v6296_v43 = vld [vmem:[#allocation2 + $0xa8] sm:$0xff] }
 0x2cc   : > { %v4806_v19 = vpop.permute.xlu0 %4805  ;;  %v6246_v47 = vpop.permute.xlu1 %4795  ;;  %v2525_v48 = vpack.c.bf16 %v2457_v2, %v2456_v17  ;;  %v2437_v51 = vsel %vm1147_vm0, %v7232_v44, %v4763_v59  ;;  %v4758_v2 = vunpack.i.h.bf16 %v6184_v36 }
 0x2cd   : > { %v4808_v58 = vunpack.i.h.bf16 %v4806_v19  ;;  %v4807_v6 = vunpack.i.l.bf16 %v4806_v19 }
 0x2ce   : > { %3716 = vrot.lane.b32.xlu0 %v5865_v20, %s5091_s17  ;;  %3014 = vmatmul.mubr.bf16.gmra.mrb[52].mxu1 %v2543_v21  ;;  %v7233_v21 = vld [vmem:[#allocation5_spill] sm:$0xff] }
 0x2cf   : > { %3714 = vrot.lane.b32.xlu1 %v5834_v54, %s5091_s17  ;;  %3143 = vmatmul.mubr.bf16.gmra.mrb[68].mxu0 %v2525_v48  ;;  %v2490_v40 = vsel %vm1147_vm0, %v6196_v12, %v4807_v6  ;;  %v2491_v38 = vsel %vm1147_vm0, %v6198_v3, %v4808_v58  ;;  %v2403_v12 = vsel %vm1147_vm0, %v6264_v11, %v4753_v1  ;;  %v1721_v3 = vld [vmem:[#allocation2 + $0x49] sm:$0xff]  ;;  %v4782_v1 = vunpack.i.l.bf16 %v6194_v7 }
 0x2d0   : > { %3021 = vmatprep.mubr.bf16.mxu1 %v2549_v41  ;;  %v6260_v0 = vpop.permute.xlu0 %4820  ;;  %v4811_v52 = vpop.permute.xlu1 %4810  ;;  %v2531_v22 = vpack.c.bf16 %v2491_v38, %v2490_v40  ;;  %v2548_v33 = vpack.c.bf16 %v2403_v12, %v2402_v62  ;;  %v2554_v48 = vpack.c.bf16 %v2437_v51, %v2436_v37  ;;  %v6298_v40 = vld [vmem:[#allocation2 + $0xb0] sm:$0xff] }
 0x2d1   : > { %v4813_v60 = vunpack.i.h.bf16 %v4811_v52  ;;  %v4812_v18 = vunpack.i.l.bf16 %v4811_v52  ;;  %v2404_v52 = vsel %vm1147_vm0, %v6296_v43, %v4757_v55 }
 0x2d2   : > { %3720 = vrot.lane.b32.xlu0 %v5890_v49, %s5091_s17  ;;  %3150 = vmatprep.mubr.bf16.mxu0 %v2531_v22  ;;  %v7235_v22 = vld [vmem:[#allocation7_spill] sm:$0xff] }
 0x2d3   : > { %3718 = vrot.lane.b32.xlu1 %v5859_v35, %s5091_s17  ;;  %v2458_v24 = vsel %vm1147_vm0, %v1721_v3, %v4812_v18  ;;  %v2459_v61 = vsel %vm1147_vm0, %v1722_v28, %v4813_v60  ;;  %v1724_v60 = vld [vmem:[#allocation2 + $0x69] sm:$0xff]  ;;  %v7236_v18 = vld [vmem:[#allocation4_spill] sm:$0xff] }
 0x2d4   : > { %v4826_v13 = vpop.permute.xlu0 %4825  ;;  %v6280_v26 = vpop.permute.xlu1 %4815  ;;  %v2530_v17 = vpack.c.bf16 %v2459_v61, %v2458_v24  ;;  %v7237_v3 = vld [vmem:[#allocation18_spill] sm:$0xff]  ;;  %v7238_v24 = vld [vmem:[#allocation17_spill] sm:$0xff] }
 0x2d5   : > { %v4828_v53 = vunpack.i.h.bf16 %v4826_v13  ;;  %v4827_v19 = vunpack.i.l.bf16 %v4826_v13  ;;  %v2438_v28 = vsel %vm1147_vm0, %v7237_v3, %v4782_v1  ;;  %v2439_v61 = vsel %vm1147_vm0, %v7238_v24, %v4783_v31  ;;  %v7240_v1 = vld [vmem:[#allocation6_spill] sm:$0xff] }
 0x2d6   : > { %3724 = vrot.lane.b32.xlu0 %v7233_v21, %s5091_s17  ;;  %3022 = vmatmul.mubr.bf16.gmra.mrb[56].mxu1 %v2548_v33  ;;  %v4778_v33 = vunpack.i.h.bf16 %v6214_v57  ;;  %v4802_v31 = vunpack.i.l.bf16 %v6226_v39 }
 0x2d7   : > { %3722 = vrot.lane.b32.xlu1 %v7234_v15, %s5091_s17  ;;  %3151 = vmatmul.mubr.bf16.gmra.mrb[72].mxu0 %v2530_v17  ;;  %v2492_v58 = vsel %vm1147_vm0, %v6228_v30, %v4827_v19  ;;  %v2493_v36 = vsel %vm1147_vm0, %v6230_v23, %v4828_v53  ;;  %v2405_v30 = vsel %vm1147_vm0, %v6298_v40, %v4758_v2  ;;  %v1723_v23 = vld [vmem:[#allocation2 + $0x61] sm:$0xff]  ;;  %v4777_v17 = vunpack.i.l.bf16 %v6214_v57 }
 0x2d8   : > { %3029 = vmatprep.mubr.bf16.mxu1 %v2554_v48  ;;  %v6294_v6 = vpop.permute.xlu0 %4840  ;;  %v4831_v41 = vpop.permute.xlu1 %4830  ;;  %v2536_v59 = vpack.c.bf16 %v2493_v36, %v2492_v58  ;;  %v2553_v51 = vpack.c.bf16 %v2405_v30, %v2404_v52  ;;  %v7239_v53 = vld [vmem:[#allocation9_spill] sm:$0xff]  ;;  %v2559_v19 = vpack.c.bf16 %v2439_v61, %v2438_v28  ;;  %v4803_v48 = vunpack.i.h.bf16 %v6226_v39  ;;  %v7243_v28 = vld [vmem:[#allocation19_spill] sm:$0xff]  ;;  %v7244_v61 = vld [vmem:[#allocation20_spill] sm:$0xff] }
 0x2d9   : > { %v4833_v7 = vunpack.i.h.bf16 %v4831_v41  ;;  %v4832_v38 = vunpack.i.l.bf16 %v4831_v41  ;;  %v2440_v24 = vsel %vm1147_vm0, %v7243_v28, %v4802_v31  ;;  %v7247_v28 = vld [vmem:[#allocation22_spill] sm:$0xff] }
 0x2da   : > { %3728 = vrot.lane.b32.xlu0 %v7235_v22, %s5091_s17  ;;  %3158 = vmatprep.mubr.bf16.mxu0 %v2536_v59 }
 0x2db   : > { %3726 = vrot.lane.b32.xlu1 %v7236_v18, %s5091_s17  ;;  %v2460_v62 = vsel %vm1147_vm0, %v1723_v23, %v4832_v38  ;;  %v2461_v12 = vsel %vm1147_vm0, %v1724_v60, %v4833_v7  ;;  %v6330_v7 = vld [vmem:[#allocation2 + $0xc0] sm:$0xff]  ;;  %v6332_v38 = vld [vmem:[#allocation2 + $0xc8] sm:$0xff]  ;;  %v7241_v23 = vld [vmem:[#allocation11_spill] sm:$0xff] }
 0x2dc   : > { %v4846_v37 = vpop.permute.xlu0 %4845  ;;  %v6314_v44 = vpop.permute.xlu1 %4835  ;;  %v2535_v13 = vpack.c.bf16 %v2461_v12, %v2460_v62  ;;  %v2406_v30 = vsel %vm1147_vm0, %v6330_v7, %v4777_v17  ;;  %v1726_v60 = vld [vmem:[#allocation2 + $0x81] sm:$0xff]  ;;  %v7242_v62 = vld [vmem:[#allocation8_spill] sm:$0xff] }
 0x2dd   : > { %v4848_v2 = vunpack.i.h.bf16 %v4846_v37  ;;  %v4847_v55 = vunpack.i.l.bf16 %v4846_v37  ;;  %v2441_v37 = vsel %vm1147_vm0, %v7244_v61, %v4803_v48  ;;  %v1727_v61 = vld [vmem:[#allocation2 + $0x91] sm:$0xff] }
 0x2de   : > { %3732 = vrot.lane.b32.xlu0 %v7239_v53, %s5091_s17  ;;  %3030 = vmatmul.mubr.bf16.gmra.mrb[60].mxu1 %v2553_v51  ;;  %v4798_v51 = vunpack.i.h.bf16 %v6246_v47  ;;  %v2564_v31 = vpack.c.bf16 %v2441_v37, %v2440_v24  ;;  %v1728_v37 = vld [vmem:[#allocation2 + $0x99] sm:$0xff] }
 0x2df   : > { %3730 = vrot.lane.b32.xlu1 %v7240_v1, %s5091_s17  ;;  %3159 = vmatmul.mubr.bf16.gmra.mrb[76].mxu0 %v2535_v13  ;;  %v2494_v58 = vsel %vm1147_vm0, %v6262_v63, %v4847_v55  ;;  %v2495_v57 = vsel %vm1147_vm0, %v6264_v11, %v4848_v2  ;;  %v2407_v63 = vsel %vm1147_vm0, %v6332_v38, %v4778_v33  ;;  %v1725_v11 = vld [vmem:[#allocation2 + $0x79] sm:$0xff]  ;;  %v4797_v13 = vunpack.i.l.bf16 %v6246_v47 }
 0x2e0   : > { %3037 = vmatprep.mubr.bf16.mxu1 %v2559_v19  ;;  %v6328_v36 = vpop.permute.xlu0 %4860  ;;  %v4851_v41 = vpop.permute.xlu1 %4850  ;;  %v2541_v59 = vpack.c.bf16 %v2495_v57, %v2494_v58  ;;  %v2558_v2 = vpack.c.bf16 %v2407_v63, %v2406_v30  ;;  %v4823_v19 = vunpack.i.h.bf16 %v6260_v0  ;;  %v4822_v58 = vunpack.i.l.bf16 %v6260_v0 }
 0x2e1   : > { %v4853_v39 = vunpack.i.h.bf16 %v4851_v41  ;;  %v4852_v52 = vunpack.i.l.bf16 %v4851_v41 }
 0x2e2   : > { %3736 = vrot.lane.b32.xlu0 %v7241_v23, %s5091_s17  ;;  %3166 = vmatprep.mubr.bf16.mxu0 %v2541_v59  ;;  %v7245_v59 = vld [vmem:[#allocation10_spill] sm:$0xff]  ;;  %v2443_v24 = vsel %vm1147_vm0, %v7247_v28, %v4823_v19  ;;  %v4843_v19 = vunpack.i.h.bf16 %v6294_v6 }
 0x2e3   : > { %3734 = vrot.lane.b32.xlu1 %v7242_v62, %s5091_s17  ;;  %v2462_v12 = vsel %vm1147_vm0, %v1725_v11, %v4852_v52  ;;  %v2463_v3 = vsel %vm1147_vm0, %v1726_v60, %v4853_v39  ;;  %v6360_v39 = vld [vmem:[#allocation2 + $0xd8] sm:$0xff]  ;;  %v6362_v52 = vld [vmem:[#allocation2 + $0xe0] sm:$0xff] }
 0x2e4   : > { %v4866_v33 = vpop.permute.xlu0 %4865  ;;  %v6350_v17 = vpop.permute.xlu1 %4855  ;;  %v2540_v55 = vpack.c.bf16 %v2463_v3, %v2462_v12  ;;  %v2408_v11 = vsel %vm1147_vm0, %v6360_v39, %v4797_v13  ;;  %v2409_v60 = vsel %vm1147_vm0, %v6362_v52, %v4798_v51  ;;  %v7246_v3 = vld [vmem:[#allocation21_spill] sm:$0xff] }
 0x2e5   : > { %v4868_v57 = vunpack.i.h.bf16 %v4866_v33  ;;  %v4867_v41 = vunpack.i.l.bf16 %v4866_v33  ;;  %v1613_v62 = vld [vmem:[#allocation2 + $0x120] sm:$0xff] }
 0x2e6   : > { %3038 = vmatmul.mubr.bf16.gmra.mrb[64].mxu1 %v2558_v2 }
 0x2e7   : > { %3738 = vrot.lane.b32.xlu1 %v7245_v59, %s5091_s17  ;;  %3167 = vmatmul.mubr.bf16.gmra.mrb[80].mxu0 %v2540_v55  ;;  %v2496_v47 = vsel %vm1147_vm0, %v6296_v43, %v4867_v41  ;;  %v2497_v48 = vsel %vm1147_vm0, %v6298_v40, %v4868_v57  ;;  %v2442_v40 = vsel %vm1147_vm0, %v7246_v3, %v4822_v58  ;;  %v4817_v58 = vunpack.i.l.bf16 %v6280_v26  ;;  %v6390_v3 = vld [vmem:[#allocation2 + $0xf8] sm:$0xff] }
 0x2e8   : > { %3045 = vmatprep.mubr.bf16.mxu1 %v2564_v31  ;;  %v6364_v0 = vpop.permute.xlu0 %4880  ;;  %v4871_v30 = vpop.permute.xlu1 %4870  ;;  %v2546_v63 = vpack.c.bf16 %v2497_v48, %v2496_v47  ;;  %v2563_v57 = vpack.c.bf16 %v2409_v60, %v2408_v11  ;;  %v2569_v41 = vpack.c.bf16 %v2443_v24, %v2442_v40  ;;  %v4818_v31 = vunpack.i.h.bf16 %v6280_v26  ;;  %v6388_v26 = vld [vmem:[#allocation2 + $0xf0] sm:$0xff] }
 0x2e9   : > { %v4873_v12 = vunpack.i.h.bf16 %v4871_v30  ;;  %v4872_v43 = vunpack.i.l.bf16 %v4871_v30  ;;  %v4842_v30 = vunpack.i.l.bf16 %v6294_v6  ;;  %v2410_v6 = vsel %vm1147_vm0, %v6388_v26, %v4817_v58 }
 0x2ea   : > { %3174 = vmatprep.mubr.bf16.mxu0 %v2546_v63  ;;  %v2411_v24 = vsel %vm1147_vm0, %v6390_v3, %v4818_v31 }
 0x2eb   : > { %v2464_v33 = vsel %vm1147_vm0, %v1727_v61, %v4872_v43  ;;  %v2465_v2 = vsel %vm1147_vm0, %v1728_v37, %v4873_v12  ;;  %v6398_v61 = vld [vmem:[#allocation2 + $0x112] sm:$0xff] }
 0x2ec   : > { %v4886_v55 = vpop.permute.xlu0 %4885  ;;  %v6376_v13 = vpop.permute.xlu1 %4875  ;;  %v2545_v51 = vpack.c.bf16 %v2465_v2, %v2464_v33  ;;  %v1730_v37 = vld [vmem:[#allocation2 + $0xb1] sm:$0xff]  ;;  %v2445_v2 = vsel %vm1147_vm0, %v6398_v61, %v4843_v19  ;;  %v4862_v19 = vunpack.i.l.bf16 %v6328_v36 }
 0x2ed   : > { %v4888_v47 = vunpack.i.h.bf16 %v4886_v55  ;;  %v4887_v48 = vunpack.i.l.bf16 %v4886_v55 }
 0x2ee   : > { %3046 = vmatmul.mubr.bf16.gmra.mrb[68].mxu1 %v2563_v57 }
 0x2ef   : > { %3175 = vmatmul.mubr.bf16.gmra.mrb[84].mxu0 %v2545_v51  ;;  %3053 = vmatprep.mubr.bf16.mxu1 %v2569_v41  ;;  %v2498_v63 = vsel %vm1147_vm0, %v6330_v7, %v4887_v48  ;;  %v2499_v11 = vsel %vm1147_vm0, %v6332_v38, %v4888_v47  ;;  %v6396_v7 = vld [vmem:[#allocation2 + $0x10a] sm:$0xff]  ;;  %v4838_v51 = vunpack.i.h.bf16 %v6314_v44  ;;  %v4837_v41 = vunpack.i.l.bf16 %v6314_v44 }
 0x2f0   : > { %v6386_v60 = vpop.permute.xlu0 %4900  ;;  %v4891_v12 = vpop.permute.xlu1 %4890  ;;  %v2551_v43 = vpack.c.bf16 %v2499_v11, %v2498_v63  ;;  %v1729_v38 = vld [vmem:[#allocation2 + $0xa9] sm:$0xff]  ;;  %v2444_v33 = vsel %vm1147_vm0, %v6396_v7, %v4842_v30  ;;  %v2568_v47 = vpack.c.bf16 %v2411_v24, %v2410_v6  ;;  %v4863_v30 = vunpack.i.h.bf16 %v6328_v36 }
 0x2f1   : > { %v4893_v40 = vunpack.i.h.bf16 %v4891_v12  ;;  %v4892_v28 = vunpack.i.l.bf16 %v4891_v12  ;;  %v2574_v12 = vpack.c.bf16 %v2445_v2, %v2444_v33 }
 0x2f2   : > { %3182 = vmatprep.mubr.bf16.mxu0 %v2551_v43 }
 0x2f3   : > { %v2466_v55 = vsel %vm1147_vm0, %v1729_v38, %v4892_v28  ;;  %v2467_v57 = vsel %vm1147_vm0, %v1730_v37, %v4893_v40  ;;  %v1611_v40 = vld [vmem:[#allocation2 + $0x108] sm:$0xff]  ;;  %v1612_v28 = vld [vmem:[#allocation2 + $0x110] sm:$0xff] }
 0x2f4   : > { %v4906_v31 = vpop.permute.xlu0 %4905  ;;  %v6408_v58 = vpop.permute.xlu1 %4895  ;;  %v2550_v48 = vpack.c.bf16 %v2467_v57, %v2466_v55  ;;  %v2412_v37 = vsel %vm1147_vm0, %v1611_v40, %v4837_v41  ;;  %v2413_v33 = vsel %vm1147_vm0, %v1612_v28, %v4838_v51  ;;  %v6420_v55 = vld [vmem:[#allocation2 + $0x122] sm:$0xff]  ;;  %v6422_v57 = vld [vmem:[#allocation2 + $0x12a] sm:$0xff] }
 0x2f5   : > { %v4908_v63 = vunpack.i.h.bf16 %v4906_v31  ;;  %v4907_v11 = vunpack.i.l.bf16 %v4906_v31  ;;  %v1732_v31 = vld [vmem:[#allocation2 + $0xc9] sm:$0xff]  ;;  %v2573_v41 = vpack.c.bf16 %v2413_v33, %v2412_v37 }
 0x2f6   : > { %3054 = vmatmul.mubr.bf16.gmra.mrb[72].mxu1 %v2568_v47  ;;  %v2447_v47 = vsel %vm1147_vm0, %v6422_v57, %v4863_v30  ;;  %v1614_v33 = vld [vmem:[#allocation2 + $0x128] sm:$0xff] }
 0x2f7   : > { %3183 = vmatmul.mubr.bf16.gmra.mrb[88].mxu0 %v2550_v48  ;;  %3061 = vmatprep.mubr.bf16.mxu1 %v2574_v12  ;;  %v2500_v43 = vsel %vm1147_vm0, %v6360_v39, %v4907_v11  ;;  %v2501_v44 = vsel %vm1147_vm0, %v6362_v52, %v4908_v63  ;;  %v1731_v39 = vld [vmem:[#allocation2 + $0xc1] sm:$0xff]  ;;  %v2446_v52 = vsel %vm1147_vm0, %v6420_v55, %v4862_v19  ;;  %v4857_v48 = vunpack.i.l.bf16 %v6350_v17 }
 0x2f8   : > { %v6416_v6 = vpop.permute.xlu0 %4920  ;;  %v4911_v24 = vpop.permute.xlu1 %4910  ;;  %v2556_v38 = vpack.c.bf16 %v2501_v44, %v2500_v43  ;;  %v4858_v11 = vunpack.i.h.bf16 %v6350_v17  ;;  %v4883_v12 = vunpack.i.h.bf16 %v6364_v0  ;;  %v4882_v43 = vunpack.i.l.bf16 %v6364_v0 }
 0x2f9   : > { %v4913_v36 = vunpack.i.h.bf16 %v4911_v24  ;;  %v4912_v2 = vunpack.i.l.bf16 %v4911_v24  ;;  %v2579_v30 = vpack.c.bf16 %v2447_v47, %v2446_v52  ;;  %v2414_v0 = vsel %vm1147_vm0, %v1613_v62, %v4857_v48  ;;  %v1733_v48 = vld [vmem:[#allocation2 + $0xd9] sm:$0xff] }
 0x2fa   : > { %3190 = vmatprep.mubr.bf16.mxu0 %v2556_v38  ;;  %v2415_v47 = vsel %vm1147_vm0, %v1614_v33, %v4858_v11  ;;  %v4923_v53 = vunpack.i.h.bf16 %v6416_v6 }
 0x2fb   : > { %v2468_v51 = vsel %vm1147_vm0, %v1731_v39, %v4912_v2  ;;  %v2469_v63 = vsel %vm1147_vm0, %v1732_v31, %v4913_v36  ;;  %v6441_v36 = vld [vmem:[#allocation2 + $0x13a] sm:$0xff]  ;;  %v6443_v2 = vld [vmem:[#allocation2 + $0x142] sm:$0xff] }
 0x2fc   : > { %v4926_v44 = vpop.permute.xlu0 %4925  ;;  %v6434_v24 = vpop.permute.xlu1 %4915  ;;  %v2555_v19 = vpack.c.bf16 %v2469_v63, %v2468_v51 }
 0x2fd   : > { %v4928_v38 = vunpack.i.h.bf16 %v4926_v44  ;;  %v4927_v59 = vunpack.i.l.bf16 %v4926_v44  ;;  %v1734_v44 = vld [vmem:[#allocation2 + $0xe1] sm:$0xff] }
 0x2fe   : > { %3062 = vmatmul.mubr.bf16.gmra.mrb[76].mxu1 %v2573_v41  ;;  %v2448_v41 = vsel %vm1147_vm0, %v6441_v36, %v4882_v43 }
 0x2ff   : > { %3191 = vmatmul.mubr.bf16.gmra.mrb[92].mxu0 %v2555_v19  ;;  %3069 = vmatprep.mubr.bf16.mxu1 %v2579_v30  ;;  %v2502_v37 = vsel %vm1147_vm0, %v6388_v26, %v4927_v59  ;;  %v2503_v17 = vsel %vm1147_vm0, %v6390_v3, %v4928_v38  ;;  %v2449_v59 = vsel %vm1147_vm0, %v6443_v2, %v4883_v12 }
 0x300   : > { %v4936_v39 = vpop.permute.xlu0 %4935  ;;  %v4931_v31 = vpop.permute.xlu1 %4930  ;;  %v2561_v52 = vpack.c.bf16 %v2503_v17, %v2502_v37  ;;  %v2578_v17 = vpack.c.bf16 %v2415_v47, %v2414_v0  ;;  %v2584_v12 = vpack.c.bf16 %v2449_v59, %v2448_v41  ;;  %v1616_v41 = vld [vmem:[#allocation2 + $0x140] sm:$0xff]  ;;  %v6458_v59 = vld [vmem:[#allocation2 + $0x152] sm:$0xff] }
 0x301   : > { %v4938_v26 = vunpack.i.h.bf16 %v4936_v39  ;;  %v4937_v3 = vunpack.i.l.bf16 %v4936_v39  ;;  %v4933_v51 = vunpack.i.h.bf16 %v4931_v31  ;;  %v4932_v63 = vunpack.i.l.bf16 %v4931_v31 }
 0x302   : > { %3198 = vmatprep.mubr.bf16.mxu0 %v2561_v52  ;;  %v4878_v39 = vunpack.i.h.bf16 %v6376_v13  ;;  %v4877_v31 = vunpack.i.l.bf16 %v6376_v13  ;;  %v4903_v52 = vunpack.i.h.bf16 %v6386_v60 }
 0x303   : > { %v2470_v19 = vsel %vm1147_vm0, %v1733_v48, %v4932_v63  ;;  %v2471_v38 = vsel %vm1147_vm0, %v1734_v44, %v4933_v51  ;;  %v2504_v30 = vsel %vm1147_vm0, %v1611_v40, %v4937_v3  ;;  %v2505_v11 = vsel %vm1147_vm0, %v1612_v28, %v4938_v26  ;;  %v1615_v28 = vld [vmem:[#allocation2 + $0x138] sm:$0xff] }
 0x304   : > { %v4946_v37 = vpop.permute.xlu0 %4945  ;;  %v4941_v43 = vpop.permute.xlu1 %4940  ;;  %v2560_v23 = vpack.c.bf16 %v2471_v38, %v2470_v19  ;;  %v2566_v1 = vpack.c.bf16 %v2505_v11, %v2504_v30  ;;  %v4902_v63 = vunpack.i.l.bf16 %v6386_v60  ;;  %v6460_v26 = vld [vmem:[#allocation2 + $0x15a] sm:$0xff]  ;;  %v2416_v13 = vsel %vm1147_vm0, %v1615_v28, %v4877_v31  ;;  %v1735_v44 = vld [vmem:[#allocation2 + $0xf1] sm:$0xff] }
 0x305   : > { %v4943_v48 = vunpack.i.h.bf16 %v4941_v43  ;;  %v4942_v51 = vunpack.i.l.bf16 %v4941_v43  ;;  %v4948_v40 = vunpack.i.h.bf16 %v4946_v37  ;;  %v4947_v3 = vunpack.i.l.bf16 %v4946_v37  ;;  %v1736_v19 = vld [vmem:[#allocation2 + $0xf9] sm:$0xff] }
 0x306   : > { %3070 = vmatmul.mubr.bf16.gmra.mrb[80].mxu1 %v2578_v17  ;;  %v2417_v60 = vsel %vm1147_vm0, %v1616_v41, %v4878_v39  ;;  %v2450_v38 = vsel %vm1147_vm0, %v6458_v59, %v4902_v63  ;;  %v4898_v31 = vunpack.i.h.bf16 %v6408_v58  ;;  %v4897_v63 = vunpack.i.l.bf16 %v6408_v58  ;;  %v1618_v58 = vld [vmem:[#allocation2 + $0x158] sm:$0xff] }
 0x307   : > { %3199 = vmatmul.mubr.bf16.gmra.mrb[96].mxu0 %v2560_v23  ;;  %3077 = vmatprep.mubr.bf16.mxu1 %v2584_v12  ;;  %v2451_v23 = vsel %vm1147_vm0, %v6460_v26, %v4903_v52  ;;  %v2473_v30 = vsel %vm1147_vm0, %v1736_v19, %v4943_v48  ;;  %v2506_v11 = vsel %vm1147_vm0, %v1613_v62, %v4947_v3 }
 0x308   : > { %3206 = vmatprep.mubr.bf16.mxu0 %v2566_v1  ;;  %v4956_v0 = vpop.permute.xlu0 %4955  ;;  %v4951_v47 = vpop.permute.xlu1 %4950  ;;  %v2472_v1 = vsel %vm1147_vm0, %v1735_v44, %v4942_v51  ;;  %v2507_v37 = vsel %vm1147_vm0, %v1614_v33, %v4948_v40  ;;  %v2583_v12 = vpack.c.bf16 %v2417_v60, %v2416_v13  ;;  %v2589_v39 = vpack.c.bf16 %v2451_v23, %v2450_v38  ;;  %v1617_v60 = vld [vmem:[#allocation2 + $0x150] sm:$0xff] }
 0x309   : > { %v2565_v52 = vpack.c.bf16 %v2473_v30, %v2472_v1  ;;  %v4922_v51 = vunpack.i.l.bf16 %v6416_v6  ;;  %v4953_v44 = vunpack.i.h.bf16 %v4951_v47  ;;  %v4952_v48 = vunpack.i.l.bf16 %v4951_v47  ;;  %v1737_v6 = vld [vmem:[#allocation2 + $0x109] sm:$0xff]  ;;  %v1738_v23 = vld [vmem:[#allocation2 + $0x111] sm:$0xff] }
 0x30a   : > { %v2571_v62 = vpack.c.bf16 %v2507_v37, %v2506_v11  ;;  %v4958_v3 = vunpack.i.h.bf16 %v4956_v0  ;;  %v4957_v33 = vunpack.i.l.bf16 %v4956_v0  ;;  %v2418_v19 = vsel %vm1147_vm0, %v1617_v60, %v4897_v63  ;;  %v5080_v0 = vld [vmem:[#allocation2 + $0x16a] sm:$0xff]  ;;  %v5081_v11 = vld [vmem:[#allocation2 + $0x172] sm:$0xff] }
 0x30b   : > { %v2419_v38 = vsel %vm1147_vm0, %v1618_v58, %v4898_v31  ;;  %v2474_v47 = vsel %vm1147_vm0, %v1737_v6, %v4952_v48  ;;  %v2475_v1 = vsel %vm1147_vm0, %v1738_v23, %v4953_v44  ;;  %v2452_v30 = vsel %vm1147_vm0, %v5080_v0, %v4922_v51 }
 0x30c   : > { %v6472_v43 = vpop.permute.xlu0 %4965  ;;  %v4961_v17 = vpop.permute.xlu1 %4960  ;;  %v2453_v37 = vsel %vm1147_vm0, %v5081_v11, %v4923_v53  ;;  %v2588_v31 = vpack.c.bf16 %v2419_v38, %v2418_v19  ;;  %v4917_v48 = vunpack.i.l.bf16 %v6434_v24  ;;  %v2570_v44 = vpack.c.bf16 %v2475_v1, %v2474_v47  ;;  %v1739_v47 = vld [vmem:[#allocation2 + $0x121] sm:$0xff]  ;;  %v1740_v1 = vld [vmem:[#allocation2 + $0x129] sm:$0xff] }
 0x30d   : > { %v2594_v6 = vpack.c.bf16 %v2453_v37, %v2452_v30  ;;  %v4963_v51 = vunpack.i.h.bf16 %v4961_v17  ;;  %v4962_v23 = vunpack.i.l.bf16 %v4961_v17  ;;  %v1846_v30 = vld [vmem:[#allocation2 + $0x32] sm:$0xff]  ;;  %v1847_v11 = vld [vmem:[#allocation2 + $0x3a] sm:$0xff] }
 0x30e   : > { %3078 = vmatmul.mubr.bf16.gmra.mrb[84].mxu1 %v2583_v12  ;;  %v2508_v12 = vsel %vm1147_vm0, %v1615_v28, %v4957_v33  ;;  %v4968_v28 = vunpack.i.h.bf16 %v6472_v43  ;;  %v1620_v33 = vld [vmem:[#allocation2 + $0x170] sm:$0xff] }
 0x30f   : > { %3207 = vmatmul.mubr.bf16.gmra.mrb[100].mxu0 %v2565_v52  ;;  %3085 = vmatprep.mubr.bf16.mxu1 %v2589_v39  ;;  %v2509_v39 = vsel %vm1147_vm0, %v1616_v41, %v4958_v3  ;;  %v4918_v52 = vunpack.i.h.bf16 %v6434_v24  ;;  %v4967_v41 = vunpack.i.l.bf16 %v6472_v43  ;;  %v1619_v24 = vld [vmem:[#allocation2 + $0x168] sm:$0xff]  ;;  %v2476_v0 = vsel %vm1147_vm0, %v1739_v47, %v4962_v23  ;;  %v1849_v47 = vld [vmem:[#allocation2 + $0x52] sm:$0xff] }
 0x310   : > { %3214 = vmatprep.mubr.bf16.mxu0 %v2571_v62  ;;  %v6478_v40 = vpop.permute.xlu0 %4975  ;;  %v6480_v13 = vpop.permute.xlu1 %4970  ;;  %v2576_v53 = vpack.c.bf16 %v2509_v39, %v2508_v12  ;;  %v2420_v38 = vsel %vm1147_vm0, %v1619_v24, %v4917_v48  ;;  %v2477_v43 = vsel %vm1147_vm0, %v1740_v1, %v4963_v51  ;;  %v2511_v12 = vsel %vm1147_vm0, %v1618_v58, %v4968_v28  ;;  %v1848_v28 = vld [vmem:[#allocation2 + $0x4a] sm:$0xff] }
 0x311   : > { %v2421_v17 = vsel %vm1147_vm0, %v1620_v33, %v4918_v52  ;;  %v2510_v37 = vsel %vm1147_vm0, %v1617_v60, %v4967_v41  ;;  %v4973_v51 = vunpack.i.h.bf16 %v6480_v13  ;;  %v4972_v23 = vunpack.i.l.bf16 %v6480_v13 }
 0x312   : > { %v2581_v60 = vpack.c.bf16 %v2511_v12, %v2510_v37  ;;  %v4978_v58 = vunpack.i.h.bf16 %v6478_v40  ;;  %v2527_v12 = vpack.c.bf16 %v1849_v47, %v1848_v28  ;;  %v1854_v28 = vld [vmem:[#allocation2 + $0x92] sm:$0xff]  ;;  %v1811_v47 = vld [vmem:[#allocation2 + $0x188] sm:$0xff] }
 0x314   : > { %v6490_v63 = vpop.permute.xlu0 %4985 }
 0x315   : > { %v6494_v62 = vpop.permute.xlu1 %4980 }
 0x316   : > { %3086 = vmatmul.mubr.bf16.gmra.mrb[88].mxu1 %v2588_v31  ;;  %v2593_v31 = vpack.c.bf16 %v2421_v17, %v2420_v38  ;;  %v1741_v38 = vld [vmem:[#allocation2 + $0x139] sm:$0xff]  ;;  %v1742_v17 = vld [vmem:[#allocation2 + $0x141] sm:$0xff] }
 0x317   : > { %3215 = vmatmul.mubr.bf16.gmra.mrb[104].mxu0 %v2570_v44  ;;  %3093 = vmatprep.mubr.bf16.mxu1 %v2594_v6  ;;  %v2575_v44 = vpack.c.bf16 %v2477_v43, %v2476_v0  ;;  %v2522_v6 = vpack.c.bf16 %v1847_v11, %v1846_v30  ;;  %v2478_v1 = vsel %vm1147_vm0, %v1741_v38, %v4972_v23  ;;  %v1850_v43 = vld [vmem:[#allocation2 + $0x62] sm:$0xff]  ;;  %v1851_v30 = vld [vmem:[#allocation2 + $0x6a] sm:$0xff] }
 0x318   : > { %3222 = vmatprep.mubr.bf16.mxu0 %v2576_v53  ;;  %v6499_v3 = vpop.permute.xlu0 %4995  ;;  %v4977_v53 = vunpack.i.l.bf16 %v6478_v40  ;;  %v2479_v0 = vsel %vm1147_vm0, %v1742_v17, %v4973_v51  ;;  %v2513_v11 = vsel %vm1147_vm0, %v1620_v33, %v4978_v58  ;;  %v4988_v51 = vunpack.i.h.bf16 %v6490_v63  ;;  %v1743_v23 = vld [vmem:[#allocation2 + $0x151] sm:$0xff]  ;;  %v1810_v17 = vld [vmem:[#allocation2 + $0x180] sm:$0xff] }
 0x319   : > { %v6501_v19 = vpop.permute.xlu1 %4990 }
 0x31c   : > { %v3681_v39 = vpop.permute.xlu0 %3680 }
 0x31d   : > { %v3776_v52 = vsel %vm1147_vm0, %v5656_v34, %v3681_v39  ;;  %v6518_v48 = vpop.permute.xlu1 %5000 }
 0x31e   : > { %3808 = vst [vmem:[%s6512_s20] sm:$0xff] %v3776_v52  ;;  %3810 = vst [vmem:[%s6512_s20 + $0x10] sm:$0xff] %v3776_v52  ;;  %3094 = vmatmul.mubr.bf16.gmra.mrb[92].mxu1 %v2593_v31  ;;  %v2580_v31 = vpack.c.bf16 %v2479_v0, %v2478_v1  ;;  %v2532_v52 = vpack.c.bf16 %v1851_v30, %v1850_v43  ;;  %v4997_v30 = vunpack.i.l.bf16 %v6499_v3 }
 0x31f   : > { %3223 = vmatmul.mubr.bf16.gmra.mrb[108].mxu0 %v2575_v44  ;;  %4626 = vmatprep.mubr.msk.bf16.mxu1 %vm1147_vm0, %v2522_v6  ;;  %v4983_v44 = vunpack.i.h.bf16 %v6494_v62  ;;  %v4982_v6 = vunpack.i.l.bf16 %v6494_v62 }
 0x320   : > { %3230 = vmatprep.mubr.bf16.mxu0 %v2581_v60  ;;  %v3685_v34 = vpop.permute.xlu0 %3684  ;;  %v1852_v60 = vld [vmem:[#allocation2 + $0x7a] sm:$0xff] }
 0x321   : > { %v3778_v13 = vsel %vm1147_vm0, %v5676_v50, %v3685_v34  ;;  %v3683_v41 = vpop.permute.xlu1 %3682  ;;  %v2512_v50 = vsel %vm1147_vm0, %v1619_v24, %v4977_v53  ;;  %v1853_v34 = vld [vmem:[#allocation2 + $0x82] sm:$0xff] }
 0x322   : > { %3812 = vst [vmem:[%s6512_s20 + $0x20] sm:$0xff] %v3778_v13  ;;  %3814 = vst [vmem:[%s6512_s20 + $0x30] sm:$0xff] %v3778_v13  ;;  %v3777_v40 = vsel %vm1147_vm0, %v5651_v29, %v3683_v41  ;;  %v2586_v33 = vpack.c.bf16 %v2513_v11, %v2512_v50  ;;  %v2480_v41 = vsel %vm1147_vm0, %v1743_v23, %v4982_v6  ;;  %v1746_v6 = vld [vmem:[#allocation2 + $0x171] sm:$0xff] }
 0x323   : > { %3809 = vst [vmem:[%s6512_s20 + $0x8] sm:$0xff] %v3777_v40  ;;  %3811 = vst [vmem:[%s6512_s20 + $0x18] sm:$0xff] %v3777_v40  ;;  %v2515_v40 = vsel %vm1147_vm0, %v1811_v47, %v4988_v51  ;;  %v2537_v0 = vpack.c.bf16 %v1853_v34, %v1852_v60  ;;  %v1859_v60 = vld [vmem:[#allocation2 + $0xca] sm:$0xff]  ;;  %v1747_v47 = vld [vmem:[#allocation2 + $0x181] sm:$0xff] }
 0x324   : > { %v3689_v37 = vpop.permute.xlu0 %3688 }
 0x325   : > { %v3780_v29 = vsel %vm1147_vm0, %v5696_v8, %v3689_v37  ;;  %v3687_v39 = vpop.permute.xlu1 %3686  ;;  %v4987_v8 = vunpack.i.l.bf16 %v6490_v63  ;;  %v1855_v63 = vld [vmem:[#allocation2 + $0x9a] sm:$0xff] }
 0x326   : > { %3816 = vst [vmem:[%s6512_s20 + $0x40] sm:$0xff] %v3780_v29  ;;  %3818 = vst [vmem:[%s6512_s20 + $0x50] sm:$0xff] %v3780_v29  ;;  %v3779_v24 = vsel %vm1147_vm0, %v5670_v45, %v3687_v39  ;;  %4627 = vmatmul.mubr.msk.bf16.vlgmr.msra.gmra.mrb[96].mxu1 %vm1147_vm0, %v2527_v12  ;;  %v1744_v45 = vld [vmem:[#allocation2 + $0x159] sm:$0xff]  ;;  %v2542_v43 = vpack.c.bf16 %v1855_v63, %v1854_v28  ;;  %v4993_v12 = vunpack.i.h.bf16 %v6501_v19  ;;  %v4992_v29 = vunpack.i.l.bf16 %v6501_v19  ;;  %v1745_v19 = vld [vmem:[#allocation2 + $0x169] sm:$0xff] }
 0x327   : > { %3813 = vst [vmem:[%s6512_s20 + $0x28] sm:$0xff] %v3779_v24  ;;  %3815 = vst [vmem:[%s6512_s20 + $0x38] sm:$0xff] %v3779_v24  ;;  %3231 = vmatmul.mubr.bf16.gmra.mrb[112].mxu0 %v2580_v31  ;;  %4630 = vmatprep.mubr.msk.bf16.mxu1 %vm1147_vm0, %v2532_v52  ;;  %v2481_v38 = vsel %vm1147_vm0, %v1744_v45, %v4983_v44  ;;  %v1812_v52 = vld [vmem:[#allocation2 + $0x198] sm:$0xff]  ;;  %v1856_v24 = vld [vmem:[#allocation2 + $0xaa] sm:$0xff] }
 0x328   : > { %3238 = vmatprep.mubr.bf16.mxu0 %v2586_v33  ;;  %v3693_v62 = vpop.permute.xlu0 %3692  ;;  %v2585_v37 = vpack.c.bf16 %v2481_v38, %v2480_v41  ;;  %v1857_v33 = vld [vmem:[#allocation2 + $0xb2] sm:$0xff]  ;;  %v2516_v51 = vsel %vm1147_vm0, %v1812_v52, %v4997_v30  ;;  %v2482_v23 = vsel %vm1147_vm0, %v1745_v19, %v4992_v29  ;;  %v2483_v45 = vsel %vm1147_vm0, %v1746_v6, %v4993_v12 }
 0x329   : > { %v3782_v58 = vsel %vm1147_vm0, %v5720_v32, %v3693_v62  ;;  %v3691_v53 = vpop.permute.xlu1 %3690  ;;  %v2514_v32 = vsel %vm1147_vm0, %v1810_v17, %v4987_v8  ;;  %v5003_v41 = vunpack.i.h.bf16 %v6518_v48  ;;  %v5002_v38 = vunpack.i.l.bf16 %v6518_v48  ;;  %v1862_v30 = vld [vmem:[#allocation2 + $0xf2] sm:$0xff] }
 0x32a   : > { %3820 = vst [vmem:[%s6512_s20 + $0x60] sm:$0xff] %v3782_v58  ;;  %3822 = vst [vmem:[%s6512_s20 + $0x70] sm:$0xff] %v3782_v58  ;;  %v3781_v13 = vsel %vm1147_vm0, %v5690_v5, %v3691_v53  ;;  %v4998_v5 = vunpack.i.h.bf16 %v6499_v3  ;;  %v2591_v31 = vpack.c.bf16 %v2515_v40, %v2514_v32  ;;  %v1813_v3 = vld [vmem:[#allocation2 + $0x1a0] sm:$0xff]  ;;  %v2547_v53 = vpack.c.bf16 %v1857_v33, %v1856_v24  ;;  %v1748_v40 = vld [vmem:[#allocation2 + $0x189] sm:$0xff] }
 0x32b   : > { %3817 = vst [vmem:[%s6512_s20 + $0x48] sm:$0xff] %v3781_v13  ;;  %3819 = vst [vmem:[%s6512_s20 + $0x58] sm:$0xff] %v3781_v13  ;;  %v2582_v6 = vpack.c.bf16 %v6460_v26, %v6458_v59  ;;  %v7249_v26 = vld [vmem:[#allocation6_spill] sm:$0xff] }
 0x32c   : > { %v3697_v1 = vpop.permute.xlu0 %3696  ;;  %v2517_v8 = vsel %vm1147_vm0, %v1813_v3, %v4998_v5  ;;  %v2485_v5 = vsel %vm1147_vm0, %v1748_v40, %v5003_v41  ;;  %v1874_v24 = vld [vmem:[#allocation2 + $0x182] sm:$0xff]  ;;  %v1875_v33 = vld [vmem:[#allocation2 + $0x18a] sm:$0xff] }
 0x32d   : > { %v3784_v50 = vsel %vm1147_vm0, %v5747_v56, %v3697_v1  ;;  %v3695_v11 = vpop.permute.xlu1 %3694  ;;  %v2596_v34 = vpack.c.bf16 %v2517_v8, %v2516_v51  ;;  %v1860_v1 = vld [vmem:[#allocation2 + $0xda] sm:$0xff]  ;;  %v7250_v8 = vld [vmem:[#allocation11_spill] sm:$0xff] }
 0x32e   : > { %3824 = vst [vmem:[%s6512_s20 + $0x80] sm:$0xff] %v3784_v50  ;;  %3826 = vst [vmem:[%s6512_s20 + $0x90] sm:$0xff] %v3784_v50  ;;  %v3783_v39 = vsel %vm1147_vm0, %v5710_v14, %v3695_v11  ;;  %4631 = vmatmul.mubr.msk.bf16.gmra.mrb[100].mxu1 %vm1147_vm0, %v2537_v0  ;;  %v1861_v0 = vld [vmem:[#allocation2 + $0xe2] sm:$0xff]  ;;  %v1863_v50 = vld [vmem:[#allocation2 + $0xfa] sm:$0xff] }
 0x32f   : > { %3821 = vst [vmem:[%s6512_s20 + $0x68] sm:$0xff] %v3783_v39  ;;  %3823 = vst [vmem:[%s6512_s20 + $0x78] sm:$0xff] %v3783_v39  ;;  %3239 = vmatmul.mubr.bf16.gmra.mrb[116].mxu0 %v2585_v37  ;;  %4634 = vmatprep.mubr.msk.bf16.mxu1 %vm1147_vm0, %v2542_v43  ;;  %v2484_v43 = vsel %vm1147_vm0, %v1747_v47, %v5002_v38  ;;  %v2557_v11 = vpack.c.bf16 %v1861_v0, %v1860_v1 }
 0x330   : > { %3246 = vmatprep.mubr.bf16.mxu0 %v2591_v31  ;;  %v3701_v56 = vpop.permute.xlu0 %3700  ;;  %v2595_v29 = vpack.c.bf16 %v2485_v5, %v2484_v43 }
 0x331   : > { %v3786_v14 = vsel %vm1147_vm0, %v5768_v16, %v3701_v56  ;;  %v3699_v44 = vpop.permute.xlu1 %3698  ;;  %v1858_v16 = vld [vmem:[#allocation2 + $0xc2] sm:$0xff]  ;;  %v2567_v56 = vpack.c.bf16 %v6398_v61, %v6396_v7 }
 0x332   : > { %3828 = vst [vmem:[%s6512_s20 + $0xa0] sm:$0xff] %v3786_v14  ;;  %3830 = vst [vmem:[%s6512_s20 + $0xb0] sm:$0xff] %v3786_v14  ;;  %v3785_v62 = vsel %vm1147_vm0, %v5737_v46, %v3699_v44  ;;  %v2590_v46 = vpack.c.bf16 %v2483_v45, %v2482_v23  ;;  %v2552_v13 = vpack.c.bf16 %v1859_v60, %v1858_v16  ;;  %v7251_v16 = vld [vmem:[#allocation8_spill] sm:$0xff] }
 0x333   : > { %3825 = vst [vmem:[%s6512_s20 + $0x88] sm:$0xff] %v3785_v62  ;;  %3827 = vst [vmem:[%s6512_s20 + $0x98] sm:$0xff] %v3785_v62  ;;  %v2572_v14 = vpack.c.bf16 %v6422_v57, %v6420_v55  ;;  %v2577_v57 = vpack.c.bf16 %v6443_v2, %v6441_v36  ;;  %v7248_v36 = vld [vmem:[#allocation9_spill] sm:$0xff]  ;;  %v2592_v45 = vpack.c.bf16 %v1875_v33, %v1874_v24 }
 0x334   : > { %v3705_v58 = vpop.permute.xlu0 %3704 }
 0x335   : > { %v3788_v28 = vsel %vm1147_vm0, %v5790_v4, %v3705_v58  ;;  %v3703_v63 = vpop.permute.xlu1 %3702  ;;  %v7252_v58 = vld [vmem:[#allocation14_spill] sm:$0xff] }
 0x336   : > { %3832 = vst [vmem:[%s6512_s20 + $0xc0] sm:$0xff] %v3788_v28  ;;  %3834 = vst [vmem:[%s6512_s20 + $0xd0] sm:$0xff] %v3788_v28  ;;  %v3787_v17 = vsel %vm1147_vm0, %v5762_v10, %v3703_v63  ;;  %4635 = vmatmul.mubr.msk.bf16.gmra.mrb[104].mxu1 %vm1147_vm0, %v2547_v53  ;;  %v7253_v53 = vld [vmem:[#allocation15_spill] sm:$0xff]  ;;  %v1876_v28 = vld [vmem:[#allocation2 + $0x19a] sm:$0xff] }
 0x337   : > { %3829 = vst [vmem:[%s6512_s20 + $0xa8] sm:$0xff] %v3787_v17  ;;  %3831 = vst [vmem:[%s6512_s20 + $0xb8] sm:$0xff] %v3787_v17  ;;  %3247 = vmatmul.mubr.bf16.gmra.mrb[120].mxu0 %v2590_v46  ;;  %4638 = vmatprep.mubr.msk.bf16.mxu1 %vm1147_vm0, %v2552_v13  ;;  %v1877_v63 = vld [vmem:[#allocation2 + $0x1a2] sm:$0xff] }
 0x338   : > { %v3709_v4 = vpop.permute.xlu0 %3708  ;;  %3254 = vmatprep.mubr.bf16.mxu0 %v2596_v34  ;;  %v7254_v34 = vpack.c.bf16 %v7252_v58, %v7253_v53  ;;  %v7255_v13 = vld [vmem:[#allocation10_spill] sm:$0xff]  ;;  %v2597_v38 = vpack.c.bf16 %v1877_v63, %v1876_v28 }
 0x339   : > { %v3790_v48 = vsel %vm1147_vm0, %v5815_v27, %v3709_v4  ;;  %v3707_v32 = vpop.permute.xlu1 %3706 }
 0x33a   : > { %3836 = vst [vmem:[%s6512_s20 + $0xe0] sm:$0xff] %v3790_v48  ;;  %3838 = vst [vmem:[%s6512_s20 + $0xf0] sm:$0xff] %v3790_v48  ;;  %v3789_v10 = vsel %vm1147_vm0, %v5784_v42, %v3707_v32  ;;  %v2562_v42 = vpack.c.bf16 %v1863_v50, %v1862_v30 }
 0x33b   : > { %3833 = vst [vmem:[%s6512_s20 + $0xc8] sm:$0xff] %v3789_v10  ;;  %3835 = vst [vmem:[%s6512_s20 + $0xd8] sm:$0xff] %v3789_v10 }
 0x33c   : > { %v3713_v27 = vpop.permute.xlu0 %3712 }
 0x33d   : > { %v3792_v37 = vsel %vm1147_vm0, %v5840_v9, %v3713_v27  ;;  %v3711_v12 = vpop.permute.xlu1 %3710 }
 0x33e   : > { %3840 = vst [vmem:[%s6512_s20 + $0x100] sm:$0xff] %v3792_v37  ;;  %3842 = vst [vmem:[%s6512_s20 + $0x110] sm:$0xff] %v3792_v37  ;;  %v3791_v39 = vsel %vm1147_vm0, %v5809_v25, %v3711_v12  ;;  %4639 = vmatmul.mubr.msk.bf16.gmra.mrb[108].mxu1 %vm1147_vm0, %v2557_v11 }
 0x33f   : > { %3837 = vst [vmem:[%s6512_s20 + $0xe8] sm:$0xff] %v3791_v39  ;;  %3839 = vst [vmem:[%s6512_s20 + $0xf8] sm:$0xff] %v3791_v39  ;;  %3255 = vmatmul.mubr.bf16.gmra.mrb[124].mxu0 %v2595_v29  ;;  %4642 = vmatprep.mubr.msk.bf16.mxu1 %vm1147_vm0, %v2562_v42 }
 0x340   : > { %v3717_v9 = vpop.permute.xlu0 %3716 }
 0x341   : > { %v3794_v31 = vsel %vm1147_vm0, %v5865_v20, %v3717_v9  ;;  %v3715_v52 = vpop.permute.xlu1 %3714 }
 0x342   : > { %3844 = vst [vmem:[%s6512_s20 + $0x120] sm:$0xff] %v3794_v31  ;;  %3846 = vst [vmem:[%s6512_s20 + $0x130] sm:$0xff] %v3794_v31  ;;  %v3793_v25 = vsel %vm1147_vm0, %v5834_v54, %v3715_v52 }
 0x343   : > { %3841 = vst [vmem:[%s6512_s20 + $0x108] sm:$0xff] %v3793_v25  ;;  %3843 = vst [vmem:[%s6512_s20 + $0x118] sm:$0xff] %v3793_v25 }
 0x344   : > { %v3721_v3 = vpop.permute.xlu0 %3720 }
 0x345   : > { %v3796_v19 = vsel %vm1147_vm0, %v5890_v49, %v3721_v3  ;;  %v3719_v20 = vpop.permute.xlu1 %3718  ;;  %v6696_v3 = vld [vmem:[%s7178_s8] ss:$0 sm:$0xff] }
 0x346   : > { %3848 = vst [vmem:[%s6512_s20 + $0x140] sm:$0xff] %v3796_v19  ;;  %3850 = vst [vmem:[%s6512_s20 + $0x150] sm:$0xff] %v3796_v19  ;;  %v3795_v54 = vsel %vm1147_vm0, %v5859_v35, %v3719_v20  ;;  %4643 = vmatmul.mubr.msk.bf16.gmra.mrb[112].mxu1 %vm1147_vm0, %v2567_v56 }
 0x347   : > { %3845 = vst [vmem:[%s6512_s20 + $0x128] sm:$0xff] %v3795_v54  ;;  %3847 = vst [vmem:[%s6512_s20 + $0x138] sm:$0xff] %v3795_v54  ;;  %4646 = vmatprep.mubr.msk.bf16.mxu1 %vm1147_vm0, %v2572_v14 }
 0x348   : > { %v3725_v49 = vpop.permute.xlu0 %3724 }
 0x349   : > { %v3798_v7 = vsel %vm1147_vm0, %v7233_v21, %v3725_v49  ;;  %v3723_v61 = vpop.permute.xlu1 %3722 }
 0x34a   : > { %3852 = vst [vmem:[%s6512_s20 + $0x160] sm:$0xff] %v3798_v7  ;;  %3854 = vst [vmem:[%s6512_s20 + $0x170] sm:$0xff] %v3798_v7  ;;  %v3797_v35 = vsel %vm1147_vm0, %v7234_v15, %v3723_v61 }
 0x34b   : > { %3849 = vst [vmem:[%s6512_s20 + $0x148] sm:$0xff] %v3797_v35  ;;  %3851 = vst [vmem:[%s6512_s20 + $0x158] sm:$0xff] %v3797_v35 }
 0x34c   : > { %v3729_v55 = vpop.permute.xlu0 %3728 }
 0x34d   : > { %v3800_v44 = vsel %vm1147_vm0, %v7235_v22, %v3729_v55  ;;  %v3727_v21 = vpop.permute.xlu1 %3726 }
 0x34e   : > { %3856 = vst [vmem:[%s6512_s20 + $0x180] sm:$0xff] %v3800_v44  ;;  %3858 = vst [vmem:[%s6512_s20 + $0x190] sm:$0xff] %v3800_v44  ;;  %v3799_v15 = vsel %vm1147_vm0, %v7236_v18, %v3727_v21  ;;  %4647 = vmatmul.mubr.msk.bf16.gmra.mrb[116].mxu1 %vm1147_vm0, %v2577_v57 }
 0x34f   : > { %3853 = vst [vmem:[%s6512_s20 + $0x168] sm:$0xff] %v3799_v15  ;;  %3855 = vst [vmem:[%s6512_s20 + $0x178] sm:$0xff] %v3799_v15  ;;  %4650 = vmatprep.mubr.msk.bf16.mxu1 %vm1147_vm0, %v2582_v6 }
 0x350   : > { %v3733_v22 = vpop.permute.xlu0 %3732 }
 0x351   : > { %v3802_v2 = vsel %vm1147_vm0, %v7248_v36, %v3733_v22  ;;  %v3731_v59 = vpop.permute.xlu1 %3730 }
 0x352   : > { %3860 = vst [vmem:[%s6512_s20 + $0x1a0] sm:$0xff] %v3802_v2  ;;  %3862 = vst [vmem:[%s6512_s20 + $0x1b0] sm:$0xff] %v3802_v2  ;;  %v3801_v18 = vsel %vm1147_vm0, %v7249_v26, %v3731_v59 }
 0x353   : > { %3857 = vst [vmem:[%s6512_s20 + $0x188] sm:$0xff] %v3801_v18  ;;  %3859 = vst [vmem:[%s6512_s20 + $0x198] sm:$0xff] %v3801_v18 }
 0x354   : > { %v3737_v51 = vpop.permute.xlu0 %3736 }
 0x355   : > { %v3804_v62 = vsel %vm1147_vm0, %v7250_v8, %v3737_v51  ;;  %v3735_v23 = vpop.permute.xlu1 %3734 }
 0x356   : > { %3864 = vst [vmem:[%s6512_s20 + $0x1c0] sm:$0xff] %v3804_v62  ;;  %3866 = vst [vmem:[%s6512_s20 + $0x1d0] sm:$0xff] %v3804_v62  ;;  %v3803_v60 = vsel %vm1147_vm0, %v7251_v16, %v3735_v23  ;;  %4651 = vmatmul.mubr.msk.bf16.gmra.mrb[120].mxu1 %vm1147_vm0, %v7254_v34 }
 0x357   : > { %3861 = vst [vmem:[%s6512_s20 + $0x1a8] sm:$0xff] %v3803_v60  ;;  %3863 = vst [vmem:[%s6512_s20 + $0x1b8] sm:$0xff] %v3803_v60  ;;  %4654 = vmatprep.mubr.msk.bf16.mxu1 %vm1147_vm0, %v2592_v45 }
 0x359   : > { %v3739_v46 = vpop.permute.xlu1 %3738 }
 0x35a   : > { %v3805_v41 = vsel %vm1147_vm0, %v7255_v13, %v3739_v46 }
 0x35b   : > { %3865 = vst [vmem:[%s6512_s20 + $0x1c8] sm:$0xff] %v3805_v41  ;;  %3867 = vst [vmem:[%s6512_s20 + $0x1d8] sm:$0xff] %v3805_v41 }
 0x35e   : > { %4655 = vmatmul.mubr.msk.bf16.gmra.mrb[124].mxu1 %vm1147_vm0, %v2597_v38 }
 0x379   : > { %v4278_v17 = vpop.f32.mrb[32].mxu1 }
 0x37a   : > { %v4279_v4 = vpop.f32.mrb[33].mxu1 }
 0x37b   : > { %v4280_v47 = vadd.f32 %v4279_v4, %v4278_v17  ;;  %v4281_v48 = vpop.f32.mrb[34].mxu1 }
 0x37c   : > { %v4282_v32 = vpop.f32.mrb[35].mxu1 }
 0x37d   : > { %v4283_v40 = vadd.f32 %v4282_v32, %v4281_v48  ;;  %v2976_v7 = vadd.f32 %v4280_v47, %v6696_v3 }
 0x37f   : > { %v2979_v21 = vadd.f32 %v4283_v40, %v6696_v3 }
 0x381   : > { %v4284_v1 = vpop.f32.mrb[36].mxu1 }
 0x382   : > { %v4285_v0 = vpop.f32.mrb[37].mxu1 }
 0x383   : > { %v4286_v10 = vadd.f32 %v4285_v0, %v4284_v1  ;;  %v4287_v43 = vpop.f32.mrb[38].mxu1 }
 0x384   : > { %v4288_v5 = vpop.f32.mrb[39].mxu1 }
 0x385   : > { %v4289_v30 = vadd.f32 %v4288_v5, %v4287_v43  ;;  %v2984_v33 = vadd.f32 %v4286_v10, %v6696_v3 }
 0x387   : > { %v2987_v16 = vadd.f32 %v4289_v30, %v6696_v3 }
 0x389   : > { %v4290_v50 = vpop.f32.mrb[40].mxu1 }
 0x38a   : > { %v4291_v27 = vpop.f32.mrb[41].mxu1 }
 0x38b   : > { %v4292_v11 = vadd.f32 %v4291_v27, %v4290_v50  ;;  %v4293_v37 = vpop.f32.mrb[42].mxu1 }
 0x38c   : > { %v4294_v12 = vpop.f32.mrb[43].mxu1 }
 0x38d   : > { %v4295_v29 = vadd.f32 %v4294_v12, %v4293_v37  ;;  %v2992_v38 = vadd.f32 %v4292_v11, %v6696_v3 }
 0x38f   : > { %v2995_v40 = vadd.f32 %v4295_v29, %v6696_v3 }
 0x391   : > { %v4296_v42 = vpop.f32.mrb[44].mxu1 }
 0x392   : > { %v4297_v39 = vpop.f32.mrb[45].mxu1 }
 0x393   : > { %v4298_v9 = vadd.f32 %v4297_v39, %v4296_v42  ;;  %v4299_v31 = vpop.f32.mrb[46].mxu1 }
 0x394   : > { %v4300_v52 = vpop.f32.mrb[47].mxu1 }
 0x395   : > { %v4301_v25 = vadd.f32 %v4300_v52, %v4299_v31  ;;  %v3000_v37 = vadd.f32 %v4298_v9, %v6696_v3 }
 0x397   : > { %v3003_v52 = vadd.f32 %v4301_v25, %v6696_v3 }
 0x399   : > { %v4302_v56 = vpop.f32.mrb[48].mxu1 }
 0x39a   : > { %v4390_v19 = vpop.f32.mrb[64].mxu0  ;;  %v4303_v20 = vpop.f32.mrb[49].mxu1 }
 0x39b   : > { %v6698_v14 = vadd.f32 %v4303_v20, %v4302_v56  ;;  %v4391_v54 = vpop.f32.mrb[65].mxu0  ;;  %v4305_v49 = vpop.f32.mrb[50].mxu1 }
 0x39c   : > { %v4392_v61 = vadd.f32 %v4391_v54, %v4390_v19  ;;  %v4393_v35 = vpop.f32.mrb[66].mxu0  ;;  %v4306_v55 = vpop.f32.mrb[51].mxu1 }
 0x39d   : > { %v6701_v57 = vadd.f32 %v4306_v55, %v4305_v49  ;;  %v4394_v44 = vpop.f32.mrb[67].mxu0  ;;  %v3008_v55 = vadd.f32 %v6698_v14, %v6696_v3 }
 0x39e   : > { %v4395_v6 = vadd.f32 %v4394_v44, %v4393_v35  ;;  %v6704_v15 = vadd.f32 %v4392_v61, %v2976_v7 }
 0x3a0   : > { %v6706_v22 = vadd.f32 %v4395_v6, %v2979_v21 }
 0x3a1   : > { %v4308_v36 = vpop.f32.mrb[52].mxu1 }
 0x3a2   : > { %v4396_v2 = vpop.f32.mrb[68].mxu0  ;;  %v4309_v59 = vpop.f32.mrb[53].mxu1 }
 0x3a3   : > { %v6708_v26 = vadd.f32 %v4309_v59, %v4308_v36  ;;  %v4397_v18 = vpop.f32.mrb[69].mxu0  ;;  %v4311_v24 = vpop.f32.mrb[54].mxu1 }
 0x3a4   : > { %v4398_v51 = vadd.f32 %v4397_v18, %v4396_v2  ;;  %v4399_v8 = vpop.f32.mrb[70].mxu0  ;;  %v4312_v62 = vpop.f32.mrb[55].mxu1  ;;  %v3011_v2 = vadd.f32 %v6701_v57, %v6696_v3 }
 0x3a5   : > { %v6711_v23 = vadd.f32 %v4312_v62, %v4311_v24  ;;  %v4400_v45 = vpop.f32.mrb[71].mxu0 }
 0x3a6   : > { %v4401_v60 = vadd.f32 %v4400_v45, %v4399_v8  ;;  %v6714_v58 = vadd.f32 %v4398_v51, %v2984_v33 }
 0x3a8   : > { %v6716_v53 = vadd.f32 %v4401_v60, %v2987_v16  ;;  %v3016_v16 = vadd.f32 %v6708_v26, %v6696_v3 }
 0x3a9   : > { %v4314_v34 = vpop.f32.mrb[56].mxu1 }
 0x3aa   : > { %v4402_v28 = vpop.f32.mrb[72].mxu0  ;;  %v4315_v63 = vpop.f32.mrb[57].mxu1 }
 0x3ab   : > { %v6718_v46 = vadd.f32 %v4315_v63, %v4314_v34  ;;  %v4403_v13 = vpop.f32.mrb[73].mxu0  ;;  %v4317_v41 = vpop.f32.mrb[58].mxu1 }
 0x3ac   : > { %v4404_v17 = vadd.f32 %v4403_v13, %v4402_v28  ;;  %v4405_v4 = vpop.f32.mrb[74].mxu0  ;;  %v4318_v47 = vpop.f32.mrb[59].mxu1  ;;  %v3019_v13 = vadd.f32 %v6711_v23, %v6696_v3 }
 0x3ad   : > { %v6721_v48 = vadd.f32 %v4318_v47, %v4317_v41  ;;  %v4406_v32 = vpop.f32.mrb[75].mxu0 }
 0x3ae   : > { %v4407_v1 = vadd.f32 %v4406_v32, %v4405_v4  ;;  %v6724_v0 = vadd.f32 %v4404_v17, %v2992_v38 }
 0x3b0   : > { %v6726_v10 = vadd.f32 %v4407_v1, %v2995_v40 }
 0x3b1   : > { %v4320_v43 = vpop.f32.mrb[60].mxu1 }
 0x3b2   : > { %v4408_v5 = vpop.f32.mrb[76].mxu0  ;;  %v4321_v30 = vpop.f32.mrb[61].mxu1 }
 0x3b3   : > { %v6728_v50 = vadd.f32 %v4321_v30, %v4320_v43  ;;  %v4409_v27 = vpop.f32.mrb[77].mxu0  ;;  %v4323_v11 = vpop.f32.mrb[62].mxu1  ;;  %v3024_v43 = vadd.f32 %v6718_v46, %v6696_v3 }
 0x3b4   : > { %v4410_v12 = vadd.f32 %v4409_v27, %v4408_v5  ;;  %v4411_v42 = vpop.f32.mrb[78].mxu0  ;;  %v4324_v39 = vpop.f32.mrb[63].mxu1 }
 0x3b5   : > { %v6731_v31 = vadd.f32 %v4324_v39, %v4323_v11  ;;  %v4412_v29 = vpop.f32.mrb[79].mxu0 }
 0x3b6   : > { %v4413_v56 = vadd.f32 %v4412_v29, %v4411_v42  ;;  %v6734_v19 = vadd.f32 %v4410_v12, %v3000_v37  ;;  %v3027_v37 = vadd.f32 %v6721_v48, %v6696_v3 }
 0x3b8   : > { %v6736_v20 = vadd.f32 %v4413_v56, %v3003_v52 }
 0x3b9   : > { %v4326_v54 = vpop.f32.mrb[64].mxu1 }
 0x3ba   : > { %v4414_v49 = vpop.f32.mrb[80].mxu0  ;;  %v4327_v7 = vpop.f32.mrb[65].mxu1 }
 0x3bb   : > { %v6738_v61 = vadd.f32 %v4327_v7, %v4326_v54  ;;  %v4415_v35 = vpop.f32.mrb[81].mxu0  ;;  %v4329_v9 = vpop.f32.mrb[66].mxu1  ;;  %v3032_v7 = vadd.f32 %v6728_v50, %v6696_v3 }
 0x3bc   : > { %v4416_v44 = vadd.f32 %v4415_v35, %v4414_v49  ;;  %v4417_v21 = vpop.f32.mrb[82].mxu0  ;;  %v4330_v6 = vpop.f32.mrb[67].mxu1 }
 0x3bd   : > { %v6742_v36 = vadd.f32 %v4330_v6, %v4329_v9  ;;  %v4418_v25 = vpop.f32.mrb[83].mxu0 }
 0x3be   : > { %v4419_v59 = vadd.f32 %v4418_v25, %v4417_v21  ;;  %v6746_v18 = vadd.f32 %v4416_v44, %v3008_v55  ;;  %v3035_v21 = vadd.f32 %v6731_v31, %v6696_v3 }
 0x3c0   : > { %v6748_v24 = vadd.f32 %v4419_v59, %v3011_v2 }
 0x3c1   : > { %v4332_v33 = vpop.f32.mrb[68].mxu1 }
 0x3c2   : > { %v4420_v51 = vpop.f32.mrb[84].mxu0  ;;  %v4333_v8 = vpop.f32.mrb[69].mxu1 }
 0x3c3   : > { %v6750_v62 = vadd.f32 %v4333_v8, %v4332_v33  ;;  %v4421_v14 = vpop.f32.mrb[85].mxu0  ;;  %v4335_v45 = vpop.f32.mrb[70].mxu1 }
 0x3c4   : > { %v4422_v60 = vadd.f32 %v4421_v14, %v4420_v51  ;;  %v4423_v34 = vpop.f32.mrb[86].mxu0  ;;  %v4336_v28 = vpop.f32.mrb[71].mxu1 }
 0x3c5   : > { %v6754_v63 = vadd.f32 %v4336_v28, %v4335_v45  ;;  %v4424_v57 = vpop.f32.mrb[87].mxu0  ;;  %v3040_v45 = vadd.f32 %v6738_v61, %v6696_v3 }
 0x3c6   : > { %v4425_v41 = vadd.f32 %v4424_v57, %v4423_v34  ;;  %v6758_v38 = vadd.f32 %v4422_v60, %v3016_v16  ;;  %v3043_v57 = vadd.f32 %v6742_v36, %v6696_v3 }
 0x3c8   : > { %v6760_v17 = vadd.f32 %v4425_v41, %v3019_v13 }
 0x3c9   : > { %v4338_v4 = vpop.f32.mrb[72].mxu1 }
 0x3ca   : > { %v4426_v47 = vpop.f32.mrb[88].mxu0  ;;  %v4339_v32 = vpop.f32.mrb[73].mxu1 }
 0x3cb   : > { %v6762_v40 = vadd.f32 %v4339_v32, %v4338_v4  ;;  %v4427_v26 = vpop.f32.mrb[89].mxu0  ;;  %v4341_v1 = vpop.f32.mrb[74].mxu1 }
 0x3cc   : > { %v4428_v5 = vadd.f32 %v4427_v26, %v4426_v47  ;;  %v4429_v30 = vpop.f32.mrb[90].mxu0  ;;  %v4342_v27 = vpop.f32.mrb[75].mxu1 }
 0x3cd   : > { %v6766_v11 = vadd.f32 %v4342_v27, %v4341_v1  ;;  %v4430_v23 = vpop.f32.mrb[91].mxu0 }
 0x3ce   : > { %v4431_v12 = vadd.f32 %v4430_v23, %v4429_v30  ;;  %v6770_v42 = vadd.f32 %v4428_v5, %v3024_v43  ;;  %v3048_v5 = vadd.f32 %v6750_v62, %v6696_v3 }
 0x3d0   : > { %v6772_v39 = vadd.f32 %v4431_v12, %v3027_v37  ;;  %v3051_v12 = vadd.f32 %v6754_v63, %v6696_v3 }
 0x3d1   : > { %v4344_v29 = vpop.f32.mrb[76].mxu1 }
 0x3d2   : > { %v4432_v52 = vpop.f32.mrb[92].mxu0  ;;  %v4345_v56 = vpop.f32.mrb[77].mxu1 }
 0x3d3   : > { %v6774_v54 = vadd.f32 %v4345_v56, %v4344_v29  ;;  %v4433_v46 = vpop.f32.mrb[93].mxu0  ;;  %v4347_v49 = vpop.f32.mrb[78].mxu1 }
 0x3d4   : > { %v4434_v35 = vadd.f32 %v4433_v46, %v4432_v52  ;;  %v4435_v9 = vpop.f32.mrb[94].mxu0  ;;  %v4348_v55 = vpop.f32.mrb[79].mxu1 }
 0x3d5   : > { %v6778_v44 = vadd.f32 %v4348_v55, %v4347_v49  ;;  %v4436_v48 = vpop.f32.mrb[95].mxu0  ;;  %v3056_v55 = vadd.f32 %v6762_v40, %v6696_v3 }
 0x3d6   : > { %v4437_v6 = vadd.f32 %v4436_v48, %v4435_v9  ;;  %v6782_v25 = vadd.f32 %v4434_v35, %v3032_v7 }
 0x3d8   : > { %v6784_v2 = vadd.f32 %v4437_v6, %v3035_v21 }
 0x3d9   : > { %v4350_v59 = vpop.f32.mrb[80].mxu1 }
 0x3da   : > { %v4438_v33 = vpop.f32.mrb[96].mxu0  ;;  %v4351_v51 = vpop.f32.mrb[81].mxu1 }
 0x3db   : > { %v6786_v8 = vadd.f32 %v4351_v51, %v4350_v59  ;;  %v4439_v50 = vpop.f32.mrb[97].mxu0  ;;  %v4353_v14 = vpop.f32.mrb[82].mxu1 }
 0x3dc   : > { %v4440_v16 = vadd.f32 %v4439_v50, %v4438_v33  ;;  %v4441_v60 = vpop.f32.mrb[98].mxu0  ;;  %v4354_v34 = vpop.f32.mrb[83].mxu1  ;;  %v3059_v33 = vadd.f32 %v6766_v11, %v6696_v3 }
 0x3dd   : > { %v6790_v28 = vadd.f32 %v4354_v34, %v4353_v14  ;;  %v4442_v31 = vpop.f32.mrb[99].mxu0 }
 0x3de   : > { %v4443_v13 = vadd.f32 %v4442_v31, %v4441_v60  ;;  %v6794_v41 = vadd.f32 %v4440_v16, %v3040_v45 }
 0x3e0   : > { %v6796_v4 = vadd.f32 %v4443_v13, %v3043_v57  ;;  %v3064_v57 = vadd.f32 %v6774_v54, %v6696_v3 }
 0x3e1   : > { %v4356_v47 = vpop.f32.mrb[84].mxu1 }
 0x3e2   : > { %v4444_v32 = vpop.f32.mrb[100].mxu0  ;;  %v4357_v26 = vpop.f32.mrb[85].mxu1 }
 0x3e3   : > { %v6798_v1 = vadd.f32 %v4357_v26, %v4356_v47  ;;  %v4445_v61 = vpop.f32.mrb[101].mxu0  ;;  %v4359_v43 = vpop.f32.mrb[86].mxu1 }
 0x3e4   : > { %v4446_v30 = vadd.f32 %v4445_v61, %v4444_v32  ;;  %v4447_v27 = vpop.f32.mrb[102].mxu0  ;;  %v4360_v23 = vpop.f32.mrb[87].mxu1  ;;  %v3067_v61 = vadd.f32 %v6778_v44, %v6696_v3 }
 0x3e5   : > { %v6802_v37 = vadd.f32 %v4360_v23, %v4359_v43  ;;  %v4448_v36 = vpop.f32.mrb[103].mxu0 }
 0x3e6   : > { %v4449_v29 = vadd.f32 %v4448_v36, %v4447_v27  ;;  %v6806_v52 = vadd.f32 %v4446_v30, %v3048_v5 }
 0x3e8   : > { %v6808_v56 = vadd.f32 %v4449_v29, %v3051_v12 }
 0x3e9   : > { %v4362_v46 = vpop.f32.mrb[88].mxu1 }
 0x3ea   : > { %v4450_v49 = vpop.f32.mrb[104].mxu0  ;;  %v4363_v7 = vpop.f32.mrb[89].mxu1 }
 0x3eb   : > { %v6810_v35 = vadd.f32 %v4363_v7, %v4362_v46  ;;  %v4451_v62 = vpop.f32.mrb[105].mxu0  ;;  %v4365_v9 = vpop.f32.mrb[90].mxu1 }
 0x3ec   : > { %v4452_v48 = vadd.f32 %v4451_v62, %v4450_v49  ;;  %v4453_v21 = vpop.f32.mrb[106].mxu0  ;;  %v4366_v6 = vpop.f32.mrb[91].mxu1  ;;  %v3072_v49 = vadd.f32 %v6786_v8, %v6696_v3 }
 0x3ed   : > { %v6814_v59 = vadd.f32 %v4366_v6, %v4365_v9  ;;  %v4454_v63 = vpop.f32.mrb[107].mxu0 }
 0x3ee   : > { %v4455_v51 = vadd.f32 %v4454_v63, %v4453_v21  ;;  %v6818_v50 = vadd.f32 %v4452_v48, %v3056_v55 }
 0x3f0   : > { %v6820_v14 = vadd.f32 %v4455_v51, %v3059_v33 }
 0x3f1   : > { %v4368_v45 = vpop.f32.mrb[92].mxu1 }
 0x3f2   : > { %v4456_v16 = vpop.f32.mrb[108].mxu0  ;;  %v4369_v60 = vpop.f32.mrb[93].mxu1 }
 0x3f3   : > { %v6822_v34 = vadd.f32 %v4369_v60, %v4368_v45  ;;  %v4457_v40 = vpop.f32.mrb[109].mxu0  ;;  %v4371_v31 = vpop.f32.mrb[94].mxu1  ;;  %v3080_v45 = vadd.f32 %v6798_v1, %v6696_v3 }
 0x3f4   : > { %v4458_v13 = vadd.f32 %v4457_v40, %v4456_v16  ;;  %v4459_v47 = vpop.f32.mrb[110].mxu0  ;;  %v4372_v32 = vpop.f32.mrb[95].mxu1 }
 0x3f5   : > { %v6826_v26 = vadd.f32 %v4372_v32, %v4371_v31  ;;  %v4460_v11 = vpop.f32.mrb[111].mxu0 }
 0x3f6   : > { %v4461_v43 = vadd.f32 %v4460_v11, %v4459_v47  ;;  %v6830_v5 = vadd.f32 %v4458_v13, %v3064_v57 }
 0x3f8   : > { %v6832_v30 = vadd.f32 %v4461_v43, %v3067_v61 }
 0x3f9   : > { %v4628_v27 = vpop.f32.mrb[96].mxu1 }
 0x3fa   : > { %v4462_v23 = vpop.f32.mrb[112].mxu0  ;;  %v6835_v36 = vadd.f32 %v4628_v27, %v6714_v58  ;;  %v3297_v54 = vpop.f32.mrb[97].mxu1  ;;  %v3088_v27 = vadd.f32 %v6810_v35, %v6696_v3 }
 0x3fb   : > { %v4463_v12 = vpop.f32.mrb[113].mxu0  ;;  %v6838_v29 = vadd.f32 %v3297_v54, %v6704_v15  ;;  %v4629_v46 = vpop.f32.mrb[98].mxu1  ;;  %v3075_v15 = vadd.f32 %v6790_v28, %v6696_v3 }
 0x3fc   : > { %v4464_v44 = vadd.f32 %v4463_v12, %v4462_v23  ;;  %v4465_v7 = vpop.f32.mrb[114].mxu0  ;;  %v6843_v62 = vadd.f32 %v4629_v46, %v6716_v53  ;;  %v3300_v9 = vpop.f32.mrb[99].mxu1  ;;  %3460 = vrot.lane.b32.xlu0 %v6835_v36, %s5091_s17 }
 0x3fd   : > { %v4466_v58 = vpop.f32.mrb[115].mxu0  ;;  %v6848_v55 = vadd.f32 %v3300_v9, %v6706_v22 }
 0x3fe   : > { %v4467_v48 = vadd.f32 %v4466_v58, %v4465_v7  ;;  %3462 = vrot.lane.b32.xlu1 %v6843_v62, %s5091_s17  ;;  %v6854_v8 = vadd.f32 %v4464_v44, %v3072_v49 }
 0x400   : > { %3456 = vrot.lane.b32.xlu0 %v6838_v29, %s5091_s17  ;;  %v6858_v53 = vadd.f32 %v4467_v48, %v3075_v15 }
 0x401   : > { %v4632_v21 = vpop.f32.mrb[100].mxu1 }
 0x402   : > { %v4468_v6 = vpop.f32.mrb[116].mxu0  ;;  %v6861_v63 = vadd.f32 %v4632_v21, %v6734_v19  ;;  %v3313_v22 = vpop.f32.mrb[101].mxu1  ;;  %3458 = vrot.lane.b32.xlu1 %v6848_v55, %s5091_s17  ;;  %v3096_v21 = vadd.f32 %v6822_v34, %v6696_v3 }
 0x403   : > { %v4469_v28 = vpop.f32.mrb[117].mxu0  ;;  %v6866_v33 = vadd.f32 %v3313_v22, %v6724_v0  ;;  %v4633_v51 = vpop.f32.mrb[102].mxu1  ;;  %v3083_v0 = vadd.f32 %v6802_v37, %v6696_v3 }
 0x404   : > { %v4470_v16 = vadd.f32 %v4469_v28, %v4468_v6  ;;  %v4471_v60 = vpop.f32.mrb[118].mxu0  ;;  %v6871_v40 = vadd.f32 %v4633_v51, %v6736_v20  ;;  %v3316_v31 = vpop.f32.mrb[103].mxu1  ;;  %3468 = vrot.lane.b32.xlu0 %v6861_v63, %s5091_s17 }
 0x405   : > { %v4472_v19 = vpop.f32.mrb[119].mxu0  ;;  %v6876_v57 = vadd.f32 %v3316_v31, %v6726_v10 }
 0x406   : > { %v4473_v13 = vadd.f32 %v4472_v19, %v4471_v60  ;;  %3470 = vrot.lane.b32.xlu1 %v6871_v40, %s5091_s17  ;;  %v6882_v1 = vadd.f32 %v4470_v16, %v3080_v45 }
 0x408   : > { %3464 = vrot.lane.b32.xlu0 %v6866_v33, %s5091_s17  ;;  %v6886_v20 = vadd.f32 %v4473_v13, %v3083_v0 }
 0x409   : > { %v4636_v47 = vpop.f32.mrb[104].mxu1 }
 0x40a   : > { %v4474_v32 = vpop.f32.mrb[120].mxu0  ;;  %v6889_v11 = vadd.f32 %v4636_v47, %v6758_v38  ;;  %v3329_v10 = vpop.f32.mrb[105].mxu1  ;;  %3466 = vrot.lane.b32.xlu1 %v6876_v57, %s5091_s17 }
 0x40b   : > { %v4475_v37 = vpop.f32.mrb[121].mxu0  ;;  %v6894_v61 = vadd.f32 %v3329_v10, %v6746_v18  ;;  %v4637_v43 = vpop.f32.mrb[106].mxu1  ;;  %v3091_v18 = vadd.f32 %v6814_v59, %v6696_v3 }
 0x40c   : > { %v4476_v23 = vadd.f32 %v4475_v37, %v4474_v32  ;;  %v4477_v54 = vpop.f32.mrb[122].mxu0  ;;  %v6899_v12 = vadd.f32 %v4637_v43, %v6760_v17  ;;  %v3332_v46 = vpop.f32.mrb[107].mxu1  ;;  %3476 = vrot.lane.b32.xlu0 %v6889_v11, %s5091_s17 }
 0x40d   : > { %v4478_v38 = vpop.f32.mrb[123].mxu0  ;;  %v6904_v49 = vadd.f32 %v3332_v46, %v6748_v24 }
 0x40e   : > { %v4479_v44 = vadd.f32 %v4478_v38, %v4477_v54  ;;  %3478 = vrot.lane.b32.xlu1 %v6899_v12, %s5091_s17  ;;  %v6910_v35 = vadd.f32 %v4476_v23, %v3088_v27 }
 0x410   : > { %3472 = vrot.lane.b32.xlu0 %v6894_v61, %s5091_s17  ;;  %v6914_v17 = vadd.f32 %v4479_v44, %v3091_v18 }
 0x411   : > { %v4640_v7 = vpop.f32.mrb[108].mxu1 }
 0x412   : > { %v4480_v9 = vpop.f32.mrb[124].mxu0  ;;  %v6917_v58 = vadd.f32 %v4640_v7, %v6782_v25  ;;  %v3345_v24 = vpop.f32.mrb[109].mxu1  ;;  %3474 = vrot.lane.b32.xlu1 %v6904_v49, %s5091_s17  ;;  %v7257_v7 = vld [vmem:[#allocation12_spill] sm:$0xff] }
 0x413   : > { %v4481_v59 = vpop.f32.mrb[125].mxu0  ;;  %v6922_v15 = vadd.f32 %v3345_v24, %v6770_v42  ;;  %v4641_v48 = vpop.f32.mrb[110].mxu1  ;;  %v3099_v42 = vadd.f32 %v6826_v26, %v6696_v3 }
 0x414   : > { %v4482_v6 = vadd.f32 %v4481_v59, %v4480_v9  ;;  %v4483_v22 = vpop.f32.mrb[126].mxu0  ;;  %v6927_v28 = vadd.f32 %v4641_v48, %v6784_v2  ;;  %v3348_v51 = vpop.f32.mrb[111].mxu1  ;;  %3484 = vrot.lane.b32.xlu0 %v6917_v58, %s5091_s17 }
 0x415   : > { %v4484_v25 = vpop.f32.mrb[127].mxu0  ;;  %v6932_v45 = vadd.f32 %v3348_v51, %v6772_v39 }
 0x416   : > { %v4485_v16 = vadd.f32 %v4484_v25, %v4483_v22  ;;  %3486 = vrot.lane.b32.xlu1 %v6927_v28, %s5091_s17  ;;  %v3257_v34 = vadd.f32 %v4482_v6, %v3096_v21 }
 0x418   : > { %3480 = vrot.lane.b32.xlu0 %v6922_v15, %s5091_s17  ;;  %v3260_v2 = vadd.f32 %v4485_v16, %v3099_v42 }
 0x419   : > { %v4644_v60 = vpop.f32.mrb[112].mxu1 }
 0x41a   : > { %v6941_v31 = vadd.f32 %v4644_v60, %v6806_v52  ;;  %v3361_v19 = vpop.f32.mrb[113].mxu1  ;;  %3482 = vrot.lane.b32.xlu1 %v6932_v45, %s5091_s17 }
 0x41b   : > { %v6946_v39 = vadd.f32 %v3361_v19, %v6794_v41  ;;  %v4645_v3 = vpop.f32.mrb[114].mxu1 }
 0x41c   : > { %v6949_v26 = vadd.f32 %v4645_v3, %v6808_v56  ;;  %v3364_v0 = vpop.f32.mrb[115].mxu1  ;;  %3492 = vrot.lane.b32.xlu0 %v6941_v31, %s5091_s17 }
 0x41d   : > { %v6954_v13 = vadd.f32 %v3364_v0, %v6796_v4 }
 0x41e   : > { %3494 = vrot.lane.b32.xlu1 %v6949_v26, %s5091_s17 }
 0x420   : > { %3488 = vrot.lane.b32.xlu0 %v6946_v39, %s5091_s17 }
 0x421   : > { %v4648_v52 = vpop.f32.mrb[116].mxu1 }
 0x422   : > { %v6961_v41 = vadd.f32 %v4648_v52, %v6830_v5  ;;  %v3377_v47 = vpop.f32.mrb[117].mxu1  ;;  %3490 = vrot.lane.b32.xlu1 %v6954_v13, %s5091_s17 }
 0x423   : > { %v6966_v56 = vadd.f32 %v3377_v47, %v6818_v50  ;;  %v4649_v32 = vpop.f32.mrb[118].mxu1 }
 0x424   : > { %v6969_v4 = vadd.f32 %v4649_v32, %v6832_v30  ;;  %v3380_v10 = vpop.f32.mrb[119].mxu1  ;;  %3500 = vrot.lane.b32.xlu0 %v6961_v41, %s5091_s17 }
 0x425   : > { %v6974_v37 = vadd.f32 %v3380_v10, %v6820_v14 }
 0x426   : > { %3502 = vrot.lane.b32.xlu1 %v6969_v4, %s5091_s17 }
 0x428   : > { %3496 = vrot.lane.b32.xlu0 %v6966_v56, %s5091_s17 }
 0x429   : > { %v4652_v5 = vpop.f32.mrb[120].mxu1 }
 0x42a   : > { %v6981_v50 = vadd.f32 %v4652_v5, %v6882_v1  ;;  %v3393_v43 = vpop.f32.mrb[121].mxu1  ;;  %3498 = vrot.lane.b32.xlu1 %v6974_v37, %s5091_s17 }
 0x42b   : > { %v6986_v30 = vadd.f32 %v3393_v43, %v6854_v8  ;;  %v4653_v27 = vpop.f32.mrb[122].mxu1 }
 0x42c   : > { %v6989_v14 = vadd.f32 %v4653_v27, %v6886_v20  ;;  %v3396_v23 = vpop.f32.mrb[123].mxu1  ;;  %3508 = vrot.lane.b32.xlu0 %v6981_v50, %s5091_s17 }
 0x42d   : > { %v6994_v54 = vadd.f32 %v3396_v23, %v6858_v53 }
 0x42e   : > { %3510 = vrot.lane.b32.xlu1 %v6989_v14, %s5091_s17 }
 0x430   : > { %3504 = vrot.lane.b32.xlu0 %v6986_v30, %s5091_s17 }
 0x431   : > { %v4656_v8 = vpop.f32.mrb[124].mxu1 }
 0x432   : > { %v7000_v1 = vadd.f32 %v4656_v8, %v3257_v34  ;;  %v3409_v46 = vpop.f32.mrb[125].mxu1  ;;  %3506 = vrot.lane.b32.xlu1 %v6994_v54, %s5091_s17 }
 0x433   : > { %v7005_v20 = vadd.f32 %v3409_v46, %v6910_v35  ;;  %v4657_v38 = vpop.f32.mrb[126].mxu1  ;;  %v7256_v35 = vld [vmem:[#allocation13_spill] sm:$0xff] }
 0x434   : > { %v7007_v53 = vadd.f32 %v4657_v38, %v3260_v2  ;;  %v3412_v18 = vpop.f32.mrb[127].mxu1  ;;  %3516 = vrot.lane.b32.xlu0 %v7000_v1, %s5091_s17 }
 0x435   : > { %v7012_v44 = vadd.f32 %v3412_v18, %v6914_v17 }
 0x436   : > { %3518 = vrot.lane.b32.xlu1 %v7007_v53, %s5091_s17 }
 0x438   : > { %3512 = vrot.lane.b32.xlu0 %v7005_v20, %s5091_s17 }
 0x43a   : > { %3514 = vrot.lane.b32.xlu1 %v7012_v44, %s5091_s17 }
 0x43c   : > { %3740 = vrot.lane.b32.xlu0 %v7256_v35, %s5091_s17 }
 0x43e   : > { %3742 = vrot.lane.b32.xlu1 %v7257_v7, %s5091_s17 }
 0x46e   : > { %v3461_v17 = vpop.permute.xlu0 %3460 }
 0x46f   : > { %v3554_v9 = vsel %vm1147_vm0, %v6835_v36, %v3461_v17 }
 0x470   : > { %3588 = vst [vmem:[%s7029_s25 + $0x20] sm:$0xff] %v3554_v9  ;;  %3590 = vst [vmem:[%s7029_s25 + $0x30] sm:$0xff] %v3554_v9  ;;  %v3463_v24 = vpop.permute.xlu1 %3462 }
 0x471   : > { %v3555_v59 = vsel %vm1147_vm0, %v6843_v62, %v3463_v24 }
 0x472   : > { %3589 = vst [vmem:[%s7029_s25 + $0x28] sm:$0xff] %v3555_v59  ;;  %3591 = vst [vmem:[%s7029_s25 + $0x38] sm:$0xff] %v3555_v59  ;;  %v3457_v48 = vpop.permute.xlu0 %3456 }
 0x473   : > { %v3552_v21 = vsel %vm1147_vm0, %v6838_v29, %v3457_v48 }
 0x474   : > { %3584 = vst [vmem:[%s7029_s25] sm:$0xff] %v3552_v21  ;;  %3586 = vst [vmem:[%s7029_s25 + $0x10] sm:$0xff] %v3552_v21  ;;  %v3459_v36 = vpop.permute.xlu1 %3458 }
 0x475   : > { %v3553_v6 = vsel %vm1147_vm0, %v6848_v55, %v3459_v36 }
 0x476   : > { %3585 = vst [vmem:[%s7029_s25 + $0x8] sm:$0xff] %v3553_v6  ;;  %3587 = vst [vmem:[%s7029_s25 + $0x18] sm:$0xff] %v3553_v6  ;;  %v3469_v62 = vpop.permute.xlu0 %3468 }
 0x477   : > { %v3558_v22 = vsel %vm1147_vm0, %v6861_v63, %v3469_v62 }
 0x478   : > { %3596 = vst [vmem:[%s7029_s25 + $0x60] sm:$0xff] %v3558_v22  ;;  %3598 = vst [vmem:[%s7029_s25 + $0x70] sm:$0xff] %v3558_v22  ;;  %v3471_v29 = vpop.permute.xlu1 %3470 }
 0x479   : > { %v3559_v51 = vsel %vm1147_vm0, %v6871_v40, %v3471_v29 }
 0x47a   : > { %3597 = vst [vmem:[%s7029_s25 + $0x68] sm:$0xff] %v3559_v51  ;;  %3599 = vst [vmem:[%s7029_s25 + $0x78] sm:$0xff] %v3559_v51  ;;  %v3465_v55 = vpop.permute.xlu0 %3464 }
 0x47b   : > { %v3556_v25 = vsel %vm1147_vm0, %v6866_v33, %v3465_v55 }
 0x47c   : > { %3592 = vst [vmem:[%s7029_s25 + $0x40] sm:$0xff] %v3556_v25  ;;  %3594 = vst [vmem:[%s7029_s25 + $0x50] sm:$0xff] %v3556_v25  ;;  %v3467_v63 = vpop.permute.xlu1 %3466 }
 0x47d   : > { %v3557_v42 = vsel %vm1147_vm0, %v6876_v57, %v3467_v63 }
 0x47e   : > { %3593 = vst [vmem:[%s7029_s25 + $0x48] sm:$0xff] %v3557_v42  ;;  %3595 = vst [vmem:[%s7029_s25 + $0x58] sm:$0xff] %v3557_v42  ;;  %v3477_v40 = vpop.permute.xlu0 %3476 }
 0x47f   : > { %v3562_v16 = vsel %vm1147_vm0, %v6889_v11, %v3477_v40 }
 0x480   : > { %3604 = vst [vmem:[%s7029_s25 + $0xa0] sm:$0xff] %v3562_v16  ;;  %3606 = vst [vmem:[%s7029_s25 + $0xb0] sm:$0xff] %v3562_v16  ;;  %v3479_v33 = vpop.permute.xlu1 %3478 }
 0x481   : > { %v3563_v34 = vsel %vm1147_vm0, %v6899_v12, %v3479_v33 }
 0x482   : > { %3605 = vst [vmem:[%s7029_s25 + $0xa8] sm:$0xff] %v3563_v34  ;;  %3607 = vst [vmem:[%s7029_s25 + $0xb8] sm:$0xff] %v3563_v34  ;;  %v3473_v57 = vpop.permute.xlu0 %3472 }
 0x483   : > { %v3560_v2 = vsel %vm1147_vm0, %v6894_v61, %v3473_v57 }
 0x484   : > { %3600 = vst [vmem:[%s7029_s25 + $0x80] sm:$0xff] %v3560_v2  ;;  %3602 = vst [vmem:[%s7029_s25 + $0x90] sm:$0xff] %v3560_v2  ;;  %v3475_v11 = vpop.permute.xlu1 %3474 }
 0x485   : > { %v3561_v60 = vsel %vm1147_vm0, %v6904_v49, %v3475_v11 }
 0x486   : > { %3601 = vst [vmem:[%s7029_s25 + $0x88] sm:$0xff] %v3561_v60  ;;  %3603 = vst [vmem:[%s7029_s25 + $0x98] sm:$0xff] %v3561_v60  ;;  %v3485_v12 = vpop.permute.xlu0 %3484 }
 0x487   : > { %v3566_v19 = vsel %vm1147_vm0, %v6917_v58, %v3485_v12 }
 0x488   : > { %3612 = vst [vmem:[%s7029_s25 + $0xe0] sm:$0xff] %v3566_v19  ;;  %3614 = vst [vmem:[%s7029_s25 + $0xf0] sm:$0xff] %v3566_v19  ;;  %v3487_v61 = vpop.permute.xlu1 %3486 }
 0x489   : > { %v3567_v3 = vsel %vm1147_vm0, %v6927_v28, %v3487_v61 }
 0x48a   : > { %3613 = vst [vmem:[%s7029_s25 + $0xe8] sm:$0xff] %v3567_v3  ;;  %3615 = vst [vmem:[%s7029_s25 + $0xf8] sm:$0xff] %v3567_v3  ;;  %v3481_v49 = vpop.permute.xlu0 %3480 }
 0x48b   : > { %v3564_v0 = vsel %vm1147_vm0, %v6922_v15, %v3481_v49 }
 0x48c   : > { %3608 = vst [vmem:[%s7029_s25 + $0xc0] sm:$0xff] %v3564_v0  ;;  %3610 = vst [vmem:[%s7029_s25 + $0xd0] sm:$0xff] %v3564_v0  ;;  %v3483_v58 = vpop.permute.xlu1 %3482 }
 0x48d   : > { %v3565_v52 = vsel %vm1147_vm0, %v6932_v45, %v3483_v58 }
 0x48e   : > { %3609 = vst [vmem:[%s7029_s25 + $0xc8] sm:$0xff] %v3565_v52  ;;  %3611 = vst [vmem:[%s7029_s25 + $0xd8] sm:$0xff] %v3565_v52  ;;  %v3493_v28 = vpop.permute.xlu0 %3492 }
 0x48f   : > { %v3570_v47 = vsel %vm1147_vm0, %v6941_v31, %v3493_v28 }
 0x490   : > { %3620 = vst [vmem:[%s7029_s25 + $0x120] sm:$0xff] %v3570_v47  ;;  %3622 = vst [vmem:[%s7029_s25 + $0x130] sm:$0xff] %v3570_v47  ;;  %v3495_v15 = vpop.permute.xlu1 %3494 }
 0x491   : > { %v3571_v32 = vsel %vm1147_vm0, %v6949_v26, %v3495_v15 }
 0x492   : > { %3621 = vst [vmem:[%s7029_s25 + $0x128] sm:$0xff] %v3571_v32  ;;  %3623 = vst [vmem:[%s7029_s25 + $0x138] sm:$0xff] %v3571_v32  ;;  %v3489_v45 = vpop.permute.xlu0 %3488 }
 0x493   : > { %v3568_v10 = vsel %vm1147_vm0, %v6946_v39, %v3489_v45 }
 0x494   : > { %3616 = vst [vmem:[%s7029_s25 + $0x100] sm:$0xff] %v3568_v10  ;;  %3618 = vst [vmem:[%s7029_s25 + $0x110] sm:$0xff] %v3568_v10  ;;  %v3491_v31 = vpop.permute.xlu1 %3490 }
 0x495   : > { %v3569_v5 = vsel %vm1147_vm0, %v6954_v13, %v3491_v31 }
 0x496   : > { %3617 = vst [vmem:[%s7029_s25 + $0x108] sm:$0xff] %v3569_v5  ;;  %3619 = vst [vmem:[%s7029_s25 + $0x118] sm:$0xff] %v3569_v5  ;;  %v3501_v26 = vpop.permute.xlu0 %3500 }
 0x497   : > { %v3574_v43 = vsel %vm1147_vm0, %v6961_v41, %v3501_v26 }
 0x498   : > { %3628 = vst [vmem:[%s7029_s25 + $0x160] sm:$0xff] %v3574_v43  ;;  %3630 = vst [vmem:[%s7029_s25 + $0x170] sm:$0xff] %v3574_v43  ;;  %v3503_v39 = vpop.permute.xlu1 %3502 }
 0x499   : > { %v3575_v27 = vsel %vm1147_vm0, %v6969_v4, %v3503_v39 }
 0x49a   : > { %3629 = vst [vmem:[%s7029_s25 + $0x168] sm:$0xff] %v3575_v27  ;;  %3631 = vst [vmem:[%s7029_s25 + $0x178] sm:$0xff] %v3575_v27  ;;  %v3497_v13 = vpop.permute.xlu0 %3496 }
 0x49b   : > { %v3572_v23 = vsel %vm1147_vm0, %v6966_v56, %v3497_v13 }
 0x49c   : > { %3624 = vst [vmem:[%s7029_s25 + $0x140] sm:$0xff] %v3572_v23  ;;  %3626 = vst [vmem:[%s7029_s25 + $0x150] sm:$0xff] %v3572_v23  ;;  %v3499_v41 = vpop.permute.xlu1 %3498 }
 0x49d   : > { %v3573_v8 = vsel %vm1147_vm0, %v6974_v37, %v3499_v41 }
 0x49e   : > { %3625 = vst [vmem:[%s7029_s25 + $0x148] sm:$0xff] %v3573_v8  ;;  %3627 = vst [vmem:[%s7029_s25 + $0x158] sm:$0xff] %v3573_v8  ;;  %v3509_v4 = vpop.permute.xlu0 %3508 }
 0x49f   : > { %v3578_v46 = vsel %vm1147_vm0, %v6981_v50, %v3509_v4 }
 0x4a0   : > { %3636 = vst [vmem:[%s7029_s25 + $0x1a0] sm:$0xff] %v3578_v46  ;;  %3638 = vst [vmem:[%s7029_s25 + $0x1b0] sm:$0xff] %v3578_v46  ;;  %v3511_v56 = vpop.permute.xlu1 %3510 }
 0x4a1   : > { %v3579_v38 = vsel %vm1147_vm0, %v6989_v14, %v3511_v56 }
 0x4a2   : > { %3637 = vst [vmem:[%s7029_s25 + $0x1a8] sm:$0xff] %v3579_v38  ;;  %3639 = vst [vmem:[%s7029_s25 + $0x1b8] sm:$0xff] %v3579_v38  ;;  %v3505_v37 = vpop.permute.xlu0 %3504 }
 0x4a3   : > { %v3576_v18 = vsel %vm1147_vm0, %v6986_v30, %v3505_v37 }
 0x4a4   : > { %3632 = vst [vmem:[%s7029_s25 + $0x180] sm:$0xff] %v3576_v18  ;;  %3634 = vst [vmem:[%s7029_s25 + $0x190] sm:$0xff] %v3576_v18  ;;  %v3507_v50 = vpop.permute.xlu1 %3506 }
 0x4a5   : > { %v3577_v17 = vsel %vm1147_vm0, %v6994_v54, %v3507_v50 }
 0x4a6   : > { %3633 = vst [vmem:[%s7029_s25 + $0x188] sm:$0xff] %v3577_v17  ;;  %3635 = vst [vmem:[%s7029_s25 + $0x198] sm:$0xff] %v3577_v17  ;;  %v3517_v14 = vpop.permute.xlu0 %3516 }
 0x4a7   : > { %v3582_v9 = vsel %vm1147_vm0, %v7000_v1, %v3517_v14 }
 0x4a8   : > { %3644 = vst [vmem:[%s7029_s25 + $0x1e0] sm:$0xff] %v3582_v9  ;;  %3646 = vst [vmem:[%s7029_s25 + $0x1f0] sm:$0xff] %v3582_v9  ;;  %v3519_v30 = vpop.permute.xlu1 %3518 }
 0x4a9   : > { %v3583_v24 = vsel %vm1147_vm0, %v7007_v53, %v3519_v30 }
 0x4aa   : > { %3645 = vst [vmem:[%s7029_s25 + $0x1e8] sm:$0xff] %v3583_v24  ;;  %3647 = vst [vmem:[%s7029_s25 + $0x1f8] sm:$0xff] %v3583_v24  ;;  %v3513_v54 = vpop.permute.xlu0 %3512 }
 0x4ab   : > { %v3580_v59 = vsel %vm1147_vm0, %v7005_v20, %v3513_v54 }
 0x4ac   : > { %3640 = vst [vmem:[%s7029_s25 + $0x1c0] sm:$0xff] %v3580_v59  ;;  %3642 = vst [vmem:[%s7029_s25 + $0x1d0] sm:$0xff] %v3580_v59  ;;  %v3515_v48 = vpop.permute.xlu1 %3514 }
 0x4ad   : > { %v3581_v1 = vsel %vm1147_vm0, %v7012_v44, %v3515_v48 }
 0x4ae   : > { %3641 = vst [vmem:[%s7029_s25 + $0x1c8] sm:$0xff] %v3581_v1  ;;  %3643 = vst [vmem:[%s7029_s25 + $0x1d8] sm:$0xff] %v3581_v1  ;;  %v3741_v21 = vpop.permute.xlu0 %3740 }
 0x4af   : > { %v3806_v53 = vsel %vm1147_vm0, %v7256_v35, %v3741_v21 }
 0x4b0   : > { %3868 = vst [vmem:[%s6512_s20 + $0x1e0] sm:$0xff] %v3806_v53  ;;  %3870 = vst [vmem:[%s6512_s20 + $0x1f0] sm:$0xff] %v3806_v53  ;;  %v3743_v36 = vpop.permute.xlu1 %3742 }
 0x4b1   : > { %v3807_v6 = vsel %vm1147_vm0, %v7257_v7, %v3743_v36 }
 0x4b2   : > { %3869 = vst [vmem:[%s6512_s20 + $0x1e8] sm:$0xff] %v3807_v6  ;;  %3871 = vst [vmem:[%s6512_s20 + $0x1f8] sm:$0xff] %v3807_v6 }
 0x4b3 PF: > { %s21_s13 = sadd.s32 1, %s5088_s13  }
 0x4b4   : > { %p18_p4 = scmp.ge.s32.totalorder %s21_s13, 4  }
 0x4b6   :  { %20 = sbr.rel (!%p18_p4) target bundleno = 1 (0x1), region = 103 }

</bundles_post_ra>
